<compile_context>
chip_gen: v7x
topology: tpu7x:2x2x1
jax: 0.10.0
libtpu: 0.0.40
codegen_flags: <defaults>
</compile_context>

<pallas_src>
import math

import jax
import jax.numpy as jnp
from jax.experimental import pallas as pl
from jax.experimental.pallas import tpu as pltpu

# ----------------------- configuration (small but consistent) -----------------------
B = 2                    # batch size
S = 316                  # context set size (hard-coded as 316 in the PyTorch expand())
EMBED_DIM = 34           # MultiheadAttention embed_dim => context_x feat dim == target_x width
NUM_HEADS = 2
HEAD_DIM = EMBED_DIM // NUM_HEADS        # 17
CTX_Y_DIM = 1
ENCODER_SIZES = [EMBED_DIM + CTX_Y_DIM, 64, 32]   # encoder_sizes
NUM_DENSE = 13
NUM_SPARSE = 21          # 13 + 21 == 34 == target_x width (must match attention key dim)
VOC_SIZE = 50
EMB_DIM = 8              # embedding_dim
REP_SIZE = 16            # representation_size
HIDDEN_UNITS = [32, 16]  # decoder DNN hidden units
SIMPLE_MLP_HIDDEN = 64


def _full_spec(a):
    """Full-array block (single grid point): whole tensor resident in VMEM."""
    nd = a.ndim
    return pl.BlockSpec(tuple(a.shape), lambda i, _nd=nd: (0,) * _nd)


# ------------------------------ fused encoder kernel ---------------------------------
def _encoder_kernel(cx_ref, cy_ref, mask_ref, pool_ref,
                    w0x_ref, w0y_ref, b0_ref,
                    w1_ref, b1_ref,
                    wv_ref, bv_ref,
                    wo_ref, bo_ref,
                    wm0_ref, bm0_ref,
                    wm1_ref, bm1_ref,
                    rep_ref):
    mask = mask_ref[...]                                   # (B*S, 1)
    cxm = cx_ref[...] * mask                               # masked context_x
    cym = cy_ref[...] * mask                               # masked context_y
    # enc_l0 on the concatenated [context_x, context_y]: concat folded into a
    # weight row-split (W0 = [W0x; W0y]) to avoid building a 35-wide tensor.
    h = jnp.dot(cxm, w0x_ref[...], preferred_element_type=jnp.float32)
    h = h + cym * w0y_ref[...] + b0_ref[...]
    h = jnp.maximum(h, 0.0)                                # (B*S, 64)
    # per-batch mean over the context set as a pooling matmul (B, B*S) @ (B*S, 64)
    hm = jnp.dot(pool_ref[...], h, preferred_element_type=jnp.float32)          # (B, 64)
    # out_linear commutes with the mean (affine): mean(out_3d) = mean(h) @ W1 + b1
    out_mean = jnp.dot(hm, w1_ref[...], preferred_element_type=jnp.float32) + b1_ref[...]
    # Attention: keys are a broadcast of a single target row, so softmax is uniform
    # 1/S and the multi-head output is exactly out_proj(V_proj(mean_S(out_3d))).
    v = jnp.dot(out_mean, wv_ref[...], preferred_element_type=jnp.float32) + bv_ref[...]
    a = jnp.dot(v, wo_ref[...], preferred_element_type=jnp.float32) + bo_ref[...]
    # SimpleMLP (assumed 34 -> 64 -> REP_SIZE); mean over S of identical rows == row.
    m = jnp.maximum(
        jnp.dot(a, wm0_ref[...], preferred_element_type=jnp.float32) + bm0_ref[...], 0.0)
    rep = jnp.dot(m, wm1_ref[...], preferred_element_type=jnp.float32) + bm1_ref[...]
    rep_ref[...] = rep.astype(rep_ref.dtype)


def encoder_fused(p, context_x, context_y, mask_matrix, target_x):
    del target_x  # W_q / W_k (and hence target_x) drop out exactly -- see kernel comment.
    b, s, _ = context_x.shape
    cx = context_x.reshape(b * s, EMBED_DIM)
    cy = context_y.reshape(b * s, CTX_Y_DIM)
    mask = mask_matrix.reshape(b * s, 1)
    # pooling matrix: pool[b, b*S + j] = 1/S  -> per-batch mean via one matmul
    pool = (jnp.arange(b)[:, None] ==
            (jnp.arange(b * s)[None, :] // s)).astype(jnp.float32) / float(s)

    w0, b0 = p["enc_l0"]
    w1, b1 = p["enc_out"]
    wv, bv = p["attn_v"]
    wo, bo = p["attn_o"]
    wm0, bm0 = p["mlp_0"]
    wm1, bm1 = p["mlp_1"]

    args = (
        cx, cy, mask, pool,
        w0[:EMBED_DIM], w0[EMBED_DIM:], b0.reshape(1, -1),
        w1, b1.reshape(1, -1),
        wv, bv.reshape(1, -1),
        wo, bo.reshape(1, -1),
        wm0, bm0.reshape(1, -1),
        wm1, bm1.reshape(1, -1),
    )
    return pl.pallas_call(
        _encoder_kernel,
        out_shape=jax.ShapeDtypeStruct((b, REP_SIZE), jnp.float32),
        grid=(1,),
        in_specs=[_full_spec(a) for a in args],
        out_specs=pl.BlockSpec((b, REP_SIZE), lambda i: (0, 0)),
        compiler_params=pltpu.CompilerParams(dimension_semantics=("arbitrary",)),
    )(*args)


# ------------------------------ fused decoder kernel ---------------------------------
def _decoder_kernel(dense_ref, rep_ref, emb1_ref, emb2f_ref, emb2_ref, pool_ref,
                    wf1d_ref, wf1r_ref, bf1_ref,
                    wd0e_ref, wd0d_ref, wd0r_ref, bd0_ref,
                    wd1_ref, bd1_ref,
                    wfin_ref, bfin_ref,
                    out_ref):
    dense = dense_ref[...]        # (B, 13)
    rep = rep_ref[...]            # (B, REP)
    emb1 = emb1_ref[...]          # (B, F)   first-order sparse embeddings
    emb2f = emb2f_ref[...]        # (B, F*E) second-order embeddings, flattened
    emb2 = emb2_ref[...]          # (B*F, E) second-order embeddings, stacked
    pool = pool_ref[...]          # (B, B*F) per-batch field-sum matrix

    # FM first order
    fm_1st_sparse = jnp.sum(emb1, axis=-1, keepdims=True)                         # (B, 1)
    fm_1st_dense = (jnp.dot(dense, wf1d_ref[...], preferred_element_type=jnp.float32)
                    + jnp.dot(rep, wf1r_ref[...], preferred_element_type=jnp.float32)
                    + bf1_ref[...])                                                # (B, 1)

    # FM second order: 0.5 * sum((sum_f e)^2 - sum_f e^2)
    sum_embed = jnp.dot(pool, emb2, preferred_element_type=jnp.float32)            # (B, E)
    sum_sq = jnp.dot(pool, emb2 * emb2, preferred_element_type=jnp.float32)        # (B, E)
    fm_2nd = 0.5 * jnp.sum(sum_embed * sum_embed - sum_sq, axis=-1, keepdims=True)  # (B, 1)

    # DNN on [emb2_flat, dense, representation]; concat folded into weight row-splits.
    d = (jnp.dot(emb2f, wd0e_ref[...], preferred_element_type=jnp.float32)
         + jnp.dot(dense, wd0d_ref[...], preferred_element_type=jnp.float32)
         + jnp.dot(rep, wd0r_ref[...], preferred_element_type=jnp.float32)
         + bd0_ref[...])
    d = jnp.maximum(d, 0.0)                                                        # (B, 32)
    d = jnp.maximum(
        jnp.dot(d, wd1_ref[...], preferred_element_type=jnp.float32) + bd1_ref[...], 0.0)
    dnn_out = jnp.dot(d, wfin_ref[...], preferred_element_type=jnp.float32) + bfin_ref[...]

    out_ref[...] = (fm_1st_sparse + fm_1st_dense + fm_2nd + dnn_out).astype(out_ref.dtype)


def decoder_fused(p, representation, target_x):
    b = target_x.shape[0]
    dense = target_x[:, :NUM_DENSE]
    sparse_in = target_x[:, NUM_DENSE:].astype(jnp.int32)       # (B, F)

    # Embedding gathers stay in plain JAX (tiny tables; a gridded gather kernel
    # would be pure launch overhead).
    feat_idx = jnp.arange(NUM_SPARSE)[None, :]
    emb1 = p["fm1_emb"][feat_idx, sparse_in]                    # (B, F)
    emb2 = p["fm2_emb"][feat_idx, sparse_in]                    # (B, F, E)
    emb2_flat = emb2.reshape(b, NUM_SPARSE * EMB_DIM)           # (B, F*E)
    emb2_2d = emb2.reshape(b * NUM_SPARSE, EMB_DIM)             # (B*F, E)
    pool = (jnp.arange(b)[:, None] ==
            (jnp.arange(b * NUM_SPARSE)[None, :] // NUM_SPARSE)).astype(jnp.float32)

    wf1, bf1 = p["fm1_dense"]
    (wd0, bd0), (wd1, bd1) = p["dnn"]
    wfin, bfin = p["final"]

    ne = NUM_SPARSE * EMB_DIM
    args = (
        dense, representation, emb1, emb2_flat, emb2_2d, pool,
        wf1[:NUM_DENSE], wf1[NUM_DENSE:], bf1.reshape(1, -1),
        wd0[:ne], wd0[ne:ne + NUM_DENSE], wd0[ne + NUM_DENSE:], bd0.reshape(1, -1),
        wd1, bd1.reshape(1, -1),
        wfin, bfin.reshape(1, -1),
    )
    return pl.pallas_call(
        _decoder_kernel,
        out_shape=jax.ShapeDtypeStruct((b, 1), jnp.float32),
        grid=(1,),
        in_specs=[_full_spec(a) for a in args],
        out_specs=pl.BlockSpec((b, 1), lambda i: (0, 0)),
        compiler_params=pltpu.CompilerParams(dimension_semantics=("arbitrary",)),
    )(*args)


# ------------------------------- parameters (deterministic) --------------------------
def _init_linear(key, fan_in, fan_out):
    kw, kb = jax.random.split(key)
    bound = 1.0 / math.sqrt(fan_in)
    w = jax.random.uniform(kw, (fan_in, fan_out), jnp.float32, -bound, bound)
    b = jax.random.uniform(kb, (fan_out,), jnp.float32, -bound, bound)
    return w, b


def init_params(key):
    keys = jax.random.split(key, 32)
    it = iter(keys)
    p = {}
    # Encoder: only linears[:-1] and out_linear are used by forward;
    # the final nn.Linear in self.linears is created but unused -> not materialized.
    p["enc_l0"] = _init_linear(next(it), ENCODER_SIZES[0], ENCODER_SIZES[1])
    p["enc_out"] = _init_linear(next(it), ENCODER_SIZES[1], EMBED_DIM)
    # MultiheadAttention (embed_dim=34, num_heads=2): q/k projections exist in the
    # module but drop out of the forward exactly (uniform softmax) -> kept only for
    # architectural fidelity, never read in compute.
    p["attn_q"] = _init_linear(next(it), EMBED_DIM, EMBED_DIM)
    p["attn_k"] = _init_linear(next(it), EMBED_DIM, EMBED_DIM)
    p["attn_v"] = _init_linear(next(it), EMBED_DIM, EMBED_DIM)
    p["attn_o"] = _init_linear(next(it), EMBED_DIM, EMBED_DIM)
    # TODO(synk): SimpleMLP is not defined in the reference source; assumed
    # Linear(34 -> 64) + ReLU + Linear(64 -> representation_size).
    p["mlp_0"] = _init_linear(next(it), EMBED_DIM, SIMPLE_MLP_HIDDEN)
    p["mlp_1"] = _init_linear(next(it), SIMPLE_MLP_HIDDEN, REP_SIZE)
    # Decoder.
    p["fm1_dense"] = _init_linear(next(it), NUM_DENSE + REP_SIZE, 1)
    p["fm1_emb"] = jax.random.uniform(next(it), (NUM_SPARSE, VOC_SIZE),
                                      jnp.float32, -0.1, 0.1)
    p["fm2_emb"] = jax.random.uniform(next(it), (NUM_SPARSE, VOC_SIZE, EMB_DIM),
                                      jnp.float32, -0.1, 0.1)
    # TODO(synk): `Dnn` is not defined in the source; assumed Linear+ReLU per layer
    # (standard DeepFM reference implementation), dropout=0.
    dnn_units = [NUM_DENSE + NUM_SPARSE * EMB_DIM + REP_SIZE] + HIDDEN_UNITS
    p["dnn"] = [_init_linear(next(it), dnn_units[i], dnn_units[i + 1])
                for i in range(len(dnn_units) - 1)]
    p["final"] = _init_linear(next(it), HIDDEN_UNITS[-1], 1)
    # The decoder's `self.linear = Linear(...)` is never used in forward -> skipped.
    return p


# ------------------------------------- forward ---------------------------------------
@jax.jit
def cdeepfm_forward(p, context_x, context_y, mask_matrix, target_x):
    representation = encoder_fused(p, context_x, context_y, mask_matrix, target_x)
    return decoder_fused(p, representation, target_x)


# --------------------------------------- main ----------------------------------------
if __name__ == "__main__":
    key = jax.random.PRNGKey(0)
    kx, ky, km, kd, ks = jax.random.split(key, 5)
    context_x = jax.random.normal(kx, (B, S, EMBED_DIM), jnp.float32)
    context_y = jax.random.normal(ky, (B, S, CTX_Y_DIM), jnp.float32)
    mask_matrix = (jax.random.uniform(km, (B, S)) > 0.5).astype(jnp.float32)
    dense_part = jax.random.normal(kd, (B, NUM_DENSE), jnp.float32)
    sparse_part = jax.random.randint(ks, (B, NUM_SPARSE), 0, VOC_SIZE).astype(jnp.float32)
    target_x = jnp.concatenate([dense_part, sparse_part], axis=-1)   # (B, 34)

    params = init_params(jax.random.PRNGKey(42))
    out = cdeepfm_forward(params, context_x, context_y, mask_matrix, target_x)
    out = jax.block_until_ready(out)
    assert out.shape == (B, 1) and out.dtype == jnp.float32
    print("KERNEL_OK")
</pallas_src>

<mosaic_0001>
module attributes {stable_mosaic.version = 11 : i64} {
  func.func @_encoder_kernel(%arg0: i32, %arg1: memref<632x34xf32, #tpu.memory_space<vmem>>, %arg2: memref<632x1xf32, #tpu.memory_space<vmem>>, %arg3: memref<632x1xf32, #tpu.memory_space<vmem>>, %arg4: memref<2x632xf32, #tpu.memory_space<vmem>>, %arg5: memref<34x64xf32, #tpu.memory_space<vmem>>, %arg6: memref<1x64xf32, #tpu.memory_space<vmem>>, %arg7: memref<1x64xf32, #tpu.memory_space<vmem>>, %arg8: memref<64x34xf32, #tpu.memory_space<vmem>>, %arg9: memref<1x34xf32, #tpu.memory_space<vmem>>, %arg10: memref<34x34xf32, #tpu.memory_space<vmem>>, %arg11: memref<1x34xf32, #tpu.memory_space<vmem>>, %arg12: memref<34x34xf32, #tpu.memory_space<vmem>>, %arg13: memref<1x34xf32, #tpu.memory_space<vmem>>, %arg14: memref<34x64xf32, #tpu.memory_space<vmem>>, %arg15: memref<1x64xf32, #tpu.memory_space<vmem>>, %arg16: memref<64x16xf32, #tpu.memory_space<vmem>>, %arg17: memref<1x16xf32, #tpu.memory_space<vmem>>, %arg18: memref<2x16xf32, #tpu.memory_space<vmem>>) attributes {dimension_semantics = [#tpu.dimension_semantics<arbitrary>], iteration_bounds = array<i64: 1>, scalar_prefetch = 0 : i64, scratch_operands = 0 : i64, tpu.core_type = #tpu.core_type<tc>, window_params = [{pipeline_mode = #tpu.pipeline_mode<synchronous>, transform_indices = @transform_0, window_bounds = array<i64: 632, 34>}, {pipeline_mode = #tpu.pipeline_mode<synchronous>, transform_indices = @transform_1, window_bounds = array<i64: 632, 1>}, {pipeline_mode = #tpu.pipeline_mode<synchronous>, transform_indices = @transform_2, window_bounds = array<i64: 632, 1>}, {pipeline_mode = #tpu.pipeline_mode<synchronous>, transform_indices = @transform_3, window_bounds = array<i64: 2, 632>}, {pipeline_mode = #tpu.pipeline_mode<synchronous>, transform_indices = @transform_4, window_bounds = array<i64: 34, 64>}, {pipeline_mode = #tpu.pipeline_mode<synchronous>, transform_indices = @transform_5, window_bounds = array<i64: 1, 64>}, {pipeline_mode = #tpu.pipeline_mode<synchronous>, transform_indices = @transform_6, window_bounds = array<i64: 1, 64>}, {pipeline_mode = #tpu.pipeline_mode<synchronous>, transform_indices = @transform_7, window_bounds = array<i64: 64, 34>}, {pipeline_mode = #tpu.pipeline_mode<synchronous>, transform_indices = @transform_8, window_bounds = array<i64: 1, 34>}, {pipeline_mode = #tpu.pipeline_mode<synchronous>, transform_indices = @transform_9, window_bounds = array<i64: 34, 34>}, {pipeline_mode = #tpu.pipeline_mode<synchronous>, transform_indices = @transform_10, window_bounds = array<i64: 1, 34>}, {pipeline_mode = #tpu.pipeline_mode<synchronous>, transform_indices = @transform_11, window_bounds = array<i64: 34, 34>}, {pipeline_mode = #tpu.pipeline_mode<synchronous>, transform_indices = @transform_12, window_bounds = array<i64: 1, 34>}, {pipeline_mode = #tpu.pipeline_mode<synchronous>, transform_indices = @transform_13, window_bounds = array<i64: 34, 64>}, {pipeline_mode = #tpu.pipeline_mode<synchronous>, transform_indices = @transform_14, window_bounds = array<i64: 1, 64>}, {pipeline_mode = #tpu.pipeline_mode<synchronous>, transform_indices = @transform_15, window_bounds = array<i64: 64, 16>}, {pipeline_mode = #tpu.pipeline_mode<synchronous>, transform_indices = @transform_16, window_bounds = array<i64: 1, 16>}, {pipeline_mode = #tpu.pipeline_mode<synchronous>, transform_indices = @transform_17, window_bounds = array<i64: 2, 16>}]} {
    %c0 = arith.constant 0 : index
    %c0_0 = arith.constant 0 : index
    %0 = vector.load %arg3[%c0, %c0_0] : memref<632x1xf32, #tpu.memory_space<vmem>>, vector<632x1xf32>
    %c0_1 = arith.constant 0 : index
    %c0_2 = arith.constant 0 : index
    %1 = vector.load %arg1[%c0_1, %c0_2] : memref<632x34xf32, #tpu.memory_space<vmem>>, vector<632x34xf32>
    %2 = vector.broadcast %0 : vector<632x1xf32> to vector<632x34xf32>
    %3 = arith.mulf %1, %2 : vector<632x34xf32>
    %c0_3 = arith.constant 0 : index
    %c0_4 = arith.constant 0 : index
    %4 = vector.load %arg2[%c0_3, %c0_4] : memref<632x1xf32, #tpu.memory_space<vmem>>, vector<632x1xf32>
    %5 = arith.mulf %4, %0 : vector<632x1xf32>
    %c0_5 = arith.constant 0 : index
    %c0_6 = arith.constant 0 : index
    %6 = vector.load %arg5[%c0_5, %c0_6] : memref<34x64xf32, #tpu.memory_space<vmem>>, vector<34x64xf32>
    %cst = arith.constant dense<0.000000e+00> : vector<632x64xf32>
    %7 = tpu.matmul %3, %6, %cst {dimension_numbers = #tpu.dot_dimension_numbers<[1], [0], [0], [1], [0, 0, 1, 1], [], []>} : vector<632x34xf32>, vector<34x64xf32>, vector<632x64xf32> -> vector<632x64xf32>
    %c0_7 = arith.constant 0 : index
    %c0_8 = arith.constant 0 : index
    %8 = vector.load %arg6[%c0_7, %c0_8] : memref<1x64xf32, #tpu.memory_space<vmem>>, vector<1x64xf32>
    %9 = vector.broadcast %5 : vector<632x1xf32> to vector<632x64xf32>
    %10 = vector.broadcast %8 : vector<1x64xf32> to vector<632x64xf32>
    %11 = arith.mulf %9, %10 : vector<632x64xf32>
    %12 = arith.addf %7, %11 : vector<632x64xf32>
    %c0_9 = arith.constant 0 : index
    %c0_10 = arith.constant 0 : index
    %13 = vector.load %arg7[%c0_9, %c0_10] : memref<1x64xf32, #tpu.memory_space<vmem>>, vector<1x64xf32>
    %14 = vector.broadcast %13 : vector<1x64xf32> to vector<632x64xf32>
    %15 = arith.addf %12, %14 : vector<632x64xf32>
    %cst_11 = arith.constant 0.000000e+00 : f32
    %16 = vector.broadcast %cst_11 : f32 to vector<632x64xf32>
    %17 = arith.maximumf %15, %16 : vector<632x64xf32>
    %c0_12 = arith.constant 0 : index
    %c0_13 = arith.constant 0 : index
    %18 = vector.load %arg4[%c0_12, %c0_13] : memref<2x632xf32, #tpu.memory_space<vmem>>, vector<2x632xf32>
    %cst_14 = arith.constant dense<0.000000e+00> : vector<2x64xf32>
    %19 = tpu.matmul %18, %17, %cst_14 {dimension_numbers = #tpu.dot_dimension_numbers<[1], [0], [0], [1], [0, 0, 1, 1], [], []>} : vector<2x632xf32>, vector<632x64xf32>, vector<2x64xf32> -> vector<2x64xf32>
    %c0_15 = arith.constant 0 : index
    %c0_16 = arith.constant 0 : index
    %20 = vector.load %arg8[%c0_15, %c0_16] : memref<64x34xf32, #tpu.memory_space<vmem>>, vector<64x34xf32>
    %cst_17 = arith.constant dense<0.000000e+00> : vector<2x34xf32>
    %21 = tpu.matmul %19, %20, %cst_17 {dimension_numbers = #tpu.dot_dimension_numbers<[1], [0], [0], [1], [0, 0, 1, 1], [], []>} : vector<2x64xf32>, vector<64x34xf32>, vector<2x34xf32> -> vector<2x34xf32>
    %c0_18 = arith.constant 0 : index
    %c0_19 = arith.constant 0 : index
    %22 = vector.load %arg9[%c0_18, %c0_19] : memref<1x34xf32, #tpu.memory_space<vmem>>, vector<1x34xf32>
    %23 = vector.broadcast %22 : vector<1x34xf32> to vector<2x34xf32>
    %24 = arith.addf %21, %23 : vector<2x34xf32>
    %c0_20 = arith.constant 0 : index
    %c0_21 = arith.constant 0 : index
    %25 = vector.load %arg10[%c0_20, %c0_21] : memref<34x34xf32, #tpu.memory_space<vmem>>, vector<34x34xf32>
    %cst_22 = arith.constant dense<0.000000e+00> : vector<2x34xf32>
    %26 = tpu.matmul %24, %25, %cst_22 {dimension_numbers = #tpu.dot_dimension_numbers<[1], [0], [0], [1], [0, 0, 1, 1], [], []>} : vector<2x34xf32>, vector<34x34xf32>, vector<2x34xf32> -> vector<2x34xf32>
    %c0_23 = arith.constant 0 : index
    %c0_24 = arith.constant 0 : index
    %27 = vector.load %arg11[%c0_23, %c0_24] : memref<1x34xf32, #tpu.memory_space<vmem>>, vector<1x34xf32>
    %28 = vector.broadcast %27 : vector<1x34xf32> to vector<2x34xf32>
    %29 = arith.addf %26, %28 : vector<2x34xf32>
    %c0_25 = arith.constant 0 : index
    %c0_26 = arith.constant 0 : index
    %30 = vector.load %arg12[%c0_25, %c0_26] : memref<34x34xf32, #tpu.memory_space<vmem>>, vector<34x34xf32>
    %cst_27 = arith.constant dense<0.000000e+00> : vector<2x34xf32>
    %31 = tpu.matmul %29, %30, %cst_27 {dimension_numbers = #tpu.dot_dimension_numbers<[1], [0], [0], [1], [0, 0, 1, 1], [], []>} : vector<2x34xf32>, vector<34x34xf32>, vector<2x34xf32> -> vector<2x34xf32>
    %c0_28 = arith.constant 0 : index
    %c0_29 = arith.constant 0 : index
    %32 = vector.load %arg13[%c0_28, %c0_29] : memref<1x34xf32, #tpu.memory_space<vmem>>, vector<1x34xf32>
    %33 = vector.broadcast %32 : vector<1x34xf32> to vector<2x34xf32>
    %34 = arith.addf %31, %33 : vector<2x34xf32>
    %c0_30 = arith.constant 0 : index
    %c0_31 = arith.constant 0 : index
    %35 = vector.load %arg14[%c0_30, %c0_31] : memref<34x64xf32, #tpu.memory_space<vmem>>, vector<34x64xf32>
    %cst_32 = arith.constant dense<0.000000e+00> : vector<2x64xf32>
    %36 = tpu.matmul %34, %35, %cst_32 {dimension_numbers = #tpu.dot_dimension_numbers<[1], [0], [0], [1], [0, 0, 1, 1], [], []>} : vector<2x34xf32>, vector<34x64xf32>, vector<2x64xf32> -> vector<2x64xf32>
    %c0_33 = arith.constant 0 : index
    %c0_34 = arith.constant 0 : index
    %37 = vector.load %arg15[%c0_33, %c0_34] : memref<1x64xf32, #tpu.memory_space<vmem>>, vector<1x64xf32>
    %38 = vector.broadcast %37 : vector<1x64xf32> to vector<2x64xf32>
    %39 = arith.addf %36, %38 : vector<2x64xf32>
    %cst_35 = arith.constant 0.000000e+00 : f32
    %40 = vector.broadcast %cst_35 : f32 to vector<2x64xf32>
    %41 = arith.maximumf %39, %40 : vector<2x64xf32>
    %c0_36 = arith.constant 0 : index
    %c0_37 = arith.constant 0 : index
    %42 = vector.load %arg16[%c0_36, %c0_37] : memref<64x16xf32, #tpu.memory_space<vmem>>, vector<64x16xf32>
    %cst_38 = arith.constant dense<0.000000e+00> : vector<2x16xf32>
    %43 = tpu.matmul %41, %42, %cst_38 {dimension_numbers = #tpu.dot_dimension_numbers<[1], [0], [0], [1], [0, 0, 1, 1], [], []>} : vector<2x64xf32>, vector<64x16xf32>, vector<2x16xf32> -> vector<2x16xf32>
    %c0_39 = arith.constant 0 : index
    %c0_40 = arith.constant 0 : index
    %44 = vector.load %arg17[%c0_39, %c0_40] : memref<1x16xf32, #tpu.memory_space<vmem>>, vector<1x16xf32>
    %45 = vector.broadcast %44 : vector<1x16xf32> to vector<2x16xf32>
    %46 = arith.addf %43, %45 : vector<2x16xf32>
    %c0_41 = arith.constant 0 : index
    %c0_42 = arith.constant 0 : index
    %47 = vector.load %arg18[%c0_41, %c0_42] : memref<2x16xf32, #tpu.memory_space<vmem>>, vector<2x16xf32>
    tpu.vector_store %arg18[%c0_41, %c0_42], %46 {strides = array<i32>} : memref<2x16xf32, #tpu.memory_space<vmem>>, vector<2x16xf32>,
    return
  }
  func.func @transform_0(%arg0: i32) -> (i32, i32) {
    %c0_i32 = arith.constant 0 : i32
    %c0_i32_0 = arith.constant 0 : i32
    %c0_i32_1 = arith.constant 0 : i32
    return %c0_i32, %c0_i32_0 : i32, i32
  }
  func.func @transform_1(%arg0: i32) -> (i32, i32) {
    %c0_i32 = arith.constant 0 : i32
    %c0_i32_0 = arith.constant 0 : i32
    %c0_i32_1 = arith.constant 0 : i32
    return %c0_i32, %c0_i32_0 : i32, i32
  }
  func.func @transform_2(%arg0: i32) -> (i32, i32) {
    %c0_i32 = arith.constant 0 : i32
    %c0_i32_0 = arith.constant 0 : i32
    %c0_i32_1 = arith.constant 0 : i32
    return %c0_i32, %c0_i32_0 : i32, i32
  }
  func.func @transform_3(%arg0: i32) -> (i32, i32) {
    %c0_i32 = arith.constant 0 : i32
    %c0_i32_0 = arith.constant 0 : i32
    %c0_i32_1 = arith.constant 0 : i32
    return %c0_i32, %c0_i32_0 : i32, i32
  }
  func.func @transform_4(%arg0: i32) -> (i32, i32) {
    %c0_i32 = arith.constant 0 : i32
    %c0_i32_0 = arith.constant 0 : i32
    %c0_i32_1 = arith.constant 0 : i32
    return %c0_i32, %c0_i32_0 : i32, i32
  }
  func.func @transform_5(%arg0: i32) -> (i32, i32) {
    %c0_i32 = arith.constant 0 : i32
    %c0_i32_0 = arith.constant 0 : i32
    %c0_i32_1 = arith.constant 0 : i32
    return %c0_i32, %c0_i32_0 : i32, i32
  }
  func.func @transform_6(%arg0: i32) -> (i32, i32) {
    %c0_i32 = arith.constant 0 : i32
    %c0_i32_0 = arith.constant 0 : i32
    %c0_i32_1 = arith.constant 0 : i32
    return %c0_i32, %c0_i32_0 : i32, i32
  }
  func.func @transform_7(%arg0: i32) -> (i32, i32) {
    %c0_i32 = arith.constant 0 : i32
    %c0_i32_0 = arith.constant 0 : i32
    %c0_i32_1 = arith.constant 0 : i32
    return %c0_i32, %c0_i32_0 : i32, i32
  }
  func.func @transform_8(%arg0: i32) -> (i32, i32) {
    %c0_i32 = arith.constant 0 : i32
    %c0_i32_0 = arith.constant 0 : i32
    %c0_i32_1 = arith.constant 0 : i32
    return %c0_i32, %c0_i32_0 : i32, i32
  }
  func.func @transform_9(%arg0: i32) -> (i32, i32) {
    %c0_i32 = arith.constant 0 : i32
    %c0_i32_0 = arith.constant 0 : i32
    %c0_i32_1 = arith.constant 0 : i32
    return %c0_i32, %c0_i32_0 : i32, i32
  }
  func.func @transform_10(%arg0: i32) -> (i32, i32) {
    %c0_i32 = arith.constant 0 : i32
    %c0_i32_0 = arith.constant 0 : i32
    %c0_i32_1 = arith.constant 0 : i32
    return %c0_i32, %c0_i32_0 : i32, i32
  }
  func.func @transform_11(%arg0: i32) -> (i32, i32) {
    %c0_i32 = arith.constant 0 : i32
    %c0_i32_0 = arith.constant 0 : i32
    %c0_i32_1 = arith.constant 0 : i32
    return %c0_i32, %c0_i32_0 : i32, i32
  }
  func.func @transform_12(%arg0: i32) -> (i32, i32) {
    %c0_i32 = arith.constant 0 : i32
    %c0_i32_0 = arith.constant 0 : i32
    %c0_i32_1 = arith.constant 0 : i32
    return %c0_i32, %c0_i32_0 : i32, i32
  }
  func.func @transform_13(%arg0: i32) -> (i32, i32) {
    %c0_i32 = arith.constant 0 : i32
    %c0_i32_0 = arith.constant 0 : i32
    %c0_i32_1 = arith.constant 0 : i32
    return %c0_i32, %c0_i32_0 : i32, i32
  }
  func.func @transform_14(%arg0: i32) -> (i32, i32) {
    %c0_i32 = arith.constant 0 : i32
    %c0_i32_0 = arith.constant 0 : i32
    %c0_i32_1 = arith.constant 0 : i32
    return %c0_i32, %c0_i32_0 : i32, i32
  }
  func.func @transform_15(%arg0: i32) -> (i32, i32) {
    %c0_i32 = arith.constant 0 : i32
    %c0_i32_0 = arith.constant 0 : i32
    %c0_i32_1 = arith.constant 0 : i32
    return %c0_i32, %c0_i32_0 : i32, i32
  }
  func.func @transform_16(%arg0: i32) -> (i32, i32) {
    %c0_i32 = arith.constant 0 : i32
    %c0_i32_0 = arith.constant 0 : i32
    %c0_i32_1 = arith.constant 0 : i32
    return %c0_i32, %c0_i32_0 : i32, i32
  }
  func.func @transform_17(%arg0: i32) -> (i32, i32) {
    %c0_i32 = arith.constant 0 : i32
    %c0_i32_0 = arith.constant 0 : i32
    %c0_i32_1 = arith.constant 0 : i32
    return %c0_i32, %c0_i32_0 : i32, i32
  }
}

module attributes {stable_mosaic.version = 11 : i64} {
  func.func @_decoder_kernel(%arg0: i32, %arg1: memref<2x13xf32, #tpu.memory_space<vmem>>, %arg2: memref<2x16xf32, #tpu.memory_space<vmem>>, %arg3: memref<2x21xf32, #tpu.memory_space<vmem>>, %arg4: memref<2x168xf32, #tpu.memory_space<vmem>>, %arg5: memref<42x8xf32, #tpu.memory_space<vmem>>, %arg6: memref<2x42xf32, #tpu.memory_space<vmem>>, %arg7: memref<13x1xf32, #tpu.memory_space<vmem>>, %arg8: memref<16x1xf32, #tpu.memory_space<vmem>>, %arg9: memref<1x1xf32, #tpu.memory_space<vmem>>, %arg10: memref<168x32xf32, #tpu.memory_space<vmem>>, %arg11: memref<13x32xf32, #tpu.memory_space<vmem>>, %arg12: memref<16x32xf32, #tpu.memory_space<vmem>>, %arg13: memref<1x32xf32, #tpu.memory_space<vmem>>, %arg14: memref<32x16xf32, #tpu.memory_space<vmem>>, %arg15: memref<1x16xf32, #tpu.memory_space<vmem>>, %arg16: memref<16x1xf32, #tpu.memory_space<vmem>>, %arg17: memref<1x1xf32, #tpu.memory_space<vmem>>, %arg18: memref<2x1xf32, #tpu.memory_space<vmem>>) attributes {dimension_semantics = [#tpu.dimension_semantics<arbitrary>], iteration_bounds = array<i64: 1>, scalar_prefetch = 0 : i64, scratch_operands = 0 : i64, tpu.core_type = #tpu.core_type<tc>, window_params = [{pipeline_mode = #tpu.pipeline_mode<synchronous>, transform_indices = @transform_0, window_bounds = array<i64: 2, 13>}, {pipeline_mode = #tpu.pipeline_mode<synchronous>, transform_indices = @transform_1, window_bounds = array<i64: 2, 16>}, {pipeline_mode = #tpu.pipeline_mode<synchronous>, transform_indices = @transform_2, window_bounds = array<i64: 2, 21>}, {pipeline_mode = #tpu.pipeline_mode<synchronous>, transform_indices = @transform_3, window_bounds = array<i64: 2, 168>}, {pipeline_mode = #tpu.pipeline_mode<synchronous>, transform_indices = @transform_4, window_bounds = array<i64: 42, 8>}, {pipeline_mode = #tpu.pipeline_mode<synchronous>, transform_indices = @transform_5, window_bounds = array<i64: 2, 42>}, {pipeline_mode = #tpu.pipeline_mode<synchronous>, transform_indices = @transform_6, window_bounds = array<i64: 13, 1>}, {pipeline_mode = #tpu.pipeline_mode<synchronous>, transform_indices = @transform_7, window_bounds = array<i64: 16, 1>}, {pipeline_mode = #tpu.pipeline_mode<synchronous>, transform_indices = @transform_8, window_bounds = array<i64: 1, 1>}, {pipeline_mode = #tpu.pipeline_mode<synchronous>, transform_indices = @transform_9, window_bounds = array<i64: 168, 32>}, {pipeline_mode = #tpu.pipeline_mode<synchronous>, transform_indices = @transform_10, window_bounds = array<i64: 13, 32>}, {pipeline_mode = #tpu.pipeline_mode<synchronous>, transform_indices = @transform_11, window_bounds = array<i64: 16, 32>}, {pipeline_mode = #tpu.pipeline_mode<synchronous>, transform_indices = @transform_12, window_bounds = array<i64: 1, 32>}, {pipeline_mode = #tpu.pipeline_mode<synchronous>, transform_indices = @transform_13, window_bounds = array<i64: 32, 16>}, {pipeline_mode = #tpu.pipeline_mode<synchronous>, transform_indices = @transform_14, window_bounds = array<i64: 1, 16>}, {pipeline_mode = #tpu.pipeline_mode<synchronous>, transform_indices = @transform_15, window_bounds = array<i64: 16, 1>}, {pipeline_mode = #tpu.pipeline_mode<synchronous>, transform_indices = @transform_16, window_bounds = array<i64: 1, 1>}, {pipeline_mode = #tpu.pipeline_mode<synchronous>, transform_indices = @transform_17, window_bounds = array<i64: 2, 1>}]} {
    %c0 = arith.constant 0 : index
    %c0_0 = arith.constant 0 : index
    %0 = vector.load %arg1[%c0, %c0_0] : memref<2x13xf32, #tpu.memory_space<vmem>>, vector<2x13xf32>
    %c0_1 = arith.constant 0 : index
    %c0_2 = arith.constant 0 : index
    %1 = vector.load %arg2[%c0_1, %c0_2] : memref<2x16xf32, #tpu.memory_space<vmem>>, vector<2x16xf32>
    %c0_3 = arith.constant 0 : index
    %c0_4 = arith.constant 0 : index
    %2 = vector.load %arg3[%c0_3, %c0_4] : memref<2x21xf32, #tpu.memory_space<vmem>>, vector<2x21xf32>
    %c0_5 = arith.constant 0 : index
    %c0_6 = arith.constant 0 : index
    %3 = vector.load %arg4[%c0_5, %c0_6] : memref<2x168xf32, #tpu.memory_space<vmem>>, vector<2x168xf32>
    %c0_7 = arith.constant 0 : index
    %c0_8 = arith.constant 0 : index
    %4 = vector.load %arg5[%c0_7, %c0_8] : memref<42x8xf32, #tpu.memory_space<vmem>>, vector<42x8xf32>
    %c0_9 = arith.constant 0 : index
    %c0_10 = arith.constant 0 : index
    %5 = vector.load %arg6[%c0_9, %c0_10] : memref<2x42xf32, #tpu.memory_space<vmem>>, vector<2x42xf32>
    %cst = arith.constant dense<0.000000e+00> : vector<2xf32>
    %6 = vector.multi_reduction <add>, %2, %cst [1] : vector<2x21xf32> to vector<2xf32>
    %7 = vector.shape_cast %6 : vector<2xf32> to vector<2x1xf32>
    %c0_11 = arith.constant 0 : index
    %c0_12 = arith.constant 0 : index
    %8 = vector.load %arg7[%c0_11, %c0_12] : memref<13x1xf32, #tpu.memory_space<vmem>>, vector<13x1xf32>
    %cst_13 = arith.constant dense<0.000000e+00> : vector<2x1xf32>
    %9 = tpu.matmul %0, %8, %cst_13 {dimension_numbers = #tpu.dot_dimension_numbers<[1], [0], [0], [1], [0, 0, 1, 1], [], []>} : vector<2x13xf32>, vector<13x1xf32>, vector<2x1xf32> -> vector<2x1xf32>
    %c0_14 = arith.constant 0 : index
    %c0_15 = arith.constant 0 : index
    %10 = vector.load %arg8[%c0_14, %c0_15] : memref<16x1xf32, #tpu.memory_space<vmem>>, vector<16x1xf32>
    %cst_16 = arith.constant dense<0.000000e+00> : vector<2x1xf32>
    %11 = tpu.matmul %1, %10, %cst_16 {dimension_numbers = #tpu.dot_dimension_numbers<[1], [0], [0], [1], [0, 0, 1, 1], [], []>} : vector<2x16xf32>, vector<16x1xf32>, vector<2x1xf32> -> vector<2x1xf32>
    %12 = arith.addf %9, %11 : vector<2x1xf32>
    %c0_17 = arith.constant 0 : index
    %c0_18 = arith.constant 0 : index
    %13 = vector.load %arg9[%c0_17, %c0_18] : memref<1x1xf32, #tpu.memory_space<vmem>>, vector<1x1xf32>
    %14 = vector.broadcast %13 : vector<1x1xf32> to vector<2x1xf32>
    %15 = arith.addf %12, %14 : vector<2x1xf32>
    %cst_19 = arith.constant dense<0.000000e+00> : vector<2x8xf32>
    %16 = tpu.matmul %5, %4, %cst_19 {dimension_numbers = #tpu.dot_dimension_numbers<[1], [0], [0], [1], [0, 0, 1, 1], [], []>} : vector<2x42xf32>, vector<42x8xf32>, vector<2x8xf32> -> vector<2x8xf32>
    %17 = arith.mulf %4, %4 : vector<42x8xf32>
    %cst_20 = arith.constant dense<0.000000e+00> : vector<2x8xf32>
    %18 = tpu.matmul %5, %17, %cst_20 {dimension_numbers = #tpu.dot_dimension_numbers<[1], [0], [0], [1], [0, 0, 1, 1], [], []>} : vector<2x42xf32>, vector<42x8xf32>, vector<2x8xf32> -> vector<2x8xf32>
    %19 = arith.mulf %16, %16 : vector<2x8xf32>
    %20 = arith.subf %19, %18 : vector<2x8xf32>
    %cst_21 = arith.constant dense<0.000000e+00> : vector<2xf32>
    %21 = vector.multi_reduction <add>, %20, %cst_21 [1] : vector<2x8xf32> to vector<2xf32>
    %22 = vector.shape_cast %21 : vector<2xf32> to vector<2x1xf32>
    %cst_22 = arith.constant 5.000000e-01 : f32
    %23 = vector.broadcast %cst_22 : f32 to vector<2x1xf32>
    %24 = arith.mulf %23, %22 : vector<2x1xf32>
    %c0_23 = arith.constant 0 : index
    %c0_24 = arith.constant 0 : index
    %25 = vector.load %arg10[%c0_23, %c0_24] : memref<168x32xf32, #tpu.memory_space<vmem>>, vector<168x32xf32>
    %cst_25 = arith.constant dense<0.000000e+00> : vector<2x32xf32>
    %26 = tpu.matmul %3, %25, %cst_25 {dimension_numbers = #tpu.dot_dimension_numbers<[1], [0], [0], [1], [0, 0, 1, 1], [], []>} : vector<2x168xf32>, vector<168x32xf32>, vector<2x32xf32> -> vector<2x32xf32>
    %c0_26 = arith.constant 0 : index
    %c0_27 = arith.constant 0 : index
    %27 = vector.load %arg11[%c0_26, %c0_27] : memref<13x32xf32, #tpu.memory_space<vmem>>, vector<13x32xf32>
    %cst_28 = arith.constant dense<0.000000e+00> : vector<2x32xf32>
    %28 = tpu.matmul %0, %27, %cst_28 {dimension_numbers = #tpu.dot_dimension_numbers<[1], [0], [0], [1], [0, 0, 1, 1], [], []>} : vector<2x13xf32>, vector<13x32xf32>, vector<2x32xf32> -> vector<2x32xf32>
    %29 = arith.addf %26, %28 : vector<2x32xf32>
    %c0_29 = arith.constant 0 : index
    %c0_30 = arith.constant 0 : index
    %30 = vector.load %arg12[%c0_29, %c0_30] : memref<16x32xf32, #tpu.memory_space<vmem>>, vector<16x32xf32>
    %cst_31 = arith.constant dense<0.000000e+00> : vector<2x32xf32>
    %31 = tpu.matmul %1, %30, %cst_31 {dimension_numbers = #tpu.dot_dimension_numbers<[1], [0], [0], [1], [0, 0, 1, 1], [], []>} : vector<2x16xf32>, vector<16x32xf32>, vector<2x32xf32> -> vector<2x32xf32>
    %32 = arith.addf %29, %31 : vector<2x32xf32>
    %c0_32 = arith.constant 0 : index
    %c0_33 = arith.constant 0 : index
    %33 = vector.load %arg13[%c0_32, %c0_33] : memref<1x32xf32, #tpu.memory_space<vmem>>, vector<1x32xf32>
    %34 = vector.broadcast %33 : vector<1x32xf32> to vector<2x32xf32>
    %35 = arith.addf %32, %34 : vector<2x32xf32>
    %cst_34 = arith.constant 0.000000e+00 : f32
    %36 = vector.broadcast %cst_34 : f32 to vector<2x32xf32>
    %37 = arith.maximumf %35, %36 : vector<2x32xf32>
    %c0_35 = arith.constant 0 : index
    %c0_36 = arith.constant 0 : index
    %38 = vector.load %arg14[%c0_35, %c0_36] : memref<32x16xf32, #tpu.memory_space<vmem>>, vector<32x16xf32>
    %cst_37 = arith.constant dense<0.000000e+00> : vector<2x16xf32>
    %39 = tpu.matmul %37, %38, %cst_37 {dimension_numbers = #tpu.dot_dimension_numbers<[1], [0], [0], [1], [0, 0, 1, 1], [], []>} : vector<2x32xf32>, vector<32x16xf32>, vector<2x16xf32> -> vector<2x16xf32>
    %c0_38 = arith.constant 0 : index
    %c0_39 = arith.constant 0 : index
    %40 = vector.load %arg15[%c0_38, %c0_39] : memref<1x16xf32, #tpu.memory_space<vmem>>, vector<1x16xf32>
    %41 = vector.broadcast %40 : vector<1x16xf32> to vector<2x16xf32>
    %42 = arith.addf %39, %41 : vector<2x16xf32>
    %cst_40 = arith.constant 0.000000e+00 : f32
    %43 = vector.broadcast %cst_40 : f32 to vector<2x16xf32>
    %44 = arith.maximumf %42, %43 : vector<2x16xf32>
    %c0_41 = arith.constant 0 : index
    %c0_42 = arith.constant 0 : index
    %45 = vector.load %arg16[%c0_41, %c0_42] : memref<16x1xf32, #tpu.memory_space<vmem>>, vector<16x1xf32>
    %cst_43 = arith.constant dense<0.000000e+00> : vector<2x1xf32>
    %46 = tpu.matmul %44, %45, %cst_43 {dimension_numbers = #tpu.dot_dimension_numbers<[1], [0], [0], [1], [0, 0, 1, 1], [], []>} : vector<2x16xf32>, vector<16x1xf32>, vector<2x1xf32> -> vector<2x1xf32>
    %c0_44 = arith.constant 0 : index
    %c0_45 = arith.constant 0 : index
    %47 = vector.load %arg17[%c0_44, %c0_45] : memref<1x1xf32, #tpu.memory_space<vmem>>, vector<1x1xf32>
    %48 = vector.broadcast %47 : vector<1x1xf32> to vector<2x1xf32>
    %49 = arith.addf %46, %48 : vector<2x1xf32>
    %50 = arith.addf %7, %15 : vector<2x1xf32>
    %51 = arith.addf %50, %24 : vector<2x1xf32>
    %52 = arith.addf %51, %49 : vector<2x1xf32>
    %c0_46 = arith.constant 0 : index
    %c0_47 = arith.constant 0 : index
    %53 = vector.load %arg18[%c0_46, %c0_47] : memref<2x1xf32, #tpu.memory_space<vmem>>, vector<2x1xf32>
    tpu.vector_store %arg18[%c0_46, %c0_47], %52 {strides = array<i32>} : memref<2x1xf32, #tpu.memory_space<vmem>>, vector<2x1xf32>,
    return
  }
  func.func @transform_0(%arg0: i32) -> (i32, i32) {
    %c0_i32 = arith.constant 0 : i32
    %c0_i32_0 = arith.constant 0 : i32
    %c0_i32_1 = arith.constant 0 : i32
    return %c0_i32, %c0_i32_0 : i32, i32
  }
  func.func @transform_1(%arg0: i32) -> (i32, i32) {
    %c0_i32 = arith.constant 0 : i32
    %c0_i32_0 = arith.constant 0 : i32
    %c0_i32_1 = arith.constant 0 : i32
    return %c0_i32, %c0_i32_0 : i32, i32
  }
  func.func @transform_2(%arg0: i32) -> (i32, i32) {
    %c0_i32 = arith.constant 0 : i32
    %c0_i32_0 = arith.constant 0 : i32
    %c0_i32_1 = arith.constant 0 : i32
    return %c0_i32, %c0_i32_0 : i32, i32
  }
  func.func @transform_3(%arg0: i32) -> (i32, i32) {
    %c0_i32 = arith.constant 0 : i32
    %c0_i32_0 = arith.constant 0 : i32
    %c0_i32_1 = arith.constant 0 : i32
    return %c0_i32, %c0_i32_0 : i32, i32
  }
  func.func @transform_4(%arg0: i32) -> (i32, i32) {
    %c0_i32 = arith.constant 0 : i32
    %c0_i32_0 = arith.constant 0 : i32
    %c0_i32_1 = arith.constant 0 : i32
    return %c0_i32, %c0_i32_0 : i32, i32
  }
  func.func @transform_5(%arg0: i32) -> (i32, i32) {
    %c0_i32 = arith.constant 0 : i32
    %c0_i32_0 = arith.constant 0 : i32
    %c0_i32_1 = arith.constant 0 : i32
    return %c0_i32, %c0_i32_0 : i32, i32
  }
  func.func @transform_6(%arg0: i32) -> (i32, i32) {
    %c0_i32 = arith.constant 0 : i32
    %c0_i32_0 = arith.constant 0 : i32
    %c0_i32_1 = arith.constant 0 : i32
    return %c0_i32, %c0_i32_0 : i32, i32
  }
  func.func @transform_7(%arg0: i32) -> (i32, i32) {
    %c0_i32 = arith.constant 0 : i32
    %c0_i32_0 = arith.constant 0 : i32
    %c0_i32_1 = arith.constant 0 : i32
    return %c0_i32, %c0_i32_0 : i32, i32
  }
  func.func @transform_8(%arg0: i32) -> (i32, i32) {
    %c0_i32 = arith.constant 0 : i32
    %c0_i32_0 = arith.constant 0 : i32
    %c0_i32_1 = arith.constant 0 : i32
    return %c0_i32, %c0_i32_0 : i32, i32
  }
  func.func @transform_9(%arg0: i32) -> (i32, i32) {
    %c0_i32 = arith.constant 0 : i32
    %c0_i32_0 = arith.constant 0 : i32
    %c0_i32_1 = arith.constant 0 : i32
    return %c0_i32, %c0_i32_0 : i32, i32
  }
  func.func @transform_10(%arg0: i32) -> (i32, i32) {
    %c0_i32 = arith.constant 0 : i32
    %c0_i32_0 = arith.constant 0 : i32
    %c0_i32_1 = arith.constant 0 : i32
    return %c0_i32, %c0_i32_0 : i32, i32
  }
  func.func @transform_11(%arg0: i32) -> (i32, i32) {
    %c0_i32 = arith.constant 0 : i32
    %c0_i32_0 = arith.constant 0 : i32
    %c0_i32_1 = arith.constant 0 : i32
    return %c0_i32, %c0_i32_0 : i32, i32
  }
  func.func @transform_12(%arg0: i32) -> (i32, i32) {
    %c0_i32 = arith.constant 0 : i32
    %c0_i32_0 = arith.constant 0 : i32
    %c0_i32_1 = arith.constant 0 : i32
    return %c0_i32, %c0_i32_0 : i32, i32
  }
  func.func @transform_13(%arg0: i32) -> (i32, i32) {
    %c0_i32 = arith.constant 0 : i32
    %c0_i32_0 = arith.constant 0 : i32
    %c0_i32_1 = arith.constant 0 : i32
    return %c0_i32, %c0_i32_0 : i32, i32
  }
  func.func @transform_14(%arg0: i32) -> (i32, i32) {
    %c0_i32 = arith.constant 0 : i32
    %c0_i32_0 = arith.constant 0 : i32
    %c0_i32_1 = arith.constant 0 : i32
    return %c0_i32, %c0_i32_0 : i32, i32
  }
  func.func @transform_15(%arg0: i32) -> (i32, i32) {
    %c0_i32 = arith.constant 0 : i32
    %c0_i32_0 = arith.constant 0 : i32
    %c0_i32_1 = arith.constant 0 : i32
    return %c0_i32, %c0_i32_0 : i32, i32
  }
  func.func @transform_16(%arg0: i32) -> (i32, i32) {
    %c0_i32 = arith.constant 0 : i32
    %c0_i32_0 = arith.constant 0 : i32
    %c0_i32_1 = arith.constant 0 : i32
    return %c0_i32, %c0_i32_0 : i32, i32
  }
  func.func @transform_17(%arg0: i32) -> (i32, i32) {
    %c0_i32 = arith.constant 0 : i32
    %c0_i32_0 = arith.constant 0 : i32
    %c0_i32_1 = arith.constant 0 : i32
    return %c0_i32, %c0_i32_0 : i32, i32
  }
}

</mosaic_0001>

<bundles_post_ra>
// kernel: cdeepfm_forward.3
= control target key start
LH: loop header
LB: loop body
LE: loop exit
PB: predicated region body
PF: predicated region fallthrough
CT: control target
= control target key end

     0   :  { %vm157_vm0 = vcmask 1044480   ;;  %v1054_v0 = vmov 0.0|0.0   ;;  %vm1055_vm1 = vmmov 1   ;;  %vm1056_vm3 = vmmov 0   ;;  %s1375_s7 = inlined_call_operand.vmem [shape: f32[16,1], index: 7, kind: input, shape index: {}]   ;;  %s1376_s10 = inlined_call_operand.vmem [shape: f32[13,32], index: 10, kind: input, shape index: {}]   ;;  %s1377_s1 = inlined_call_operand.vmem [shape: f32[2,16], index: 1, kind: input, shape index: {}]   ;;  %s1378_s9 = inlined_call_operand.vmem [shape: f32[168,32], index: 9, kind: input, shape index: {}]   ;;  %s1379_s6 = inlined_call_operand.vmem [shape: f32[13,1], index: 6, kind: input, shape index: {}]   ;;  %s1380_s0 = inlined_call_operand.vmem [shape: f32[2,13], index: 0, kind: input, shape index: {}]   ;;  %s1381_s4 = inlined_call_operand.vmem [shape: f32[42,8], index: 4, kind: input, shape index: {}]   ;;  %s1382_s3 = inlined_call_operand.vmem [shape: f32[2,168], index: 3, kind: input, shape index: {}]   ;;  %s1383_s5 = inlined_call_operand.vmem [shape: f32[2,42], index: 5, kind: input, shape index: {}]   ;;  %s1384_s11 = inlined_call_operand.vmem [shape: f32[16,32], index: 11, kind: input, shape index: {}]   ;;  %s1385_s2 = inlined_call_operand.vmem [shape: f32[2,21], index: 2, kind: input, shape index: {}]   ;;  %s1386_s13 = inlined_call_operand.vmem [shape: f32[32,16], index: 13, kind: input, shape index: {}]   ;;  %s1387_s8 = inlined_call_operand.<no memory space> [shape: f32[1,1], index: 8, kind: input, shape index: {}]   ;;  %s1388_s12 = inlined_call_operand.vmem [shape: f32[1,32], index: 12, kind: input, shape index: {}]   ;;  %s1389_s16 = inlined_call_operand.<no memory space> [shape: f32[1,1], index: 16, kind: input, shape index: {}]   ;;  %s1390_s15 = inlined_call_operand.vmem [shape: f32[16,1], index: 15, kind: input, shape index: {}]   ;;  %s1391_s14 = inlined_call_operand.vmem [shape: f32[1,16], index: 14, kind: input, shape index: {}]   ;;  %s1392_s17 = inlined_call_operand.vmem [shape: f32[2,1], index: 17, kind: output, shape index: {}]  }
   0x1   :  { %1395 = sst [smem:[#allocation4_spill]] %s1375_s7  ;;  %969 = vmatprep.subr.bf16.mxu0 %v1054_v0  ;;  %996 = vmatprep.subr.bf16.mxu1 %v1054_v0  ;;  %vm1157_vm2 = vmpackc.low %vm157_vm0, %vm1055_vm1  ;;  %v1057_v7 = vmov 0.0   ;;  %v1174_v9 = vld [vmem:[%s1377_s1] sm:$0x3]  ;;  %vm79_vm4 = vcmask 130048   ;;  %v404_v11 = vld [vmem:[%s1378_s9 + $0x8] sm:$0xff] }
   0x2   :  { %1396 = sst [smem:[#allocation5_spill]] %s1376_s10  ;;  %s1397_s26 = sld [smem:[#allocation4_spill]]  ;;  %897 = vmatprep.mubr.msk.f32.mxu0 %vm1056_vm3, %v1057_v7  ;;  %941 = vmatprep.mubr.msk.f32.mxu1 %vm1056_vm3, %v1057_v7  ;;  %v403_v10 = vld [vmem:[%s1378_s9] sm:$0xff]  ;;  %v76_v13 = vld [vmem:[%s1379_s6 + $0x8] sm:$0x1f]  ;;  %vm153_vm5 = vcmask 105472  }
   0x3   :  { %s1400_s30 = sld [smem:[#allocation5_spill]]  ;;  %v75_v12 = vld [vmem:[%s1379_s6] sm:$0xff]  ;;  %v1001_v15 = vpack.c.bf16 %v404_v11, %v403_v10  ;;  %v405_v17 = vld [vmem:[%s1378_s9 + $0x10] sm:$0xff]  ;;  %v406_v18 = vld [vmem:[%s1378_s9 + $0x18] sm:$0xff]  ;;  %vm509_vm6 = vcmask 326656   ;;  %vm243_vm7 = vcmask 1041408  }
   0x4   :  { %v60_v14 = vld [vmem:[%s1380_s0] sm:$0x3]  ;;  %v973_v16 = vpack.c.bf16 %v76_v13, %v75_v12  ;;  %v1004_v19 = vpack.c.bf16 %v406_v18, %v405_v17  ;;  %v65_v21 = vld [vmem:[%s1381_s4 + $0x8] sm:$0xff]  ;;  %v66_v26 = vld [vmem:[%s1381_s4 + $0x10] sm:$0xff]  ;;  %vm239_vm9 = vcmask 343040   ;;  %vm71_vm10 = vcmask 164864  }
   0x5   :  { %v64_v20 = vld [vmem:[%s1381_s4] sm:$0xff]  ;;  %v408_v23 = vld [vmem:[%s1378_s9 + $0x28] sm:$0xff]  ;;  %v67_v27 = vld [vmem:[%s1381_s4 + $0x18] sm:$0xff]  ;;  %v318_v40 = vmul.f32 %v65_v21, %v65_v21  ;;  %v319_v47 = vmul.f32 %v66_v26, %v66_v26  ;;  %vm398_vm11 = vcmask 58368   ;;  %vm675_vm12 = vcmask 261120  }
   0x6   :  { %v407_v22 = vld [vmem:[%s1378_s9 + $0x20] sm:$0xff]  ;;  %v977_v24 = vpack.c.bf16 %v65_v21, %v64_v20  ;;  %v409_v28 = vld [vmem:[%s1378_s9 + $0x30] sm:$0xff]  ;;  %v410_v29 = vld [vmem:[%s1378_s9 + $0x38] sm:$0xff]  ;;  %v980_v32 = vpack.c.bf16 %v67_v27, %v66_v26  ;;  %v317_v39 = vmul.f32 %v64_v20, %v64_v20  ;;  %v320_v48 = vmul.f32 %v67_v27, %v67_v27 }
   0x7   :  { %v1007_v25 = vpack.c.bf16 %v408_v23, %v407_v22  ;;  %v1238_v30 = vld.sshfl [vmem:[%s1382_s3] sm:$0x33 pattern:$0x76325410]  ;;  %v1010_v33 = vpack.c.bf16 %v410_v29, %v409_v28  ;;  %v69_v35 = vld [vmem:[%s1381_s4 + $0x28] sm:$0x3]  ;;  %vm1260_vm8 = vmpackc.low %vm243_vm7, %vm1055_vm1 }
   0x8   :  { %v77_v1 = vld [vmem:[%s1397_s26] sm:$0xff]  ;;  %v78_v2 = vld [vmem:[%s1397_s26 + $0x8] sm:$0xff]  ;;  %v507_v31 = vcombine.high %v1238_v30, %v1238_v30  ;;  %v413_v43 = vld [vmem:[%s1378_s9 + $0x50] sm:$0xff]  ;;  %v987_v46 = vpack.c.bf16 %v318_v40, %v317_v39  ;;  %v990_v52 = vpack.c.bf16 %v320_v48, %v319_v47  ;;  %v322_v54 = vmul.f32 %v69_v35, %v69_v35 }
   0x9   :  { %v970_v3 = vpack.c.bf16 %v78_v2, %v77_v1  ;;  %v424_v5 = vld [vmem:[%s1400_s30] sm:$0xff]  ;;  %v425_v6 = vld [vmem:[%s1400_s30 + $0x8] sm:$0x1f]  ;;  %v414_v44 = vld [vmem:[%s1378_s9 + $0x58] sm:$0xff]  ;;  %vm835_vm13 = vcmask 1024  }
   0xa   :  { %v997_v8 = vpack.c.bf16 %v425_v6, %v424_v5  ;;  %v68_v34 = vld [vmem:[%s1381_s4 + $0x20] sm:$0xff]  ;;  %v412_v37 = vld [vmem:[%s1378_s9 + $0x48] sm:$0xff]  ;;  %v1016_v49 = vpack.c.bf16 %v414_v44, %v413_v43  ;;  %v417_v56 = vld [vmem:[%s1378_s9 + $0x70] sm:$0xff] }
   0xb   :  { %971 = vmatpush3.bf16.msra.mxu0 %v970_v3  ;;  %v411_v36 = vld [vmem:[%s1378_s9 + $0x40] sm:$0xff]  ;;  %v983_v38 = vpack.c.bf16 %v69_v35, %v68_v34  ;;  %v416_v51 = vld [vmem:[%s1378_s9 + $0x68] sm:$0xff]  ;;  %v321_v53 = vmul.f32 %v68_v34, %v68_v34  ;;  %v418_v57 = vld [vmem:[%s1378_s9 + $0x78] sm:$0xff] }
   0xc   :  { %999 = vmatpush3.bf16.msk.msra.mxu1 %vm1157_vm2, %v997_v8  ;;  %972 = vmatprep.subr.bf16.mxu0 %v1054_v0  ;;  %v1013_v42 = vpack.c.bf16 %v412_v37, %v411_v36  ;;  %v70_v45 = vld [vmem:[%s1383_s5] sm:$0x3]  ;;  %v1022_v59 = vpack.c.bf16 %v418_v57, %v417_v56  ;;  %v583_v61 = vld [vmem:[%s1384_s11 + $0x8] sm:$0xff]  ;;  %v421_v3 = vld [vmem:[%s1378_s9 + $0x90] sm:$0xff] }
   0xd   :  { %1000 = vmatprep.subr.bf16.mxu1 %v1054_v0  ;;  %v415_v50 = vld [vmem:[%s1378_s9 + $0x60] sm:$0xff]  ;;  %v993_v58 = vpack.c.bf16 %v322_v54, %v321_v53  ;;  %v420_v63 = vld [vmem:[%s1378_s9 + $0x88] sm:$0xff]  ;;  %v422_v4 = vld [vmem:[%s1378_s9 + $0x98] sm:$0xff] }
   0xe   :  { %898 = vmatmul.mubr.msk.f32.vlgmr.msra.gmra.mrb[0].mxu0 %vm79_vm4, %v1174_v9  ;;  %v1019_v55 = vpack.c.bf16 %v416_v51, %v415_v50  ;;  %v582_v60 = vld [vmem:[%s1384_s11] sm:$0xff]  ;;  %v1028_v5 = vpack.c.bf16 %v422_v4, %v421_v3  ;;  %v665_v11 = vld [vmem:[%s1386_s13 + $0x8] sm:$0xff]  ;;  %v666_v13 = vld [vmem:[%s1386_s13 + $0x10] sm:$0xff] }
   0xf   :  { %942 = vmatmul.mubr.msk.f32.vlgmr.msra.gmra.mrb[0].mxu1 %vm153_vm5, %v60_v14  ;;  %975 = vmatpush3.bf16.msk.msra.mxu0 %vm1157_vm2, %v973_v16  ;;  %v419_v62 = vld [vmem:[%s1378_s9 + $0x80] sm:$0xff]  ;;  %v1031_v1 = vpack.c.bf16 %v583_v61, %v582_v60  ;;  %v22_v16 = vstv %s1387_s8  ;;  %v751_v36 = vld [vmem:[%s1390_s15 + $0x8] sm:$0xff] }
  0x10   :  { %1002 = vmatpush1.bf16.msra.mxu1 %v1001_v15  ;;  %904 = vmatprep.mubr.msk.f32.mxu0 %vm1056_vm3, %v1057_v7  ;;  %v1025_v2 = vpack.c.bf16 %v420_v63, %v419_v62  ;;  %v423_v6 = vld [vmem:[%s1378_s9 + $0xa0] sm:$0xff]  ;;  %23 = vst [vmem:[#allocation2] sm:$0x1] %v22_v16 }
  0x11   :  { %1003 = vmatprep.subr.bf16.mxu1 %v1054_v0  ;;  %976 = vmatprep.subr.bf16.mxu0 %v1054_v0  ;;  %v62_v8 = vld [vmem:[%s1385_s2] sm:$0x3] }
  0x12   :  { %852 = vmatprep.mubr.msk.f32.mxu1 %vm509_vm6, %v507_v31  ;;  %v72_v10 = vsel %vm71_vm10, %v62_v8, 0.0  ;;  %v24_v31 = vstv %s1389_s16  ;;  %v750_v35 = vld [vmem:[%s1390_s15] sm:$0xff] }
  0x13   :  { %73 = vadd.xlane.f32.xlu0 %v72_v10  ;;  %25 = vst [vmem:[#allocation3] sm:$0x1] %v24_v31  ;;  %v1040_v37 = vpack.c.bf16 %v751_v36, %v750_v35 }
  0x14   :  { %1005 = vmatpush1.bf16.msra.mxu1 %v1004_v19 }
  0x15   :  { %1006 = vmatprep.subr.bf16.mxu1 %v1054_v0 }
  0x16   :  { %905 = vmatmul.mubr.msk.f32.vlgmr.msra.gmra.mrb[0].mxu0 %vm153_vm5, %v60_v14  ;;  %v667_v14 = vld [vmem:[%s1386_s13 + $0x18] sm:$0xff] }
  0x17   :  { %978 = vmatpush3.bf16.msra.mxu0 %v977_v24  ;;  %919 = vmatprep.mubr.msk.f32.mxu0 %vm1056_vm3, %v1057_v7  ;;  %v1037_v15 = vpack.c.bf16 %v667_v14, %v666_v13  ;;  %v844_v43 = vld [vmem:[#allocation2] ss:$0 sm:$0xff] }
  0x18   :  { %1008 = vmatpush1.bf16.msra.mxu1 %v1007_v25  ;;  %979 = vmatprep.subr.bf16.mxu0 %v1054_v0 }
  0x19   :  { %1009 = vmatprep.subr.bf16.mxu1 %v1054_v0 }
  0x1a   :  { %v857_v48 = vld [vmem:[#allocation3] ss:$0 sm:$0xff] }
  0x1b   :  { %981 = vmatpush3.bf16.msra.mxu0 %v980_v32 }
  0x1c   :  { %1011 = vmatpush1.bf16.msra.mxu1 %v1010_v33  ;;  %982 = vmatprep.subr.bf16.mxu0 %v1054_v0 }
  0x1d   :  { %1012 = vmatprep.subr.bf16.mxu1 %v1054_v0 }
  0x1f   :  { %985 = vmatpush3.bf16.msk.msra.mxu0 %vm1260_vm8, %v983_v38  ;;  %v855_v38 = vld [vmem:[%s1391_s14] ss:$0 sm:$0xff] }
  0x20   :  { %1014 = vmatpush1.bf16.msra.mxu1 %v1013_v42  ;;  %986 = vmatprep.subr.bf16.mxu0 %v1054_v0 }
  0x21   :  { %1015 = vmatprep.subr.bf16.mxu1 %v1054_v0 }
  0x22   :  { %920 = vmatmul.mubr.msk.f32.vlgmr.msra.gmra.mrb[2].mxu0 %vm239_vm9, %v70_v45 }
  0x23   :  { %988 = vmatpush3.bf16.msra.mxu0 %v987_v46  ;;  %934 = vmatprep.mubr.msk.f32.mxu0 %vm1056_vm3, %v1057_v7 }
  0x24   :  { %1017 = vmatpush1.bf16.msra.mxu1 %v1016_v49  ;;  %989 = vmatprep.subr.bf16.mxu0 %v1054_v0 }
  0x25   :  { %1018 = vmatprep.subr.bf16.mxu1 %v1054_v0 }
  0x27   :  { %991 = vmatpush3.bf16.msra.mxu0 %v990_v52 }
  0x28   :  { %1020 = vmatpush1.bf16.msra.mxu1 %v1019_v55  ;;  %992 = vmatprep.subr.bf16.mxu0 %v1054_v0 }
  0x29   :  { %1021 = vmatprep.subr.bf16.mxu1 %v1054_v0 }
  0x2b   :  { %995 = vmatpush3.bf16.msk.msra.mxu0 %vm1260_vm8, %v993_v58 }
  0x2c   :  { %1023 = vmatpush1.bf16.msra.mxu1 %v1022_v59  ;;  %1030 = vmatprep.subr.bf16.mxu0 %v1054_v0 }
  0x2d   :  { %1024 = vmatprep.subr.bf16.mxu1 %v1054_v0 }
  0x2e   :  { %935 = vmatmul.mubr.msk.f32.vlgmr.msra.gmra.mrb[4].mxu0 %vm239_vm9, %v70_v45 }
  0x2f   :  { %1032 = vmatpush3.bf16.msra.mxu0 %v1031_v1  ;;  %948 = vmatprep.mubr.msk.f32.mxu0 %vm1056_vm3, %v1057_v7 }
  0x30   :  { %1026 = vmatpush1.bf16.msra.mxu1 %v1025_v2  ;;  %1033 = vmatprep.subr.bf16.mxu0 %v1054_v0 }
  0x31   :  { %1027 = vmatprep.subr.bf16.mxu1 %v1054_v0 }
  0x32   :  { %949 = vmatmul.mubr.msk.f32.vlgmr.msra.gmra.mrb[6].mxu0 %vm79_vm4, %v1174_v9  ;;  %v664_v9 = vld [vmem:[%s1386_s13] sm:$0xff] }
  0x33   :  { %959 = vmatprep.mubr.msk.f32.mxu0 %vm1056_vm3, %v1057_v7  ;;  %v1034_v12 = vpack.c.bf16 %v665_v11, %v664_v9 }
  0x34   :  { %1029 = vmatpush1.bf16.msra.mxu1 %v1028_v5 }
  0x35   :  { %552 = vmatprep.subr.mxu1 %v1057_v7  ;;  %1035 = vmatpush3.bf16.msra.mxu0 %v1034_v12 }
  0x36   :  { %1036 = vmatprep.subr.bf16.mxu0 %v1054_v0 }
  0x38   :  { %553 = vmatpush1.msra.mxu1 %v423_v6 }
  0x39   :  { %577 = vmatmul.mubr.f32.vlgmr.msra.gmra.mrb[2].mxu1 %v1238_v30  ;;  %1038 = vmatpush3.bf16.msra.mxu0 %v1037_v15  ;;  %v854_v30 = vld [vmem:[%s1388_s12] ss:$0 sm:$0xff] }
  0x3a   :  { %1039 = vmatprep.subr.bf16.mxu0 %v1054_v0 }
  0xe2   :  { %v495_v17 = vpop.f32.mrb[0].mxu1 }
  0xe3   :  { %v943_v18 = vpop.f32.mrb[1].mxu1 }
  0xf5   :  { %v313_v19 = vpop.f32.mrb[2].mxu0 }
  0xf6   :  { %v921_v20 = vpop.f32.mrb[3].mxu0  ;;  %v396_v21 = vmul.f32 %v313_v19, %v313_v19 }
 0x101   :  { %v392_v22 = vpop.f32.mrb[4].mxu0 }
 0x102   :  { %v397_v23 = vsub.f32 %v396_v21, %v392_v22  ;;  %v936_v24 = vpop.f32.mrb[5].mxu0 }
 0x104   :  { %v399_v25 = vsel %vm398_vm11, %v397_v23, 0.0 }
 0x105   :  { %400 = vadd.xlane.f32.xlu0 %v399_v25  ;;  %v650_v26 = vpop.f32.mrb[6].mxu0 }
 0x106   :  { %v950_v27 = vpop.f32.mrb[7].mxu0 }
 0x10c   :  { %v578_v28 = vpop.f32.mrb[2].mxu1 }
 0x10d   :  { %v579_v0 = vadd.f32 %v578_v28, %v495_v17  ;;  %v580_v29 = vpop.f32.mrb[3].mxu1 }
 0x10f   :  { %v654_v32 = vadd.f32 %v650_v26, %v579_v0 }
 0x111   :  { %v662_v33 = vadd.f32 %v854_v30, %v654_v32 }
 0x113   :  { %v663_v34 = vmax.f32 %v662_v33, 0.0 }
 0x115   :  { %960 = vmatmul.mubr.msk.f32.vlgmr.msra.gmra.mrb[8].mxu0 %vm675_vm12, %v663_v34 }
 0x116   :  { %966 = vmatprep.mubr.msk.f32.mxu0 %vm1056_vm3, %v1057_v7  ;;  %1041 = vmatpush3.bf16.msra.mxu0 %v1040_v37  ;;  %v74_v7 = vpop.xlane.xlu0 %73 }
 0x117   :  { %v1042_v45 = vadd.f32 %v844_v43, %v74_v7 }
 0x192   :  { %v401_v44 = vpop.xlane.xlu0 %400 }
 0x193   :  { %v402_v46 = vmul.f32 0.5, %v401_v44 }
 0x195   :  { %v1043_v47 = vadd.f32 %v1042_v45, %v402_v46 }
 0x197   :  { %v1044_v49 = vadd.f32 %v1043_v47, %v857_v48 }
 0x1e8   :  { %v745_v39 = vpop.f32.mrb[8].mxu0 }
 0x1e9   :  { %v746_v40 = vadd.f32 %v855_v38, %v745_v39  ;;  %v961_v41 = vpop.f32.mrb[9].mxu0 }
 0x1eb   :  { %v749_v42 = vmax.f32 %v746_v40, 0.0 }
 0x1ed   :  { %967 = vmatmul.mubr.msk.f32.vlgmr.msra.gmra.mrb[0].mxu0 %vm79_vm4, %v749_v42 }
 0x2c0   :  { %v828_v50 = vpop.f32.mrb[0].mxu0 }
 0x2c1   :  { %v1045_v51 = vadd.f32 %v1044_v49, %v828_v50  ;;  %v968_v52 = vpop.f32.mrb[1].mxu0 }
 0x2c3   :  { %836 = vst.msk [vmem:[%s1392_s17] sm:$0x3] %vm835_vm13, %v1045_v51 }

// kernel: cdeepfm_forward.2
= control target key start
LH: loop header
LB: loop body
LE: loop exit
PB: predicated region body
PF: predicated region fallthrough
CT: control target
= control target key end

     0   :  { %v3704_v0 = vmov 0   ;;  %v5934_v5 = vmov 0.0|0.0   ;;  %vm3706_vm0 = vmmov 0   ;;  %v5932_v6 = vmov 0.0   ;;  %s5912_s2 = inlined_call_operand.vmem [shape: f32[632,1], index: 2, kind: input, shape index: {}]   ;;  %s5913_s1 = inlined_call_operand.vmem [shape: f32[632,1], index: 1, kind: input, shape index: {}]   ;;  %s5914_s4 = inlined_call_operand.vmem [shape: f32[34,64], index: 4, kind: input, shape index: {}]   ;;  %s5915_s0 = inlined_call_operand.vmem [shape: f32[632,34], index: 0, kind: input, shape index: {}]   ;;  %s5916_s5 = inlined_call_operand.vmem [shape: f32[1,64], index: 5, kind: input, shape index: {}]   ;;  %s5917_s6 = inlined_call_operand.vmem [shape: f32[1,64], index: 6, kind: input, shape index: {}]   ;;  %s5918_s3 = inlined_call_operand.vmem [shape: f32[2,632], index: 3, kind: input, shape index: {}]   ;;  %s5919_s7 = inlined_call_operand.vmem [shape: f32[64,34], index: 7, kind: input, shape index: {}]   ;;  %s5920_s9 = inlined_call_operand.vmem [shape: f32[34,34], index: 9, kind: input, shape index: {}]   ;;  %s5921_s11 = inlined_call_operand.vmem [shape: f32[34,34], index: 11, kind: input, shape index: {}]   ;;  %s5922_s8 = inlined_call_operand.vmem [shape: f32[1,34], index: 8, kind: input, shape index: {}]   ;;  %s5923_s13 = inlined_call_operand.vmem [shape: f32[34,64], index: 13, kind: input, shape index: {}]   ;;  %s5924_s10 = inlined_call_operand.vmem [shape: f32[1,34], index: 10, kind: input, shape index: {}]   ;;  %s5925_s15 = inlined_call_operand.vmem [shape: f32[64,16], index: 15, kind: input, shape index: {}]   ;;  %s5926_s12 = inlined_call_operand.vmem [shape: f32[1,34], index: 12, kind: input, shape index: {}]   ;;  %s5927_s14 = inlined_call_operand.vmem [shape: f32[1,64], index: 14, kind: input, shape index: {}]   ;;  %s5928_s16 = inlined_call_operand.vmem [shape: f32[1,16], index: 16, kind: input, shape index: {}]   ;;  %s5929_s17 = inlined_call_operand.vmem [shape: f32[2,16], index: 17, kind: output, shape index: {}]  }
   0x1   :  { %5956 = sst [smem:[#allocation34_spill]] %s5912_s2  ;;  %3697 = vset.pattern.permute.xlu1 %v3704_v0  ;;  %3696 = vset.pattern.permute.xlu0 %v3704_v0  ;;  %vm1570_vm1 = vcmask 1041408   ;;  %vm1332_vm2 = vcmask 277504   ;;  %vm2231_vm3 = vcmask 982016   ;;  %vm2459_vm4 = vcmask 523264  }
   0x2   :  { %5957 = sst [smem:[#allocation35_spill]] %s5913_s1  ;;  %s5958_s26 = sld [smem:[#allocation34_spill]]  ;;  %3552 = vmatprep.subr.bf16.mxu0 %v5934_v5  ;;  %3205 = vmatprep.mubr.msk.f32.mxu0 %vm3706_vm0, %v5932_v6  ;;  %vm2886_vm5 = vcmask 123904  }
   0x3   :  { %3685 = vmatprep.subr.bf16.mxu1 %v5934_v5  ;;  %3373 = vmatprep.mubr.msk.f32.mxu1 %vm3706_vm0, %v5932_v6  ;;  %s5959_s27 = sld [smem:[#allocation35_spill]]  ;;  %v848_v5 = vld [vmem:[%s5914_s4 + $0x10] sm:$0xff] }
   0x8   :  { %v3802_v1 = vld [vmem:[%s5958_s26 + $0x10] sm:$0xff]  ;;  %v3807_v2 = vld [vmem:[%s5958_s26] sm:$0xff]  ;;  %v3814_v3 = vld [vmem:[%s5958_s26 + $0x18] sm:$0xff] }
   0x9   :  { %226 = vperm.xlu1 %3697, %v3802_v1   ;;  %216 = vperm.xlu0 %3696, %v3807_v2   ;;  %v3819_v4 = vld [vmem:[%s5958_s26 + $0x8] sm:$0xff]  ;;  %v3837_v8 = vld [vmem:[%s5958_s26 + $0x20] sm:$0xff]  ;;  %v71_v9 = vld [vmem:[%s5958_s26 + $0x78] sm:$0xff] }
   0xa   :  { %v3832_v7 = vld [vmem:[%s5958_s26 + $0x28] sm:$0xff]  ;;  %v703_v10 = vld [vmem:[%s5959_s27 + $0x78] sm:$0xff]  ;;  %v3855_v12 = vld [vmem:[%s5958_s26 + $0x30] sm:$0xff] }
   0xb   :  { %v3850_v11 = vld [vmem:[%s5958_s26 + $0x38] sm:$0xff]  ;;  %v3857_v13 = vmul.f32 %v703_v10, %v71_v9  ;;  %v3864_v14 = vld [vmem:[%s5958_s26 + $0x48] sm:$0xff]  ;;  %v3869_v15 = vld [vmem:[%s5958_s26 + $0x40] sm:$0xff] }
   0xc   :  { %v3876_v16 = vld [vmem:[%s5958_s26 + $0x58] sm:$0xff]  ;;  %v3881_v17 = vld [vmem:[%s5958_s26 + $0x50] sm:$0xff]  ;;  %v3886_v18 = vld [vmem:[%s5958_s26 + $0x68] sm:$0xff] }
   0xd   :  { %231 = vperm.xlu1 %3697, %v3814_v3   ;;  %221 = vperm.xlu0 %3696, %v3819_v4   ;;  %v3893_v19 = vld [vmem:[%s5958_s26 + $0x60] sm:$0xff]  ;;  %v3898_v20 = vld [vmem:[%s5958_s26 + $0x108] sm:$0xff]  ;;  %v3917_v25 = vld [vmem:[%s5958_s26 + $0x118] sm:$0xff] }
   0xe   :  { %v721_v21 = vld [vmem:[%s5959_s27 + $0x108] sm:$0xff]  ;;  %v3909_v23 = vld [vmem:[%s5958_s26 + $0x100] sm:$0xff]  ;;  %v723_v27 = vld [vmem:[%s5959_s27 + $0x118] sm:$0xff] }
   0xf   :  { %v3904_v22 = vmul.f32 %v721_v21, %v3898_v20  ;;  %v720_v24 = vld [vmem:[%s5959_s27 + $0x100] sm:$0xff]  ;;  %v3928_v28 = vld [vmem:[%s5958_s26 + $0x110] sm:$0xff]  ;;  %v3939_v31 = vmul.f32 %v723_v27, %v3917_v25  ;;  %v3947_v33 = vld [vmem:[%s5958_s26 + $0x128] sm:$0xff] }
  0x10   :  { %v3920_v26 = vmul.f32 %v720_v24, %v3909_v23  ;;  %v722_v29 = vld [vmem:[%s5959_s27 + $0x110] sm:$0xff]  ;;  %v725_v34 = vld [vmem:[%s5959_s27 + $0x128] sm:$0xff]  ;;  %v3955_v35 = vld [vmem:[%s5958_s26 + $0x120] sm:$0xff] }
  0x11   :  { %241 = vperm.xlu1 %3697, %v3832_v7   ;;  %236 = vperm.xlu0 %3696, %v3837_v8   ;;  %v3936_v30 = vld [vmem:[%s5958_s26 + $0x70] sm:$0xff]  ;;  %v3942_v32 = vmul.f32 %v722_v29, %v3928_v28  ;;  %v3960_v36 = vmul.f32 %v725_v34, %v3947_v33  ;;  %v724_v37 = vld [vmem:[%s5959_s27 + $0x120] sm:$0xff]  ;;  %v3968_v38 = vld [vmem:[%s5958_s26 + $0x138] sm:$0xff] }
  0x12   :  { %v727_v39 = vld [vmem:[%s5959_s27 + $0x138] sm:$0xff]  ;;  %v3974_v40 = vmul.f32 %v724_v37, %v3955_v35  ;;  %v3982_v42 = vld [vmem:[%s5958_s26 + $0x130] sm:$0xff]  ;;  %v3990_v44 = vld [vmem:[%s5958_s26 + $0x148] sm:$0xff] }
  0x13   :  { %5960 = vst [vmem:[#allocation2_spill] sm:$0xff] %v3960_v36  ;;  %v3977_v41 = vmul.f32 %v727_v39, %v3968_v38  ;;  %v726_v43 = vld [vmem:[%s5959_s27 + $0x130] sm:$0xff]  ;;  %v729_v46 = vld [vmem:[%s5959_s27 + $0x148] sm:$0xff]  ;;  %v4001_v47 = vld [vmem:[%s5958_s26 + $0x140] sm:$0xff] }
  0x14   :  { %v3993_v45 = vmul.f32 %v726_v43, %v3982_v42  ;;  %v728_v48 = vld [vmem:[%s5959_s27 + $0x140] sm:$0xff]  ;;  %v4009_v49 = vld [vmem:[%s5958_s26 + $0x88] sm:$0xff]  ;;  %v4017_v51 = vmul.f32 %v729_v46, %v3990_v44  ;;  %v4025_v53 = vld [vmem:[%s5958_s26 + $0x158] sm:$0xff] }
  0x15   :  { %251 = vperm.xlu1 %3697, %v3850_v11   ;;  %246 = vperm.xlu0 %3696, %v3855_v12   ;;  %5961 = vst [vmem:[#allocation3_spill] sm:$0xff] %v3977_v41  ;;  %v4014_v50 = vld [vmem:[%s5958_s26 + $0x80] sm:$0xff]  ;;  %v4020_v52 = vmul.f32 %v728_v48, %v4001_v47  ;;  %v731_v54 = vld [vmem:[%s5959_s27 + $0x158] sm:$0xff]  ;;  %v4033_v55 = vld [vmem:[%s5958_s26 + $0x150] sm:$0xff] }
  0x16   :  { %5962 = vst [vmem:[#allocation4_spill] sm:$0xff] %v3993_v45  ;;  %5963 = vst [vmem:[#allocation5_spill] sm:$0xff] %v4017_v51  ;;  %v4037_v56 = vmul.f32 %v731_v54, %v4025_v53  ;;  %v730_v57 = vld [vmem:[%s5959_s27 + $0x150] sm:$0xff]  ;;  %v4045_v58 = vld [vmem:[%s5958_s26 + $0x168] sm:$0xff] }
  0x17   :  { %5964 = vst [vmem:[#allocation6_spill] sm:$0xff] %v4020_v52  ;;  %v733_v59 = vld [vmem:[%s5959_s27 + $0x168] sm:$0xff]  ;;  %v4051_v60 = vmul.f32 %v730_v57, %v4033_v55  ;;  %v4059_v62 = vld [vmem:[%s5958_s26 + $0x160] sm:$0xff]  ;;  %v4067_v0 = vld [vmem:[%s5958_s26 + $0x170] sm:$0xff] }
  0x18   :  { %5965 = vst [vmem:[#allocation7_spill] sm:$0xff] %v4037_v56  ;;  %v4054_v61 = vmul.f32 %v733_v59, %v4045_v58  ;;  %v732_v63 = vld [vmem:[%s5959_s27 + $0x160] sm:$0xff]  ;;  %v734_v10 = vld [vmem:[%s5959_s27 + $0x170] sm:$0xff]  ;;  %v4092_v34 = vld [vmem:[%s5958_s26 + $0x178] sm:$0xff] }
  0x19   :  { %261 = vperm.xlu1 %3697, %v3864_v14   ;;  %256 = vperm.xlu0 %3696, %v3869_v15   ;;  %5966 = vst [vmem:[#allocation8_spill] sm:$0xff] %v4051_v60  ;;  %v4078_v21 = vld [vmem:[%s5958_s26 + $0x1c0] sm:$0xff]  ;;  %v4084_v27 = vmul.f32 %v734_v10, %v4067_v0  ;;  %v735_v37 = vld [vmem:[%s5959_s27 + $0x178] sm:$0xff]  ;;  %v4105_v43 = vld [vmem:[%s5958_s26 + $0x1c8] sm:$0xff] }
  0x1a   :  { %5967 = vst [vmem:[#allocation9_spill] sm:$0xff] %v4054_v61  ;;  %v744_v24 = vld [vmem:[%s5959_s27 + $0x1c0] sm:$0xff]  ;;  %v4100_v39 = vmul.f32 %v735_v37, %v4092_v34  ;;  %v745_v46 = vld [vmem:[%s5959_s27 + $0x1c8] sm:$0xff]  ;;  %v4113_v48 = vld [vmem:[%s5958_s26 + $0x98] sm:$0xff] }
  0x1b   :  { %5969 = vst [vmem:[#allocation11_spill] sm:$0xff] %v4084_v27  ;;  %v4087_v29 = vmul.f32 %v744_v24, %v4078_v21  ;;  %v4118_v54 = vld [vmem:[%s5958_s26 + $0x90] sm:$0xff]  ;;  %v4121_v57 = vmul.f32 %v745_v46, %v4105_v43  ;;  %v4128_v59 = vld [vmem:[%s5958_s26 + $0xa8] sm:$0xff]  ;;  %v846_v10 = vld [vmem:[%s5914_s4] sm:$0xff] }
  0x1c   :  { %5971 = vst [vmem:[#allocation13_spill] sm:$0xff] %v4100_v39  ;;  %v847_v24 = vld [vmem:[%s5914_s4 + $0x8] sm:$0xff]  ;;  %v4146_v37 = vld [vmem:[%s5958_s26 + $0xb8] sm:$0xff]  ;;  %v4151_v46 = vld [vmem:[%s5958_s26 + $0xb0] sm:$0xff] }
  0x1d   :  { %271 = vperm.xlu1 %3697, %v3876_v16   ;;  %266 = vperm.xlu0 %3696, %v3881_v17   ;;  %5970 = vst [vmem:[#allocation12_spill] sm:$0xff] %v4087_v29  ;;  %5972 = vst [vmem:[#allocation14_spill] sm:$0xff] %v4121_v57  ;;  %v3553_v6 = vpack.c.bf16 %v847_v24, %v846_v10  ;;  %v849_v39 = vld [vmem:[%s5914_s4 + $0x18] sm:$0xff]  ;;  %v4164_v61 = vld [vmem:[%s5958_s26 + $0xc8] sm:$0xff]  ;;  %v5973_v24 = vmov 0.0|0.0  }
  0x1e   :  { %v3556_v27 = vpack.c.bf16 %v849_v39, %v848_v5  ;;  %v4169_v10 = vld [vmem:[%s5958_s26 + $0xc0] sm:$0xff]  ;;  %v4186_v39 = vld [vmem:[%s5958_s26 + $0xd0] sm:$0xff]  ;;  %v4359_v51 = vld [vmem:[%s5958_s26 + $0x228] sm:$0xff] }
  0x1f   :  { %3554 = vmatpush3.bf16.msra.mxu0 %v3553_v6  ;;  %3688 = vmatpush3.bf16.msra.mxu1 %v3553_v6  ;;  %v850_v5 = vld [vmem:[%s5914_s4 + $0x20] sm:$0x3]  ;;  %v4181_v6 = vld [vmem:[%s5958_s26 + $0xd8] sm:$0xff]  ;;  %v4214_v56 = vld [vmem:[%s5958_s26 + $0xf0] sm:$0xff]  ;;  %5986 = vst [vmem:[#allocation26_spill] sm:$0xff] %v4359_v51 }
  0x20   :  { %3555 = vmatprep.subr.bf16.mxu0 %v5973_v24  ;;  %3686 = vmatprep.subr.bf16.mxu1 %v5973_v24  ;;  %v4197_v24 = vld [vmem:[%s5958_s26 + $0xe8] sm:$0xff]  ;;  %v4346_v60 = vld [vmem:[%s5958_s26 + $0x210] sm:$0xff]  ;;  %v4438_v29 = vld [vmem:[%s5958_s26 + $0x260] sm:$0xff] }
  0x21   :  { %281 = vperm.xlu1 %3697, %v3886_v18   ;;  %276 = vperm.xlu0 %3696, %v3893_v19   ;;  %5985 = vst [vmem:[#allocation25_spill] sm:$0xff] %v4346_v60  ;;  %5993 = vst [vmem:[#allocation33_spill] sm:$0xff] %v4438_v29  ;;  %v142_v45 = vld [vmem:[%s5915_s0 + $0x38] sm:$0xff]  ;;  %v134_v36 = vld [vmem:[%s5958_s26 + $0x270] sm:$0xff] }
  0x23   :  { %3557 = vmatpush3.bf16.msra.mxu0 %v3556_v27  ;;  %3689 = vmatpush3.bf16.msra.mxu1 %v3556_v27  ;;  %v5974_v27 = vmov 0.0  }
  0x24   :  { %3203 = vmatprep.subr.mxu0 %v5974_v27  ;;  %3687 = vmatprep.subr.mxu1 %v5974_v27 }
  0x25   :  { %291 = vperm.xlu1 %3697, %v71_v9   ;;  %286 = vperm.xlu0 %3696, %v3936_v30   ;;  %v4070_v9 = vmul.f32 %v732_v63, %v4059_v62  ;;  %v4133_v63 = vld [vmem:[%s5958_s26 + $0xa0] sm:$0xff] }
  0x27   :  { %5968 = vst [vmem:[#allocation10_spill] sm:$0xff] %v4070_v9  ;;  %3204 = vmatpush3.msk.msra.mxu0 %vm1570_vm1, %v850_v5  ;;  %3690 = vmatpush3.msk.msra.mxu1 %vm1570_vm1, %v850_v5  ;;  %v4202_v9 = vld [vmem:[%s5958_s26 + $0xe0] sm:$0xff]  ;;  %v4209_v5 = vld [vmem:[%s5958_s26 + $0xf8] sm:$0xff] }
  0x29   :  { %301 = vperm.xlu1 %3697, %v4009_v49   ;;  %296 = vperm.xlu0 %3696, %v4014_v50  }
  0x2d   :  { %311 = vperm.xlu1 %3697, %v4113_v48   ;;  %306 = vperm.xlu0 %3696, %v4118_v54  }
  0x31   :  { %321 = vperm.xlu1 %3697, %v4128_v59   ;;  %316 = vperm.xlu0 %3696, %v4133_v63  }
  0x35   :  { %331 = vperm.xlu1 %3697, %v4146_v37   ;;  %326 = vperm.xlu0 %3696, %v4151_v46  }
  0x39   :  { %341 = vperm.xlu1 %3697, %v4164_v61   ;;  %336 = vperm.xlu0 %3696, %v4169_v10  }
  0x3d   :  { %351 = vperm.xlu1 %3697, %v4181_v6   ;;  %346 = vperm.xlu0 %3696, %v4186_v39  }
  0x41   :  { %361 = vperm.xlu1 %3697, %v4197_v24   ;;  %356 = vperm.xlu0 %3696, %v4202_v9  }
  0x45   :  { %371 = vperm.xlu1 %3697, %v4209_v5   ;;  %366 = vperm.xlu0 %3696, %v4214_v56  }
  0x49   :  { %381 = vperm.xlu1 %3697, %v3898_v20   ;;  %376 = vperm.xlu0 %3696, %v3909_v23   ;;  %v4239_v20 = vld [vmem:[%s5958_s26 + $0x180] sm:$0xff]  ;;  %v4244_v23 = vld [vmem:[%s5958_s26 + $0x1d0] sm:$0xff] }
  0x4a   :  { %5975 = vst [vmem:[#allocation15_spill] sm:$0xff] %v4244_v23 }
  0x4d   :  { %391 = vperm.xlu1 %3697, %v3917_v25   ;;  %386 = vperm.xlu0 %3696, %v3928_v28   ;;  %v4251_v25 = vld [vmem:[%s5958_s26 + $0x188] sm:$0xff]  ;;  %v4256_v28 = vld [vmem:[%s5958_s26 + $0x1d8] sm:$0xff] }
  0x4e   :  { %5976 = vst [vmem:[#allocation16_spill] sm:$0xff] %v4256_v28 }
  0x51   :  { %401 = vperm.xlu1 %3697, %v3947_v33   ;;  %396 = vperm.xlu0 %3696, %v3955_v35   ;;  %v4263_v33 = vld [vmem:[%s5958_s26 + $0x190] sm:$0xff]  ;;  %v4268_v35 = vld [vmem:[%s5958_s26 + $0x1e0] sm:$0xff] }
  0x52   :  { %5977 = vst [vmem:[#allocation17_spill] sm:$0xff] %v4268_v35 }
  0x55   :  { %411 = vperm.xlu1 %3697, %v3968_v38   ;;  %406 = vperm.xlu0 %3696, %v3982_v42   ;;  %v4275_v38 = vld [vmem:[%s5958_s26 + $0x198] sm:$0xff]  ;;  %v4280_v42 = vld [vmem:[%s5958_s26 + $0x1e8] sm:$0xff] }
  0x56   :  { %5978 = vst [vmem:[#allocation18_spill] sm:$0xff] %v4280_v42 }
  0x59   :  { %421 = vperm.xlu1 %3697, %v3990_v44   ;;  %416 = vperm.xlu0 %3696, %v4001_v47   ;;  %v4287_v44 = vld [vmem:[%s5958_s26 + $0x1a0] sm:$0xff]  ;;  %v4292_v47 = vld [vmem:[%s5958_s26 + $0x1f0] sm:$0xff] }
  0x5a   :  { %5979 = vst [vmem:[#allocation19_spill] sm:$0xff] %v4292_v47 }
  0x5d   :  { %431 = vperm.xlu1 %3697, %v4025_v53   ;;  %426 = vperm.xlu0 %3696, %v4033_v55   ;;  %v4299_v53 = vld [vmem:[%s5958_s26 + $0x1a8] sm:$0xff]  ;;  %v4304_v55 = vld [vmem:[%s5958_s26 + $0x1f8] sm:$0xff] }
  0x5e   :  { %5980 = vst [vmem:[#allocation20_spill] sm:$0xff] %v4304_v55 }
  0x61   :  { %441 = vperm.xlu1 %3697, %v4045_v58   ;;  %436 = vperm.xlu0 %3696, %v4059_v62   ;;  %v4311_v58 = vld [vmem:[%s5958_s26 + $0x1b0] sm:$0xff]  ;;  %v4316_v62 = vld [vmem:[%s5958_s26 + $0x200] sm:$0xff] }
  0x62   :  { %5981 = vst [vmem:[#allocation21_spill] sm:$0xff] %v4316_v62 }
  0x65   :  { %446 = vperm.xlu1 %3697, %v4067_v0   ;;  %496 = vperm.xlu0 %3696, %v4078_v21   ;;  %v135_v0 = vld [vmem:[%s5915_s0] sm:$0xff]  ;;  %v4326_v21 = vld [vmem:[%s5958_s26 + $0x1b8] sm:$0xff] }
  0x66   :  { %5982 = vst [vmem:[#allocation22_spill] sm:$0xff] %v4326_v21 }
  0x69   :  { %451 = vperm.xlu1 %3697, %v4092_v34   ;;  %501 = vperm.xlu0 %3696, %v4105_v43   ;;  %v4331_v34 = vld [vmem:[%s5958_s26 + $0x208] sm:$0xff] }
  0x6a   :  { %5983 = vst [vmem:[#allocation23_spill] sm:$0xff] %v4331_v34 }
  0x6d   :  { %456 = vperm.xlu1 %3697, %v4239_v20   ;;  %506 = vperm.xlu0 %3696, %v4244_v23   ;;  %v141_v23 = vld [vmem:[%s5915_s0 + $0x30] sm:$0xff] }
  0x71   :  { %461 = vperm.xlu1 %3697, %v4251_v25   ;;  %511 = vperm.xlu0 %3696, %v4256_v28  }
  0x75   :  { %466 = vperm.xlu1 %3697, %v4263_v33   ;;  %516 = vperm.xlu0 %3696, %v4268_v35  }
  0x79   :  { %471 = vperm.xlu1 %3697, %v4275_v38   ;;  %521 = vperm.xlu0 %3696, %v4280_v42   ;;  %v4341_v42 = vld [vmem:[%s5958_s26 + $0x218] sm:$0xff] }
  0x7a   :  { %5984 = vst [vmem:[#allocation24_spill] sm:$0xff] %v4341_v42 }
  0x7d   :  { %476 = vperm.xlu1 %3697, %v4287_v44   ;;  %526 = vperm.xlu0 %3696, %v4292_v47  }
  0x81   :  { %481 = vperm.xlu1 %3697, %v4299_v53   ;;  %531 = vperm.xlu0 %3696, %v4304_v55  }
  0x85   :  { %486 = vperm.xlu1 %3697, %v4311_v58   ;;  %536 = vperm.xlu0 %3696, %v4316_v62   ;;  %v136_v62 = vld [vmem:[%s5915_s0 + $0x8] sm:$0xff] }
  0x88   :  { %v227_v43 = vpop.permute.xlu1 %226  ;;  %v217_v55 = vpop.permute.xlu0 %216 }
  0x89   :  { %v609_v47 = vmul.f32 %v217_v55, %v135_v0  ;;  %491 = vperm.xlu1 %3697, %v4326_v21   ;;  %541 = vperm.xlu0 %3696, %v4331_v34   ;;  %v137_v55 = vld [vmem:[%s5915_s0 + $0x10] sm:$0xff] }
  0x8a   :  { %v611_v28 = vmul.f32 %v227_v43, %v137_v55 }
  0x8b   :  { %3206 = vmatmul.mubr.msk.f32.vlgmr.msra.gmra.mrb[0].mxu0 %vm1332_vm2, %v609_v47  ;;  %v4364_v47 = vld [vmem:[%s5958_s26 + $0x220] sm:$0xff] }
  0x8c   :  { %v232_v0 = vpop.permute.xlu1 %231  ;;  %v222_v34 = vpop.permute.xlu0 %221  ;;  %3208 = vmatprep.mubr.msk.f32.mxu0 %vm3706_vm0, %v5974_v27  ;;  %5987 = vst [vmem:[#allocation27_spill] sm:$0xff] %v4364_v47 }
  0x8d   :  { %v610_v35 = vmul.f32 %v222_v34, %v136_v62  ;;  %551 = vperm.xlu1 %3697, %v4341_v42   ;;  %546 = vperm.xlu0 %3696, %v4346_v60   ;;  %v138_v62 = vld [vmem:[%s5915_s0 + $0x18] sm:$0xff]  ;;  %v4395_v42 = vld [vmem:[%s5958_s26 + $0x248] sm:$0xff] }
  0x8e   :  { %v4377_v34 = vld [vmem:[%s5958_s26 + $0x238] sm:$0xff]  ;;  %5990 = vst [vmem:[#allocation30_spill] sm:$0xff] %v4395_v42 }
  0x8f   :  { %3209 = vmatmul.mubr.msk.f32.gmra.mrb[2].mxu0 %vm1332_vm2, %v610_v35  ;;  %5988 = vst [vmem:[#allocation28_spill] sm:$0xff] %v4377_v34  ;;  %v4382_v35 = vld [vmem:[%s5958_s26 + $0x230] sm:$0xff]  ;;  %v131_v60 = vld [vmem:[%s5958_s26 + $0x258] sm:$0xff] }
  0x90   :  { %v242_v52 = vpop.permute.xlu1 %241  ;;  %v237_v57 = vpop.permute.xlu0 %236  ;;  %3211 = vmatprep.mubr.msk.f32.mxu0 %vm3706_vm0, %v5974_v27  ;;  %5989 = vst [vmem:[#allocation29_spill] sm:$0xff] %v4382_v35 }
  0x91   :  { %561 = vperm.xlu1 %3697, %v4359_v51   ;;  %556 = vperm.xlu0 %3696, %v4364_v47   ;;  %v612_v51 = vmul.f32 %v232_v0, %v138_v62  ;;  %v139_v47 = vld [vmem:[%s5915_s0 + $0x20] sm:$0xff] }
  0x93   :  { %3212 = vmatmul.mubr.msk.f32.gmra.mrb[4].mxu0 %vm1332_vm2, %v611_v28  ;;  %v4400_v28 = vld [vmem:[%s5958_s26 + $0x240] sm:$0xff] }
  0x94   :  { %v252_v43 = vpop.permute.xlu1 %251  ;;  %v247_v55 = vpop.permute.xlu0 %246  ;;  %3214 = vmatprep.mubr.msk.f32.mxu0 %vm3706_vm0, %v5974_v27  ;;  %5991 = vst [vmem:[#allocation31_spill] sm:$0xff] %v4400_v28 }
  0x95   :  { %571 = vperm.xlu1 %3697, %v4377_v34   ;;  %566 = vperm.xlu0 %3696, %v4382_v35   ;;  %v613_v34 = vmul.f32 %v237_v57, %v139_v47  ;;  %v140_v35 = vld [vmem:[%s5915_s0 + $0x28] sm:$0xff] }
  0x97   :  { %3215 = vmatmul.mubr.msk.f32.gmra.mrb[6].mxu0 %vm1332_vm2, %v612_v51  ;;  %v4416_v51 = vld [vmem:[%s5958_s26 + $0x250] sm:$0xff] }
  0x98   :  { %v262_v0 = vpop.permute.xlu1 %261  ;;  %v257_v62 = vpop.permute.xlu0 %256  ;;  %3217 = vmatprep.mubr.msk.f32.mxu0 %vm3706_vm0, %v5974_v27  ;;  %5992 = vst [vmem:[#allocation32_spill] sm:$0xff] %v4416_v51 }
  0x99   :  { %581 = vperm.xlu1 %3697, %v4395_v42   ;;  %576 = vperm.xlu0 %3696, %v4400_v28   ;;  %v704_v42 = vld [vmem:[%s5959_s27 + $0x80] sm:$0xff]  ;;  %v614_v28 = vmul.f32 %v242_v52, %v140_v35 }
  0x9a   :  { %v783_v35 = vmul.f32 %v704_v42, %v4014_v50 }
  0x9b   :  { %3218 = vmatmul.mubr.msk.f32.gmra.mrb[8].mxu0 %vm1332_vm2, %v613_v34  ;;  %v133_v34 = vld [vmem:[%s5958_s26 + $0x268] sm:$0xff] }
  0x9c   :  { %v4419_v57 = vpop.permute.xlu1 %271  ;;  %v4421_v47 = vpop.permute.xlu0 %266  ;;  %3220 = vmatprep.mubr.msk.f32.mxu0 %vm3706_vm0, %v5974_v27 }
  0x9d   :  { %591 = vperm.xlu1 %3697, %v131_v60   ;;  %586 = vperm.xlu0 %3696, %v4416_v51   ;;  %v688_v60 = vld [vmem:[%s5959_s27] sm:$0xff]  ;;  %v615_v51 = vmul.f32 %v247_v55, %v141_v23  ;;  %v616_v55 = vmul.f32 %v252_v43, %v142_v45 }
  0x9e   :  { %v767_v23 = vmul.f32 %v688_v60, %v3807_v2  ;;  %v690_v60 = vld [vmem:[%s5959_s27 + $0x10] sm:$0xff] }
  0x9f   :  { %3221 = vmatmul.mubr.msk.f32.gmra.mrb[10].mxu0 %vm1332_vm2, %v614_v28  ;;  %v705_v28 = vld [vmem:[%s5959_s27 + $0x88] sm:$0xff] }
  0xa0   :  { %v4441_v41 = vpop.permute.xlu1 %281  ;;  %v4443_v52 = vpop.permute.xlu0 %276  ;;  %3223 = vmatprep.mubr.msk.f32.mxu0 %vm3706_vm0, %v5974_v27  ;;  %v784_v42 = vmul.f32 %v705_v28, %v4009_v49  ;;  %v144_v28 = vld [vmem:[%s5915_s0 + $0x48] sm:$0xff] }
  0xa1   :  { %601 = vperm.xlu1 %3697, %v133_v34   ;;  %596 = vperm.xlu0 %3696, %v4438_v29   ;;  %v689_v34 = vld [vmem:[%s5959_s27 + $0x8] sm:$0xff]  ;;  %v143_v29 = vld [vmem:[%s5915_s0 + $0x40] sm:$0xff] }
  0xa2   :  { %v617_v43 = vmul.f32 %v257_v62, %v143_v29  ;;  %v769_v29 = vmul.f32 %v690_v60, %v3802_v1  ;;  %v146_v60 = vld [vmem:[%s5915_s0 + $0x58] sm:$0xff] }
  0xa3   :  { %3224 = vmatmul.mubr.msk.f32.gmra.mrb[12].mxu0 %vm1332_vm2, %v615_v51  ;;  %v706_v51 = vld [vmem:[%s5959_s27 + $0x90] sm:$0xff] }
  0xa4   :  { %v4462_v21 = vpop.permute.xlu1 %291  ;;  %v4464_v50 = vpop.permute.xlu0 %286  ;;  %3226 = vmatprep.mubr.msk.f32.mxu0 %vm3706_vm0, %v5974_v27  ;;  %v785_v45 = vmul.f32 %v706_v51, %v4118_v54 }
  0xa5   :  { %606 = vperm.xlu0 %3696, %v134_v36   ;;  %934 = vperm.xlu1 %3697, %v783_v35   ;;  %v768_v36 = vmul.f32 %v689_v34, %v3819_v4  ;;  %v707_v35 = vld [vmem:[%s5959_s27 + $0x98] sm:$0xff]  ;;  %v145_v34 = vld [vmem:[%s5915_s0 + $0x50] sm:$0xff] }
  0xa6   :  { %v786_v62 = vmul.f32 %v707_v35, %v4113_v48 }
  0xa7   :  { %3227 = vmatmul.mubr.msk.f32.gmra.mrb[14].mxu0 %vm1332_vm2, %v616_v55  ;;  %v708_v55 = vld [vmem:[%s5959_s27 + $0xa0] sm:$0xff] }
  0xa8   :  { %v4480_v2 = vpop.permute.xlu1 %301  ;;  %v4482_v49 = vpop.permute.xlu0 %296  ;;  %3229 = vmatprep.mubr.msk.f32.mxu0 %vm3706_vm0, %v5974_v27  ;;  %v787_v51 = vmul.f32 %v708_v55, %v4133_v63 }
  0xa9   :  { %939 = vperm.xlu0 %3696, %v784_v42   ;;  %854 = vperm.xlu1 %3697, %v767_v23   ;;  %v618_v23 = vmul.f32 %v262_v0, %v144_v28  ;;  %v691_v42 = vld [vmem:[%s5959_s27 + $0x18] sm:$0xff]  ;;  %v620_v28 = vmul.f32 %v4419_v57, %v146_v60  ;;  %v712_v60 = vld [vmem:[%s5959_s27 + $0xc0] sm:$0xff] }
  0xaa   :  { %v770_v0 = vmul.f32 %v691_v42, %v3814_v3 }
  0xab   :  { %3230 = vmatmul.mubr.msk.f32.gmra.mrb[16].mxu0 %vm1332_vm2, %v617_v43  ;;  %v709_v43 = vld [vmem:[%s5959_s27 + $0xa8] sm:$0xff] }
  0xac   :  { %v4498_v4 = vpop.permute.xlu1 %311  ;;  %v4500_v54 = vpop.permute.xlu0 %306  ;;  %3232 = vmatprep.mubr.msk.f32.mxu0 %vm3706_vm0, %v5974_v27  ;;  %v788_v35 = vmul.f32 %v709_v43, %v4128_v59  ;;  %v695_v43 = vld [vmem:[%s5959_s27 + $0x38] sm:$0xff] }
  0xad   :  { %859 = vperm.xlu0 %3696, %v768_v36   ;;  %944 = vperm.xlu1 %3697, %v785_v45   ;;  %v619_v36 = vmul.f32 %v4421_v47, %v145_v34  ;;  %v692_v45 = vld [vmem:[%s5959_s27 + $0x20] sm:$0xff]  ;;  %v694_v34 = vld [vmem:[%s5959_s27 + $0x30] sm:$0xff] }
  0xae   :  { %v771_v47 = vmul.f32 %v692_v45, %v3837_v8 }
  0xaf   :  { %3233 = vmatmul.mubr.msk.f32.gmra.mrb[18].mxu0 %vm1332_vm2, %v618_v23  ;;  %v147_v23 = vld [vmem:[%s5915_s0 + $0x60] sm:$0xff] }
  0xb0   :  { %v4516_v1 = vpop.permute.xlu1 %321  ;;  %v4518_v48 = vpop.permute.xlu0 %316  ;;  %3235 = vmatprep.mubr.msk.f32.mxu0 %vm3706_vm0, %v5974_v27  ;;  %v621_v55 = vmul.f32 %v4443_v52, %v147_v23  ;;  %v773_v52 = vmul.f32 %v694_v34, %v3855_v12  ;;  %v150_v23 = vld [vmem:[%s5915_s0 + $0x78] sm:$0xff]  ;;  %v714_v34 = vld [vmem:[%s5959_s27 + $0xd0] sm:$0xff] }
  0xb1   :  { %949 = vperm.xlu0 %3696, %v786_v62   ;;  %864 = vperm.xlu1 %3697, %v769_v29   ;;  %v693_v29 = vld [vmem:[%s5959_s27 + $0x28] sm:$0xff]  ;;  %v710_v62 = vld [vmem:[%s5959_s27 + $0xb0] sm:$0xff] }
  0xb2   :  { %v772_v57 = vmul.f32 %v693_v29, %v3832_v7  ;;  %v789_v42 = vmul.f32 %v710_v62, %v4151_v46  ;;  %v696_v29 = vld [vmem:[%s5959_s27 + $0x40] sm:$0xff]  ;;  %v713_v62 = vld [vmem:[%s5959_s27 + $0xc8] sm:$0xff] }
  0xb3   :  { %3236 = vmatmul.mubr.msk.f32.gmra.mrb[20].mxu0 %vm1332_vm2, %v619_v36 }
  0xb4   :  { %v4535_v3 = vpop.permute.xlu1 %331  ;;  %v4537_v63 = vpop.permute.xlu0 %326  ;;  %3238 = vmatprep.mubr.msk.f32.mxu0 %vm3706_vm0, %v5974_v27 }
  0xb5   :  { %869 = vperm.xlu0 %3696, %v770_v0   ;;  %954 = vperm.xlu1 %3697, %v787_v51   ;;  %v711_v0 = vld [vmem:[%s5959_s27 + $0xb8] sm:$0xff]  ;;  %v148_v51 = vld [vmem:[%s5915_s0 + $0x68] sm:$0xff] }
  0xb6   :  { %v790_v36 = vmul.f32 %v711_v0, %v4146_v37  ;;  %v622_v45 = vmul.f32 %v4441_v41, %v148_v51  ;;  %v774_v41 = vmul.f32 %v695_v43, %v3850_v11  ;;  %v151_v0 = vld [vmem:[%s5915_s0 + $0x80] sm:$0xff]  ;;  %v793_v51 = vmul.f32 %v714_v34, %v4186_v39  ;;  %v152_v43 = vld [vmem:[%s5915_s0 + $0x88] sm:$0xff] }
  0xb7   :  { %3239 = vmatmul.mubr.msk.f32.gmra.mrb[22].mxu0 %vm1332_vm2, %v620_v28  ;;  %v701_v34 = vld [vmem:[%s5959_s27 + $0x68] sm:$0xff] }
  0xb8   :  { %v4554_v8 = vpop.permute.xlu1 %341  ;;  %v4556_v59 = vpop.permute.xlu0 %336  ;;  %3241 = vmatprep.mubr.msk.f32.mxu0 %vm3706_vm0, %v5974_v27 }
  0xb9   :  { %959 = vperm.xlu0 %3696, %v788_v35   ;;  %874 = vperm.xlu1 %3697, %v771_v47   ;;  %v149_v47 = vld [vmem:[%s5915_s0 + $0x70] sm:$0xff]  ;;  %v791_v35 = vmul.f32 %v712_v60, %v4169_v10 }
  0xba   :  { %v623_v28 = vmul.f32 %v4464_v50, %v149_v47  ;;  %v775_v50 = vmul.f32 %v696_v29, %v3869_v15  ;;  %v626_v47 = vmul.f32 %v4480_v2, %v152_v43  ;;  %v156_v43 = vld [vmem:[%s5915_s0 + $0xa8] sm:$0xff] }
  0xbb   :  { %3242 = vmatmul.mubr.msk.f32.gmra.mrb[24].mxu0 %vm1332_vm2, %v621_v55  ;;  %v697_v55 = vld [vmem:[%s5959_s27 + $0x48] sm:$0xff] }
  0xbc   :  { %v4573_v7 = vpop.permute.xlu1 %351  ;;  %v4575_v46 = vpop.permute.xlu0 %346  ;;  %3244 = vmatprep.mubr.msk.f32.mxu0 %vm3706_vm0, %v5974_v27 }
  0xbd   :  { %879 = vperm.xlu0 %3696, %v772_v57   ;;  %964 = vperm.xlu1 %3697, %v789_v42   ;;  %v792_v57 = vmul.f32 %v713_v62, %v4164_v61  ;;  %v624_v42 = vmul.f32 %v4462_v21, %v150_v23  ;;  %v776_v21 = vmul.f32 %v697_v55, %v3864_v14  ;;  %v700_v23 = vld [vmem:[%s5959_s27 + $0x60] sm:$0xff] }
  0xbf   :  { %3245 = vmatmul.mubr.msk.f32.gmra.mrb[26].mxu0 %vm1332_vm2, %v622_v45  ;;  %v715_v45 = vld [vmem:[%s5959_s27 + $0xd8] sm:$0xff] }
  0xc0   :  { %v4592_v12 = vpop.permute.xlu1 %361  ;;  %v4594_v37 = vpop.permute.xlu0 %356  ;;  %3247 = vmatprep.mubr.msk.f32.mxu0 %vm3706_vm0, %v5974_v27  ;;  %v794_v60 = vmul.f32 %v715_v45, %v4181_v6  ;;  %v719_v45 = vld [vmem:[%s5959_s27 + $0xf8] sm:$0xff] }
  0xc1   :  { %969 = vperm.xlu0 %3696, %v790_v36   ;;  %884 = vperm.xlu1 %3697, %v773_v52   ;;  %v625_v52 = vmul.f32 %v4482_v49, %v151_v0  ;;  %v698_v36 = vld [vmem:[%s5959_s27 + $0x50] sm:$0xff] }
  0xc2   :  { %v777_v49 = vmul.f32 %v698_v36, %v3881_v17  ;;  %v718_v0 = vld [vmem:[%s5959_s27 + $0xf0] sm:$0xff] }
  0xc3   :  { %3248 = vmatmul.mubr.msk.f32.gmra.mrb[28].mxu0 %vm1332_vm2, %v623_v28  ;;  %v153_v28 = vld [vmem:[%s5915_s0 + $0x90] sm:$0xff] }
  0xc4   :  { %v4611_v11 = vpop.permute.xlu1 %371  ;;  %v4613_v10 = vpop.permute.xlu0 %366  ;;  %3250 = vmatprep.mubr.msk.f32.mxu0 %vm3706_vm0, %v5974_v27  ;;  %v627_v62 = vmul.f32 %v4500_v54, %v153_v28  ;;  %v779_v54 = vmul.f32 %v700_v23, %v3893_v19  ;;  %v702_v36 = vld [vmem:[%s5959_s27 + $0x70] sm:$0xff] }
  0xc5   :  { %889 = vperm.xlu0 %3696, %v774_v41   ;;  %974 = vperm.xlu1 %3697, %v791_v35   ;;  %v699_v41 = vld [vmem:[%s5959_s27 + $0x58] sm:$0xff]  ;;  %v716_v35 = vld [vmem:[%s5959_s27 + $0xe0] sm:$0xff] }
  0xc6   :  { %v778_v2 = vmul.f32 %v699_v41, %v3876_v16  ;;  %v795_v29 = vmul.f32 %v716_v35, %v4202_v9  ;;  %v157_v41 = vld [vmem:[%s5915_s0 + $0xb0] sm:$0xff] }
  0xc7   :  { %3251 = vmatmul.mubr.msk.f32.gmra.mrb[30].mxu0 %vm1332_vm2, %v624_v42 }
  0xc8   :  { %v4630_v15 = vpop.permute.xlu1 %381  ;;  %v4632_v61 = vpop.permute.xlu0 %376  ;;  %3253 = vmatprep.mubr.msk.f32.mxu0 %vm3706_vm0, %v5974_v27 }
  0xc9   :  { %979 = vperm.xlu0 %3696, %v792_v57   ;;  %894 = vperm.xlu1 %3697, %v775_v50   ;;  %v717_v50 = vld [vmem:[%s5959_s27 + $0xe8] sm:$0xff]  ;;  %v154_v57 = vld [vmem:[%s5915_s0 + $0x98] sm:$0xff] }
  0xca   :  { %v796_v42 = vmul.f32 %v717_v50, %v4197_v24  ;;  %v628_v55 = vmul.f32 %v4498_v4, %v154_v57  ;;  %v780_v4 = vmul.f32 %v701_v34, %v3886_v18  ;;  %v738_v57 = vld [vmem:[%s5959_s27 + $0x190] sm:$0xff] }
  0xcb   :  { %3254 = vmatmul.mubr.msk.f32.gmra.mrb[32].mxu0 %vm1332_vm2, %v625_v52 }
  0xcc   :  { %v4649_v14 = vpop.permute.xlu1 %391  ;;  %v4651_v39 = vpop.permute.xlu0 %386  ;;  %3256 = vmatprep.mubr.msk.f32.mxu0 %vm3706_vm0, %v5974_v27 }
  0xcd   :  { %899 = vperm.xlu0 %3696, %v776_v21   ;;  %984 = vperm.xlu1 %3697, %v793_v51   ;;  %v155_v21 = vld [vmem:[%s5915_s0 + $0xa0] sm:$0xff]  ;;  %v797_v51 = vmul.f32 %v718_v0, %v4214_v56  ;;  %v739_v0 = vld [vmem:[%s5959_s27 + $0x198] sm:$0xff] }
  0xce   :  { %v629_v52 = vmul.f32 %v4518_v48, %v155_v21  ;;  %v781_v48 = vmul.f32 %v702_v36, %v3936_v30  ;;  %v160_v21 = vld [vmem:[%s5915_s0 + $0xc8] sm:$0xff]  ;;  %v740_v36 = vld [vmem:[%s5959_s27 + $0x1a0] sm:$0xff] }
  0xcf   :  { %3257 = vmatmul.mubr.msk.f32.gmra.mrb[34].mxu0 %vm1332_vm2, %v626_v47  ;;  %v736_v47 = vld [vmem:[%s5959_s27 + $0x180] sm:$0xff] }
  0xd0   :  { %v4668_v17 = vpop.permute.xlu1 %401  ;;  %v4670_v6 = vpop.permute.xlu0 %396  ;;  %3259 = vmatprep.mubr.msk.f32.mxu0 %vm3706_vm0, %v5974_v27  ;;  %v815_v30 = vmul.f32 %v736_v47, %v4239_v20  ;;  %v162_v47 = vld [vmem:[%s5915_s0 + $0xd8] sm:$0xff] }
  0xd1   :  { %989 = vperm.xlu0 %3696, %v794_v60   ;;  %904 = vperm.xlu1 %3697, %v777_v49   ;;  %v798_v49 = vmul.f32 %v719_v45, %v4209_v5  ;;  %v630_v60 = vmul.f32 %v4516_v1, %v156_v43  ;;  %v631_v5 = vmul.f32 %v4537_v63, %v157_v41  ;;  %v737_v1 = vld [vmem:[%s5959_s27 + $0x188] sm:$0xff]  ;;  %v161_v45 = vld [vmem:[%s5915_s0 + $0xd0] sm:$0xff]  ;;  %v194_v43 = vld [vmem:[%s5915_s0 + $0x1d8] sm:$0xff] }
  0xd2   :  { %v816_v63 = vmul.f32 %v737_v1, %v4251_v25  ;;  %v195_v41 = vld [vmem:[%s5915_s0 + $0x1e0] sm:$0xff]  ;;  %v742_v1 = vld [vmem:[%s5959_s27 + $0x1b0] sm:$0xff] }
  0xd3   :  { %3260 = vmatmul.mubr.msk.f32.gmra.mrb[36].mxu0 %vm1332_vm2, %v627_v62 }
  0xd4   :  { %v4687_v16 = vpop.permute.xlu1 %411  ;;  %v4689_v9 = vpop.permute.xlu0 %406  ;;  %3262 = vmatprep.mubr.msk.f32.mxu0 %vm3706_vm0, %v5974_v27 }
  0xd5   :  { %909 = vperm.xlu0 %3696, %v778_v2   ;;  %994 = vperm.xlu1 %3697, %v795_v29   ;;  %v158_v2 = vld [vmem:[%s5915_s0 + $0xb8] sm:$0xff]  ;;  %v191_v29 = vld [vmem:[%s5915_s0 + $0x1c0] sm:$0xff] }
  0xd6   :  { %v632_v23 = vmul.f32 %v4535_v3, %v158_v2  ;;  %v817_v3 = vmul.f32 %v738_v57, %v4263_v33  ;;  %v163_v2 = vld [vmem:[%s5915_s0 + $0xe0] sm:$0xff]  ;;  %v197_v57 = vld [vmem:[%s5915_s0 + $0x1f0] sm:$0xff] }
  0xd7   :  { %3263 = vmatmul.mubr.msk.f32.gmra.mrb[38].mxu0 %vm1332_vm2, %v628_v55 }
  0xd8   :  { %v4706_v19 = vpop.permute.xlu1 %421  ;;  %v4708_v24 = vpop.permute.xlu0 %416  ;;  %3265 = vmatprep.mubr.msk.f32.mxu0 %vm3706_vm0, %v5974_v27 }
  0xd9   :  { %999 = vperm.xlu0 %3696, %v796_v42   ;;  %914 = vperm.xlu1 %3697, %v779_v54   ;;  %v159_v54 = vld [vmem:[%s5915_s0 + $0xc0] sm:$0xff]  ;;  %v192_v42 = vld [vmem:[%s5915_s0 + $0x1c8] sm:$0xff] }
  0xda   :  { %v633_v55 = vmul.f32 %v4556_v59, %v159_v54 }
  0xdb   :  { %3266 = vmatmul.mubr.msk.f32.gmra.mrb[40].mxu0 %vm1332_vm2, %v629_v52 }
  0xdc   :  { %v4725_v18 = vpop.permute.xlu1 %431  ;;  %v4727_v56 = vpop.permute.xlu0 %426  ;;  %3268 = vmatprep.mubr.msk.f32.mxu0 %vm3706_vm0, %v5974_v27 }
  0xdd   :  { %919 = vperm.xlu0 %3696, %v780_v4   ;;  %1004 = vperm.xlu1 %3697, %v797_v51   ;;  %v193_v4 = vld [vmem:[%s5915_s0 + $0x1d0] sm:$0xff]  ;;  %v634_v51 = vmul.f32 %v4554_v8, %v160_v21  ;;  %v819_v8 = vmul.f32 %v740_v36, %v4287_v44 }
  0xdf   :  { %3269 = vmatmul.mubr.msk.f32.gmra.mrb[42].mxu0 %vm1332_vm2, %v630_v60  ;;  %v741_v60 = vld [vmem:[%s5959_s27 + $0x1a8] sm:$0xff] }
  0xe0   :  { %v4741_v35 = vpop.permute.xlu1 %441  ;;  %v4743_v28 = vpop.permute.xlu0 %436  ;;  %3271 = vmatprep.mubr.msk.f32.mxu0 %vm3706_vm0, %v5974_v27 }
  0xe1   :  { %1009 = vperm.xlu0 %3696, %v798_v49   ;;  %924 = vperm.xlu1 %3697, %v781_v48   ;;  %v635_v48 = vmul.f32 %v4575_v46, %v161_v45 }
  0xe3   :  { %3272 = vmatmul.mubr.msk.f32.gmra.mrb[44].mxu0 %vm1332_vm2, %v631_v5 }
  0xe4   :  { %v4759_v62 = vpop.permute.xlu1 %446  ;;  %v497_v20 = vpop.permute.xlu0 %496  ;;  %3274 = vmatprep.mubr.msk.f32.mxu0 %vm3706_vm0, %v5974_v27 }
  0xe5   :  { %v665_v50 = vmul.f32 %v497_v20, %v191_v29  ;;  %929 = vperm.xlu0 %3696, %v3857_v13   ;;  %1094 = vperm.xlu1 %3697, %v815_v30   ;;  %v636_v30 = vmul.f32 %v4573_v7, %v162_v47  ;;  %v196_v29 = vld [vmem:[%s5915_s0 + $0x1e8] sm:$0xff]  ;;  %v821_v7 = vmul.f32 %v742_v1, %v4311_v58  ;;  %v747_v1 = vld [vmem:[%s5959_s27 + $0x1d8] sm:$0xff] }
  0xe6   :  { %v637_v20 = vmul.f32 %v4594_v37, %v163_v2  ;;  %v5999_v47 = vld [vmem:[#allocation15_spill] sm:$0xff] }
  0xe7   :  { %3275 = vmatmul.mubr.msk.f32.gmra.mrb[46].mxu0 %vm1332_vm2, %v632_v23  ;;  %3374 = vmatmul.mubr.msk.f32.vlgmr.msra.gmra.mrb[0].mxu1 %vm1332_vm2, %v665_v50  ;;  %v743_v23 = vld [vmem:[%s5959_s27 + $0x1b8] sm:$0xff]  ;;  %v164_v50 = vld [vmem:[%s5915_s0 + $0xe8] sm:$0xff] }
  0xe8   :  { %v4777_v25 = vpop.permute.xlu1 %451  ;;  %v502_v13 = vpop.permute.xlu0 %501  ;;  %3277 = vmatprep.mubr.msk.f32.mxu0 %vm3706_vm0, %v5974_v27  ;;  %3376 = vmatprep.mubr.msk.f32.mxu1 %vm3706_vm0, %v5974_v27  ;;  %v168_v2 = vld [vmem:[%s5915_s0 + $0x108] sm:$0xff] }
  0xe9   :  { %v666_v34 = vmul.f32 %v502_v13, %v192_v42  ;;  %1099 = vperm.xlu0 %3696, %v816_v63   ;;  %1014 = vperm.xlu1 %3697, %v3920_v26   ;;  %v818_v26 = vmul.f32 %v739_v0, %v4275_v38  ;;  %v638_v42 = vmul.f32 %v4592_v12, %v164_v50  ;;  %v6003_v50 = vld [vmem:[#allocation5_spill] sm:$0xff] }
  0xeb   :  { %3278 = vmatmul.mubr.msk.f32.gmra.mrb[48].mxu0 %vm1332_vm2, %v633_v55  ;;  %3377 = vmatmul.mubr.msk.f32.gmra.mrb[2].mxu1 %vm1332_vm2, %v666_v34  ;;  %v165_v55 = vld [vmem:[%s5915_s0 + $0xf0] sm:$0xff]  ;;  %v198_v34 = vld [vmem:[%s5915_s0 + $0x1f8] sm:$0xff] }
  0xec   :  { %v4797_v33 = vpop.permute.xlu1 %456  ;;  %v507_v59 = vpop.permute.xlu0 %506  ;;  %3280 = vmatprep.mubr.msk.f32.mxu0 %vm3706_vm0, %v5974_v27  ;;  %3379 = vmatprep.mubr.msk.f32.mxu1 %vm3706_vm0, %v5974_v27  ;;  %v639_v12 = vmul.f32 %v4613_v10, %v165_v55 }
  0xed   :  { %v667_v52 = vmul.f32 %v507_v59, %v193_v4  ;;  %1019 = vperm.xlu0 %3696, %v3904_v22   ;;  %1104 = vperm.xlu1 %3697, %v817_v3   ;;  %v5995_v3 = vld [vmem:[#allocation2_spill] sm:$0xff]  ;;  %v5996_v59 = vld [vmem:[#allocation4_spill] sm:$0xff] }
  0xef   :  { %3281 = vmatmul.mubr.msk.f32.gmra.mrb[50].mxu0 %vm1332_vm2, %v634_v51  ;;  %3380 = vmatmul.mubr.msk.f32.gmra.mrb[4].mxu1 %vm1332_vm2, %v667_v52  ;;  %v199_v51 = vld [vmem:[%s5915_s0 + $0x200] sm:$0xff] }
  0xf0   :  { %v4817_v38 = vpop.permute.xlu1 %461  ;;  %v512_v22 = vpop.permute.xlu0 %511  ;;  %3283 = vmatprep.mubr.msk.f32.mxu0 %vm3706_vm0, %v5974_v27  ;;  %3382 = vmatprep.mubr.msk.f32.mxu1 %vm3706_vm0, %v5974_v27 }
  0xf1   :  { %v668_v49 = vmul.f32 %v512_v22, %v194_v43  ;;  %1109 = vperm.xlu0 %3696, %v818_v26   ;;  %1024 = vperm.xlu1 %3697, %v3942_v32   ;;  %v820_v32 = vmul.f32 %v741_v60, %v4299_v53  ;;  %v166_v26 = vld [vmem:[%s5915_s0 + $0xf8] sm:$0xff]  ;;  %v5997_v43 = vld [vmem:[#allocation3_spill] sm:$0xff]  ;;  %v5998_v22 = vld [vmem:[#allocation12_spill] sm:$0xff] }
  0xf2   :  { %v640_v10 = vmul.f32 %v4611_v11, %v166_v26  ;;  %v6006_v26 = vld [vmem:[#allocation18_spill] sm:$0xff] }
  0xf3   :  { %3284 = vmatmul.mubr.msk.f32.gmra.mrb[52].mxu0 %vm1332_vm2, %v635_v48  ;;  %3383 = vmatmul.mubr.msk.f32.gmra.mrb[6].mxu1 %vm1332_vm2, %v668_v49  ;;  %v167_v48 = vld [vmem:[%s5915_s0 + $0x100] sm:$0xff]  ;;  %v200_v49 = vld [vmem:[%s5915_s0 + $0x208] sm:$0xff] }
  0xf4   :  { %v4837_v44 = vpop.permute.xlu1 %466  ;;  %v517_v46 = vpop.permute.xlu0 %516  ;;  %3286 = vmatprep.mubr.msk.f32.mxu0 %vm3706_vm0, %v5974_v27  ;;  %3385 = vmatprep.mubr.msk.f32.mxu1 %vm3706_vm0, %v5974_v27 }
  0xf5   :  { %v669_v5 = vmul.f32 %v517_v46, %v195_v41  ;;  %1029 = vperm.xlu0 %3696, %v3939_v31   ;;  %1114 = vperm.xlu1 %3697, %v819_v8   ;;  %v746_v8 = vld [vmem:[%s5959_s27 + $0x1d0] sm:$0xff]  ;;  %v641_v46 = vmul.f32 %v4632_v61, %v167_v48 }
  0xf6   :  { %v825_v41 = vmul.f32 %v746_v8, %v5999_v47  ;;  %v204_v8 = vld [vmem:[%s5915_s0 + $0x228] sm:$0xff] }
  0xf7   :  { %3287 = vmatmul.mubr.msk.f32.gmra.mrb[54].mxu0 %vm1332_vm2, %v636_v30  ;;  %3386 = vmatmul.mubr.msk.f32.gmra.mrb[8].mxu1 %vm1332_vm2, %v669_v5  ;;  %v6000_v30 = vld [vmem:[#allocation14_spill] sm:$0xff] }
  0xf8   :  { %v4857_v53 = vpop.permute.xlu1 %471  ;;  %v522_v31 = vpop.permute.xlu0 %521  ;;  %3289 = vmatprep.mubr.msk.f32.mxu0 %vm3706_vm0, %v5974_v27  ;;  %3388 = vmatprep.mubr.msk.f32.mxu1 %vm3706_vm0, %v5974_v27  ;;  %v6001_v5 = vld [vmem:[#allocation6_spill] sm:$0xff] }
  0xf9   :  { %v670_v63 = vmul.f32 %v522_v31, %v196_v29  ;;  %1119 = vperm.xlu0 %3696, %v820_v32   ;;  %1034 = vperm.xlu1 %3697, %v3974_v40   ;;  %v5994_v40 = vld [vmem:[#allocation22_spill] sm:$0xff]  ;;  %v201_v29 = vld [vmem:[%s5915_s0 + $0x210] sm:$0xff] }
  0xfa   :  { %v822_v54 = vmul.f32 %v743_v23, %v5994_v40  ;;  %v202_v40 = vld [vmem:[%s5915_s0 + $0x218] sm:$0xff] }
  0xfb   :  { %3290 = vmatmul.mubr.msk.f32.gmra.mrb[56].mxu0 %vm1332_vm2, %v637_v20  ;;  %3389 = vmatmul.mubr.msk.f32.gmra.mrb[10].mxu1 %vm1332_vm2, %v670_v63  ;;  %v642_v63 = vmul.f32 %v4630_v15, %v168_v2  ;;  %v6010_v2 = vld [vmem:[#allocation20_spill] sm:$0xff] }
  0xfc   :  { %v4877_v58 = vpop.permute.xlu1 %476  ;;  %v527_v37 = vpop.permute.xlu0 %526  ;;  %3292 = vmatprep.mubr.msk.f32.mxu0 %vm3706_vm0, %v5974_v27  ;;  %3391 = vmatprep.mubr.msk.f32.mxu1 %vm3706_vm0, %v5974_v27 }
  0xfd   :  { %v671_v13 = vmul.f32 %v527_v37, %v197_v57  ;;  %1039 = vperm.xlu0 %3696, %v5995_v3   ;;  %1124 = vperm.xlu1 %3697, %v821_v7   ;;  %v6002_v7 = vld [vmem:[#allocation16_spill] sm:$0xff]  ;;  %v748_v57 = vld [vmem:[%s5959_s27 + $0x1e0] sm:$0xff] }
  0xfe   :  { %v826_v20 = vmul.f32 %v747_v1, %v6002_v7  ;;  %v169_v37 = vld [vmem:[%s5915_s0 + $0x110] sm:$0xff]  ;;  %v6011_v7 = vld [vmem:[#allocation9_spill] sm:$0xff] }
  0xff   :  { %3293 = vmatmul.mubr.msk.f32.gmra.mrb[58].mxu0 %vm1332_vm2, %v638_v42  ;;  %3392 = vmatmul.mubr.msk.f32.gmra.mrb[12].mxu1 %vm1332_vm2, %v671_v13  ;;  %v6004_v42 = vld [vmem:[#allocation17_spill] sm:$0xff]  ;;  %v643_v3 = vmul.f32 %v4651_v39, %v169_v37 }
 0x100   :  { %v4894_v0 = vpop.permute.xlu1 %481  ;;  %v532_v21 = vpop.permute.xlu0 %531  ;;  %3295 = vmatprep.mubr.msk.f32.mxu0 %vm3706_vm0, %v5974_v27  ;;  %3394 = vmatprep.mubr.msk.f32.mxu1 %vm3706_vm0, %v5974_v27  ;;  %v827_v13 = vmul.f32 %v748_v57, %v6004_v42  ;;  %v6012_v57 = vld [vmem:[#allocation21_spill] sm:$0xff]  ;;  %v6013_v42 = vld [vmem:[#allocation11_spill] sm:$0xff] }
 0x101   :  { %v672_v4 = vmul.f32 %v532_v21, %v198_v34  ;;  %1129 = vperm.xlu0 %3696, %v822_v54   ;;  %1044 = vperm.xlu1 %3697, %v5996_v59   ;;  %v6005_v34 = vld [vmem:[#allocation8_spill] sm:$0xff]  ;;  %v749_v21 = vld [vmem:[%s5959_s27 + $0x1e8] sm:$0xff] }
 0x103   :  { %3296 = vmatmul.mubr.msk.f32.gmra.mrb[60].mxu0 %vm1332_vm2, %v639_v12  ;;  %3395 = vmatmul.mubr.msk.f32.gmra.mrb[14].mxu1 %vm1332_vm2, %v672_v4  ;;  %v170_v12 = vld [vmem:[%s5915_s0 + $0x118] sm:$0xff]  ;;  %v203_v4 = vld [vmem:[%s5915_s0 + $0x220] sm:$0xff] }
 0x104   :  { %v4910_v52 = vpop.permute.xlu1 %486  ;;  %v537_v36 = vpop.permute.xlu0 %536  ;;  %3298 = vmatprep.mubr.msk.f32.mxu0 %vm3706_vm0, %v5974_v27  ;;  %3397 = vmatprep.mubr.msk.f32.mxu1 %vm3706_vm0, %v5974_v27 }
 0x105   :  { %v673_v45 = vmul.f32 %v537_v36, %v199_v51  ;;  %1049 = vperm.xlu0 %3696, %v5997_v43   ;;  %1134 = vperm.xlu1 %3697, %v5998_v22   ;;  %v828_v51 = vmul.f32 %v749_v21, %v6006_v26  ;;  %v644_v36 = vmul.f32 %v4649_v14, %v170_v12  ;;  %v750_v43 = vld [vmem:[%s5959_s27 + $0x1f0] sm:$0xff]  ;;  %v171_v22 = vld [vmem:[%s5915_s0 + $0x120] sm:$0xff] }
 0x106   :  { %v645_v47 = vmul.f32 %v4670_v6, %v171_v22 }
 0x107   :  { %3299 = vmatmul.mubr.msk.f32.gmra.mrb[62].mxu0 %vm1332_vm2, %v640_v10  ;;  %3398 = vmatmul.mubr.msk.f32.gmra.mrb[16].mxu1 %vm1332_vm2, %v673_v45  ;;  %v6007_v45 = vld [vmem:[#allocation7_spill] sm:$0xff] }
 0x108   :  { %v4930_v11 = vpop.permute.xlu1 %491  ;;  %v542_v60 = vpop.permute.xlu0 %541  ;;  %3301 = vmatprep.mubr.msk.f32.mxu0 %vm3706_vm0, %v5974_v27  ;;  %3400 = vmatprep.mubr.msk.f32.mxu1 %vm3706_vm0, %v5974_v27 }
 0x109   :  { %v674_v32 = vmul.f32 %v542_v60, %v200_v49  ;;  %1139 = vperm.xlu0 %3696, %v6000_v30   ;;  %1054 = vperm.xlu1 %3697, %v6001_v5   ;;  %v6008_v49 = vld [vmem:[#allocation19_spill] sm:$0xff]  ;;  %v205_v5 = vld [vmem:[%s5915_s0 + $0x230] sm:$0xff] }
 0x10a   :  { %v829_v60 = vmul.f32 %v750_v43, %v6008_v49  ;;  %v172_v30 = vld [vmem:[%s5915_s0 + $0x128] sm:$0xff] }
 0x10b   :  { %3302 = vmatmul.mubr.msk.f32.gmra.mrb[64].mxu0 %vm1332_vm2, %v641_v46  ;;  %3401 = vmatmul.mubr.msk.f32.gmra.mrb[18].mxu1 %vm1332_vm2, %v674_v32  ;;  %v6009_v46 = vld [vmem:[#allocation10_spill] sm:$0xff]  ;;  %v751_v32 = vld [vmem:[%s5959_s27 + $0x1f8] sm:$0xff]  ;;  %v208_v43 = vld [vmem:[%s5915_s0 + $0x248] sm:$0xff] }
 0x10c   :  { %v552_v61 = vpop.permute.xlu1 %551  ;;  %v547_v31 = vpop.permute.xlu0 %546  ;;  %3304 = vmatprep.mubr.msk.f32.mxu0 %vm3706_vm0, %v5974_v27  ;;  %3403 = vmatprep.mubr.msk.f32.mxu1 %vm3706_vm0, %v5974_v27  ;;  %v757_v49 = vld [vmem:[%s5959_s27 + $0x228] sm:$0xff] }
 0x10d   :  { %v675_v23 = vmul.f32 %v547_v31, %v201_v29  ;;  %1059 = vperm.xlu0 %3696, %v6003_v50   ;;  %1144 = vperm.xlu1 %3697, %v825_v41   ;;  %v676_v55 = vmul.f32 %v552_v61, %v202_v40  ;;  %v830_v29 = vmul.f32 %v751_v32, %v6010_v2  ;;  %v753_v40 = vld [vmem:[%s5959_s27 + $0x208] sm:$0xff]  ;;  %v758_v32 = vld [vmem:[%s5959_s27 + $0x230] sm:$0xff] }
 0x10e   :  { %v646_v61 = vmul.f32 %v4668_v17, %v172_v30  ;;  %v176_v30 = vld [vmem:[%s5915_s0 + $0x148] sm:$0xff] }
 0x10f   :  { %3305 = vmatmul.mubr.msk.f32.gmra.mrb[66].mxu0 %vm1332_vm2, %v642_v63  ;;  %3404 = vmatmul.mubr.msk.f32.gmra.mrb[20].mxu1 %vm1332_vm2, %v675_v23  ;;  %v173_v63 = vld [vmem:[%s5915_s0 + $0x130] sm:$0xff]  ;;  %v206_v23 = vld [vmem:[%s5915_s0 + $0x238] sm:$0xff] }
 0x110   :  { %v562_v15 = vpop.permute.xlu1 %561  ;;  %v557_v54 = vpop.permute.xlu0 %556  ;;  %3307 = vmatprep.mubr.msk.f32.mxu0 %vm3706_vm0, %v5974_v27  ;;  %3406 = vmatprep.mubr.msk.f32.mxu1 %vm3706_vm0, %v5974_v27 }
 0x111   :  { %1149 = vperm.xlu0 %3696, %v826_v20   ;;  %1064 = vperm.xlu1 %3697, %v6005_v34   ;;  %v677_v10 = vmul.f32 %v557_v54, %v203_v4  ;;  %v678_v41 = vmul.f32 %v562_v15, %v204_v8  ;;  %v752_v20 = vld [vmem:[%s5959_s27 + $0x200] sm:$0xff]  ;;  %v647_v15 = vmul.f32 %v4689_v9, %v173_v63  ;;  %v6014_v9 = vld [vmem:[#allocation23_spill] sm:$0xff]  ;;  %v755_v4 = vld [vmem:[%s5959_s27 + $0x218] sm:$0xff] }
 0x112   :  { %v831_v37 = vmul.f32 %v752_v20, %v6012_v57  ;;  %v832_v34 = vmul.f32 %v753_v40, %v6014_v9  ;;  %v650_v20 = vmul.f32 %v4706_v19, %v176_v30  ;;  %v177_v57 = vld [vmem:[%s5915_s0 + $0x150] sm:$0xff] }
 0x113   :  { %3308 = vmatmul.mubr.msk.f32.gmra.mrb[68].mxu0 %vm1332_vm2, %v643_v3  ;;  %3407 = vmatmul.mubr.msk.f32.gmra.mrb[22].mxu1 %vm1332_vm2, %v676_v55  ;;  %v174_v3 = vld [vmem:[%s5915_s0 + $0x138] sm:$0xff]  ;;  %v207_v55 = vld [vmem:[%s5915_s0 + $0x240] sm:$0xff]  ;;  %v6021_v19 = vld [vmem:[#allocation28_spill] sm:$0xff] }
 0x114   :  { %v572_v39 = vpop.permute.xlu1 %571  ;;  %v567_v59 = vpop.permute.xlu0 %566  ;;  %3310 = vmatprep.mubr.msk.f32.mxu0 %vm3706_vm0, %v5974_v27  ;;  %3409 = vmatprep.mubr.msk.f32.mxu1 %vm3706_vm0, %v5974_v27  ;;  %v648_v26 = vmul.f32 %v4687_v16, %v174_v3  ;;  %v6017_v16 = vld [vmem:[#allocation24_spill] sm:$0xff]  ;;  %v651_v3 = vmul.f32 %v4727_v56, %v177_v57  ;;  %v6023_v56 = vld [vmem:[#allocation30_spill] sm:$0xff] }
 0x115   :  { %1069 = vperm.xlu0 %3696, %v6007_v45   ;;  %1154 = vperm.xlu1 %3697, %v827_v13   ;;  %v679_v31 = vmul.f32 %v567_v59, %v205_v5  ;;  %v680_v54 = vmul.f32 %v572_v39, %v206_v23  ;;  %v754_v13 = vld [vmem:[%s5959_s27 + $0x210] sm:$0xff]  ;;  %v6015_v39 = vld [vmem:[#allocation25_spill] sm:$0xff]  ;;  %v175_v45 = vld [vmem:[%s5915_s0 + $0x140] sm:$0xff]  ;;  %v834_v22 = vmul.f32 %v755_v4, %v6017_v16 }
 0x116   :  { %v833_v59 = vmul.f32 %v754_v13, %v6015_v39  ;;  %v209_v5 = vld [vmem:[%s5915_s0 + $0x250] sm:$0xff]  ;;  %v760_v23 = vld [vmem:[%s5959_s27 + $0x240] sm:$0xff] }
 0x117   :  { %3311 = vmatmul.mubr.msk.f32.gmra.mrb[70].mxu0 %vm1332_vm2, %v644_v36  ;;  %3410 = vmatmul.mubr.msk.f32.gmra.mrb[24].mxu1 %vm1332_vm2, %v677_v10  ;;  %v6016_v36 = vld [vmem:[#allocation13_spill] sm:$0xff]  ;;  %v756_v10 = vld [vmem:[%s5959_s27 + $0x220] sm:$0xff]  ;;  %v762_v9 = vld [vmem:[%s5959_s27 + $0x250] sm:$0xff] }
 0x118   :  { %v5005_v14 = vpop.permute.xlu1 %581  ;;  %v577_v48 = vpop.permute.xlu0 %576  ;;  %3313 = vmatprep.mubr.msk.f32.mxu0 %vm3706_vm0, %v5974_v27  ;;  %3412 = vmatprep.mubr.msk.f32.mxu1 %vm3706_vm0, %v5974_v27  ;;  %v211_v4 = vld [vmem:[%s5915_s0 + $0x260] sm:$0xff]  ;;  %v181_v57 = vld [vmem:[%s5915_s0 + $0x170] sm:$0xff] }
 0x119   :  { %1159 = vperm.xlu0 %3696, %v828_v51   ;;  %1074 = vperm.xlu1 %3697, %v6009_v46   ;;  %v681_v51 = vmul.f32 %v577_v48, %v207_v55  ;;  %v682_v46 = vmul.f32 %v5005_v14, %v208_v43  ;;  %v764_v43 = vld [vmem:[%s5959_s27 + $0x260] sm:$0xff] }
 0x11a   :  { %v179_v16 = vld [vmem:[%s5915_s0 + $0x160] sm:$0xff] }
 0x11b   :  { %3314 = vmatmul.mubr.msk.f32.gmra.mrb[72].mxu0 %vm1332_vm2, %v645_v47  ;;  %3413 = vmatmul.mubr.msk.f32.gmra.mrb[26].mxu1 %vm1332_vm2, %v678_v41  ;;  %v649_v41 = vmul.f32 %v4708_v24, %v175_v45  ;;  %v6019_v24 = vld [vmem:[#allocation26_spill] sm:$0xff] }
 0x11c   :  { %v5025_v6 = vpop.permute.xlu1 %591  ;;  %v5027_v1 = vpop.permute.xlu0 %586  ;;  %3316 = vmatprep.mubr.msk.f32.mxu0 %vm3706_vm0, %v5974_v27  ;;  %3415 = vmatprep.mubr.msk.f32.mxu1 %vm3706_vm0, %v5974_v27  ;;  %v836_v14 = vmul.f32 %v757_v49, %v6019_v24  ;;  %v180_v24 = vld [vmem:[%s5915_s0 + $0x168] sm:$0xff] }
 0x11d   :  { %1079 = vperm.xlu0 %3696, %v6011_v7   ;;  %1164 = vperm.xlu1 %3697, %v829_v60   ;;  %v6018_v60 = vld [vmem:[#allocation27_spill] sm:$0xff]  ;;  %v683_v63 = vmul.f32 %v5027_v1, %v209_v5  ;;  %v766_v5 = vld [vmem:[%s5959_s27 + $0x270] sm:$0xff] }
 0x11e   :  { %v835_v47 = vmul.f32 %v756_v10, %v6018_v60 }
 0x11f   :  { %3317 = vmatmul.mubr.msk.f32.gmra.mrb[74].mxu0 %vm1332_vm2, %v646_v61  ;;  %3416 = vmatmul.mubr.msk.f32.gmra.mrb[28].mxu1 %vm1332_vm2, %v679_v31  ;;  %v759_v61 = vld [vmem:[%s5959_s27 + $0x238] sm:$0xff] }
 0x120   :  { %v5047_v17 = vpop.permute.xlu1 %601  ;;  %v5049_v50 = vpop.permute.xlu0 %596  ;;  %3319 = vmatprep.mubr.msk.f32.mxu0 %vm3706_vm0, %v5974_v27  ;;  %3418 = vmatprep.mubr.msk.f32.mxu1 %vm3706_vm0, %v5974_v27  ;;  %v6020_v31 = vld [vmem:[#allocation29_spill] sm:$0xff]  ;;  %v838_v1 = vmul.f32 %v759_v61, %v6021_v19 }
 0x121   :  { %1169 = vperm.xlu0 %3696, %v830_v29   ;;  %1084 = vperm.xlu1 %3697, %v6013_v42   ;;  %v837_v7 = vmul.f32 %v758_v32, %v6020_v31  ;;  %v6022_v42 = vld [vmem:[#allocation31_spill] sm:$0xff]  ;;  %v685_v45 = vmul.f32 %v5049_v50, %v211_v4  ;;  %v653_v32 = vmul.f32 %v4743_v28, %v179_v16 }
 0x122   :  { %v839_v13 = vmul.f32 %v760_v23, %v6022_v42  ;;  %v3700_v28 = vld [vmem:[%s5958_s26 + $0x268] sm:$0xff] }
 0x123   :  { %3320 = vmatmul.mubr.msk.f32.gmra.mrb[76].mxu0 %vm1332_vm2, %v647_v15  ;;  %3419 = vmatmul.mubr.msk.f32.gmra.mrb[30].mxu1 %vm1332_vm2, %v680_v54  ;;  %v761_v54 = vld [vmem:[%s5959_s27 + $0x248] sm:$0xff] }
 0x124   :  { %v5073_v21 = vpop.permute.xlu0 %606  ;;  %v5075_v12 = vpop.permute.xlu1 %934  ;;  %3322 = vmatprep.mubr.msk.f32.mxu0 %vm3706_vm0, %v5974_v27  ;;  %3421 = vmatprep.mubr.msk.f32.mxu1 %vm3706_vm0, %v5974_v27  ;;  %v188_v16 = vld [vmem:[%s5915_s0 + $0x1a8] sm:$0xff] }
 0x125   :  { %1089 = vperm.xlu0 %3696, %v6016_v36   ;;  %1174 = vperm.xlu1 %3697, %v831_v37   ;;  %v210_v37 = vld [vmem:[%s5915_s0 + $0x258] sm:$0xff] }
 0x126   :  { %v684_v55 = vmul.f32 %v5025_v6, %v210_v37  ;;  %v840_v6 = vmul.f32 %v761_v54, %v6023_v56  ;;  %v185_v56 = vld [vmem:[%s5915_s0 + $0x190] sm:$0xff] }
 0x127   :  { %3323 = vmatmul.mubr.msk.f32.gmra.mrb[78].mxu0 %vm1332_vm2, %v648_v26  ;;  %3422 = vmatmul.mubr.msk.f32.gmra.mrb[32].mxu1 %vm1332_vm2, %v681_v51  ;;  %v763_v26 = vld [vmem:[%s5959_s27 + $0x258] sm:$0xff]  ;;  %v6024_v51 = vld [vmem:[#allocation32_spill] sm:$0xff] }
 0x128   :  { %v5099_v8 = vpop.permute.xlu0 %939  ;;  %v5101_v48 = vpop.permute.xlu1 %854  ;;  %3325 = vmatprep.mubr.msk.f32.mxu0 %vm3706_vm0, %v5974_v27  ;;  %3424 = vmatprep.mubr.msk.f32.mxu1 %vm3706_vm0, %v5974_v27  ;;  %v841_v36 = vmul.f32 %v762_v9, %v6024_v51  ;;  %v184_v9 = vld [vmem:[%s5915_s0 + $0x188] sm:$0xff]  ;;  %v186_v51 = vld [vmem:[%s5915_s0 + $0x198] sm:$0xff] }
 0x129   :  { %1179 = vperm.xlu0 %3696, %v832_v34   ;;  %1184 = vperm.xlu1 %3697, %v833_v59   ;;  %v178_v34 = vld [vmem:[%s5915_s0 + $0x158] sm:$0xff]  ;;  %v658_v4 = vmul.f32 %v4817_v38, %v184_v9 }
 0x12a   :  { %v652_v10 = vmul.f32 %v4725_v18, %v178_v34  ;;  %v3699_v18 = vld [vmem:[%s5958_s26 + $0x258] sm:$0xff] }
 0x12b   :  { %3326 = vmatmul.mubr.msk.f32.gmra.mrb[80].mxu0 %vm1332_vm2, %v649_v41  ;;  %3425 = vmatmul.mubr.msk.f32.gmra.mrb[34].mxu1 %vm1332_vm2, %v682_v46  ;;  %v842_v50 = vmul.f32 %v3699_v18, %v763_v26  ;;  %v6025_v41 = vld [vmem:[#allocation33_spill] sm:$0xff] }
 0x12c   :  { %v5125_v2 = vpop.permute.xlu0 %859  ;;  %v5127_v29 = vpop.permute.xlu1 %944  ;;  %3328 = vmatprep.mubr.msk.f32.mxu0 %vm3706_vm0, %v5974_v27  ;;  %3427 = vmatprep.mubr.msk.f32.mxu1 %vm3706_vm0, %v5974_v27  ;;  %v843_v46 = vmul.f32 %v764_v43, %v6025_v41 }
 0x12d   :  { %1189 = vperm.xlu0 %3696, %v834_v22   ;;  %1194 = vperm.xlu1 %3697, %v835_v47   ;;  %v212_v22 = vld [vmem:[%s5915_s0 + $0x268] sm:$0xff] }
 0x12e   :  { %v765_v47 = vld [vmem:[%s5959_s27 + $0x268] sm:$0xff]  ;;  %v686_v30 = vmul.f32 %v5047_v17, %v212_v22  ;;  %v662_v22 = vmul.f32 %v4894_v0, %v188_v16  ;;  %v5347_v0 = vld [vmem:[%s5917_s6] ss:$0 sm:$0xff] }
 0x12f   :  { %3329 = vmatmul.mubr.msk.f32.gmra.mrb[82].mxu0 %vm1332_vm2, %v650_v20  ;;  %3428 = vmatmul.mubr.msk.f32.gmra.mrb[36].mxu1 %vm1332_vm2, %v683_v63  ;;  %v844_v17 = vmul.f32 %v3700_v28, %v765_v47  ;;  %v654_v63 = vmul.f32 %v4741_v35, %v180_v24  ;;  %v655_v35 = vmul.f32 %v4759_v62, %v181_v57  ;;  %v183_v62 = vld [vmem:[%s5915_s0 + $0x180] sm:$0xff] }
 0x130   :  { %v5151_v40 = vpop.permute.xlu0 %949  ;;  %v5153_v15 = vpop.permute.xlu1 %864  ;;  %3331 = vmatprep.mubr.msk.f32.mxu0 %vm3706_vm0, %v5974_v27  ;;  %3430 = vmatprep.mubr.msk.f32.mxu1 %vm3706_vm0, %v5974_v27 }
 0x131   :  { %1199 = vperm.xlu0 %3696, %v836_v14   ;;  %1204 = vperm.xlu1 %3697, %v837_v7   ;;  %v213_v14 = vld [vmem:[%s5915_s0 + $0x270] sm:$0xff] }
 0x132   :  { %v3701_v7 = vld [vmem:[%s5958_s26 + $0x270] sm:$0xff]  ;;  %v687_v23 = vmul.f32 %v5073_v21, %v213_v14  ;;  %v182_v21 = vld [vmem:[%s5915_s0 + $0x178] sm:$0xff] }
 0x133   :  { %3332 = vmatmul.mubr.msk.f32.gmra.mrb[84].mxu0 %vm1332_vm2, %v651_v3  ;;  %3431 = vmatmul.mubr.msk.f32.gmra.mrb[38].mxu1 %vm1332_vm2, %v684_v55  ;;  %v845_v20 = vmul.f32 %v3701_v7, %v766_v5  ;;  %v656_v42 = vmul.f32 %v4777_v25, %v182_v21  ;;  %v657_v55 = vmul.f32 %v4797_v33, %v183_v62  ;;  %v190_v5 = vld [vmem:[%s5915_s0 + $0x1b8] sm:$0xff] }
 0x134   :  { %v5177_v39 = vpop.permute.xlu0 %869  ;;  %v5179_v59 = vpop.permute.xlu1 %954  ;;  %3334 = vmatprep.mubr.msk.f32.mxu0 %vm3706_vm0, %v5974_v27  ;;  %3433 = vmatprep.mubr.msk.f32.mxu1 %vm3706_vm0, %v5974_v27 }
 0x135   :  { %1209 = vperm.xlu0 %3696, %v838_v1   ;;  %1214 = vperm.xlu1 %3697, %v839_v13  }
 0x137   :  { %3335 = vmatmul.mubr.msk.f32.gmra.mrb[86].mxu0 %vm1332_vm2, %v652_v10  ;;  %3434 = vmatmul.mubr.msk.f32.gmra.mrb[40].mxu1 %vm1332_vm2, %v685_v45  ;;  %v187_v10 = vld [vmem:[%s5915_s0 + $0x1a0] sm:$0xff] }
 0x138   :  { %v5205_v49 = vpop.permute.xlu0 %959  ;;  %v5207_v60 = vpop.permute.xlu1 %874  ;;  %3337 = vmatprep.mubr.msk.f32.mxu0 %vm3706_vm0, %v5974_v27  ;;  %3436 = vmatprep.mubr.msk.f32.mxu1 %vm3706_vm0, %v5974_v27  ;;  %v661_v45 = vmul.f32 %v4877_v58, %v187_v10 }
 0x139   :  { %1219 = vperm.xlu0 %3696, %v840_v6   ;;  %1224 = vperm.xlu1 %3697, %v841_v36   ;;  %v659_v6 = vmul.f32 %v4837_v44, %v185_v56  ;;  %v660_v36 = vmul.f32 %v4857_v53, %v186_v51  ;;  %v5329_v53 = vld [vmem:[%s5916_s5] ss:$0 sm:$0xff] }
 0x13a   :  { %v1253_v58 = vmul.f32 %v5329_v53, %v5101_v48  ;;  %v1256_v62 = vmul.f32 %v5329_v53, %v5177_v39  ;;  %v1257_v51 = vmul.f32 %v5329_v53, %v5207_v60 }
 0x13b   :  { %3338 = vmatmul.mubr.msk.f32.gmra.mrb[88].mxu0 %vm1332_vm2, %v653_v32  ;;  %3437 = vmatmul.mubr.msk.f32.gmra.mrb[42].mxu1 %vm1332_vm2, %v686_v30  ;;  %v1254_v30 = vmul.f32 %v5329_v53, %v5125_v2  ;;  %v1255_v2 = vmul.f32 %v5329_v53, %v5153_v15 }
 0x13c   :  { %v5233_v61 = vpop.permute.xlu0 %879  ;;  %v5235_v31 = vpop.permute.xlu1 %964  ;;  %3340 = vmatprep.mubr.msk.f32.mxu0 %vm3706_vm0, %v5974_v27  ;;  %3439 = vmatprep.mubr.msk.f32.mxu1 %vm3706_vm0, %v5974_v27 }
 0x13d   :  { %1229 = vperm.xlu0 %3696, %v842_v50   ;;  %1234 = vperm.xlu1 %3697, %v843_v46   ;;  %v189_v50 = vld [vmem:[%s5915_s0 + $0x1b0] sm:$0xff] }
 0x13e   :  { %v663_v48 = vmul.f32 %v4910_v52, %v189_v50  ;;  %v664_v52 = vmul.f32 %v4930_v11, %v190_v5  ;;  %v1258_v50 = vmul.f32 %v5329_v53, %v5233_v61 }
 0x13f   :  { %3341 = vmatmul.mubr.msk.f32.gmra.mrb[90].mxu0 %vm1332_vm2, %v654_v63  ;;  %3440 = vmatmul.mubr.msk.f32.gmra.mrb[44].mxu1 %vm1332_vm2, %v687_v23 }
 0x140   :  { %v5251_v37 = vpop.permute.xlu0 %969  ;;  %v5253_v19 = vpop.permute.xlu1 %884  ;;  %3343 = vmatprep.mubr.msk.f32.mxu0 %vm3706_vm0, %v5974_v27 }
 0x141   :  { %1239 = vperm.xlu0 %3696, %v844_v17   ;;  %1244 = vperm.xlu1 %3697, %v845_v20   ;;  %v1259_v5 = vmul.f32 %v5329_v53, %v5253_v19 }
 0x143   :  { %3344 = vmatmul.mubr.msk.f32.gmra.mrb[92].mxu0 %vm1332_vm2, %v655_v35 }
 0x144   :  { %v5262_v1 = vpop.permute.xlu0 %889  ;;  %v5264_v54 = vpop.permute.xlu1 %974  ;;  %3346 = vmatprep.mubr.msk.f32.mxu0 %vm3706_vm0, %v5974_v27 }
 0x147   :  { %3347 = vmatmul.mubr.msk.f32.gmra.mrb[94].mxu0 %vm1332_vm2, %v656_v42 }
 0x148   :  { %v5273_v13 = vpop.permute.xlu0 %979  ;;  %v5275_v3 = vpop.permute.xlu1 %894  ;;  %3349 = vmatprep.mubr.msk.f32.mxu0 %vm3706_vm0, %v5974_v27 }
 0x14b   :  { %3350 = vmatmul.mubr.msk.f32.gmra.mrb[96].mxu0 %vm1332_vm2, %v657_v55 }
 0x14c   :  { %v5284_v25 = vpop.permute.xlu0 %899  ;;  %v5286_v34 = vpop.permute.xlu1 %984  ;;  %3352 = vmatprep.mubr.msk.f32.mxu0 %vm3706_vm0, %v5974_v27 }
 0x14f   :  { %3353 = vmatmul.mubr.msk.f32.gmra.mrb[98].mxu0 %vm1332_vm2, %v658_v4 }
 0x150   :  { %v5295_v33 = vpop.permute.xlu0 %989  ;;  %3355 = vmatprep.mubr.msk.f32.mxu0 %vm3706_vm0, %v5974_v27  ;;  %v5300_v26 = vpop.permute.xlu1 %904 }
 0x153   :  { %3356 = vmatmul.mubr.msk.f32.gmra.mrb[100].mxu0 %vm1332_vm2, %v659_v6 }
 0x154   :  { %v5306_v38 = vpop.permute.xlu0 %909  ;;  %3358 = vmatprep.mubr.msk.f32.mxu0 %vm3706_vm0, %v5974_v27  ;;  %v5314_v44 = vpop.permute.xlu1 %994 }
 0x157   :  { %3359 = vmatmul.mubr.msk.f32.gmra.mrb[102].mxu0 %vm1332_vm2, %v660_v36 }
 0x158   :  { %3361 = vmatprep.mubr.msk.f32.mxu0 %vm3706_vm0, %v5974_v27  ;;  %v5320_v43 = vpop.permute.xlu0 %999  ;;  %v5336_v18 = vpop.permute.xlu1 %914 }
 0x15b   :  { %3362 = vmatmul.mubr.msk.f32.gmra.mrb[104].mxu0 %vm1332_vm2, %v661_v45 }
 0x15c   :  { %3364 = vmatprep.mubr.msk.f32.mxu0 %vm3706_vm0, %v5974_v27  ;;  %v5341_v41 = vpop.permute.xlu0 %919  ;;  %v5357_v14 = vpop.permute.xlu1 %1004 }
 0x15e   :  { %v1640_v47 = vpop.f32.mrb[0].mxu0 }
 0x15f   :  { %v1641_v46 = vadd.f32 %v1640_v47, %v1253_v58  ;;  %v3207_v32 = vpop.f32.mrb[1].mxu0  ;;  %3365 = vmatmul.mubr.msk.f32.gmra.mrb[106].mxu0 %vm1332_vm2, %v662_v22 }
 0x160   :  { %3367 = vmatprep.mubr.msk.f32.mxu0 %vm3706_vm0, %v5974_v27  ;;  %v5366_v20 = vpop.permute.xlu0 %1009  ;;  %v5372_v55 = vpop.permute.xlu1 %924 }
 0x161   :  { %v2041_v28 = vadd.f32 %v5347_v0, %v1641_v46 }
 0x162   :  { %v1645_v24 = vpop.f32.mrb[2].mxu0 }
 0x163   :  { %v1646_v17 = vadd.f32 %v1645_v24, %v1254_v30  ;;  %v3210_v7 = vpop.f32.mrb[3].mxu0  ;;  %3368 = vmatmul.mubr.msk.f32.gmra.mrb[108].mxu0 %vm1332_vm2, %v663_v48  ;;  %v2120_v57 = vmax.f32 %v2041_v28, 0.0 }
 0x164   :  { %3370 = vmatprep.mubr.msk.f32.mxu0 %vm3706_vm0, %v5974_v27  ;;  %v5376_v15 = vpop.permute.xlu0 %929  ;;  %v5382_v45 = vpop.permute.xlu1 %1094 }
 0x165   :  { %v2042_v63 = vadd.f32 %v5347_v0, %v1646_v17 }
 0x166   :  { %v1650_v23 = vpop.f32.mrb[4].mxu0 }
 0x167   :  { %v2121_v35 = vmax.f32 %v2042_v63, 0.0  ;;  %v1651_v21 = vadd.f32 %v1650_v23, %v1255_v2  ;;  %v3213_v42 = vpop.f32.mrb[5].mxu0  ;;  %3371 = vmatmul.mubr.msk.f32.gmra.mrb[110].mxu0 %vm1332_vm2, %v664_v52  ;;  %v1260_v23 = vmul.f32 %v5329_v53, %v5262_v1 }
 0x168   :  { %v5386_v47 = vpop.permute.xlu0 %1099  ;;  %v5393_v24 = vpop.permute.xlu1 %1014 }
 0x169   :  { %v5374_v11 = vpack.c.bf16 %v2121_v35, %v2120_v57  ;;  %v2043_v4 = vadd.f32 %v5347_v0, %v1651_v21 }
 0x16a   :  { %v1655_v9 = vpop.f32.mrb[6].mxu0 }
 0x16b   :  { %v1656_v56 = vadd.f32 %v1655_v9, %v1256_v62  ;;  %v3216_v6 = vpop.f32.mrb[7].mxu0  ;;  %v2122_v39 = vmax.f32 %v2043_v4, 0.0  ;;  %v1261_v9 = vmul.f32 %v5329_v53, %v5275_v3 }
 0x16c   :  { %v5396_v7 = vpop.permute.xlu0 %1019  ;;  %v5402_v21 = vpop.permute.xlu1 %1104 }
 0x16d   :  { %v2044_v36 = vadd.f32 %v5347_v0, %v1656_v56 }
 0x16e   :  { %v1660_v10 = vpop.f32.mrb[8].mxu0 }
 0x16f   :  { %v2123_v16 = vmax.f32 %v2044_v36, 0.0  ;;  %v1661_v22 = vadd.f32 %v1660_v10, %v1257_v51  ;;  %v3219_v58 = vpop.f32.mrb[9].mxu0 }
 0x170   :  { %v5407_v4 = vpop.permute.xlu0 %1109 }
 0x171   :  { %v5388_v46 = vpack.c.bf16 %v2123_v16, %v2122_v39  ;;  %v2045_v48 = vadd.f32 %v5347_v0, %v1661_v22  ;;  %v1262_v39 = vmul.f32 %v5329_v53, %v5284_v25  ;;  %v5412_v16 = vpop.permute.xlu1 %1024 }
 0x172   :  { %v1665_v32 = vpop.f32.mrb[10].mxu0 }
 0x173   :  { %v1666_v60 = vadd.f32 %v1665_v32, %v1258_v50  ;;  %v3222_v30 = vpop.f32.mrb[11].mxu0  ;;  %v2124_v61 = vmax.f32 %v2045_v48, 0.0 }
 0x174   :  { %v5416_v50 = vpop.permute.xlu0 %1029 }
 0x175   :  { %v2046_v28 = vadd.f32 %v5347_v0, %v1666_v60  ;;  %v1263_v60 = vmul.f32 %v5329_v53, %v5300_v26 }
 0x176   :  { %v1670_v17 = vpop.f32.mrb[12].mxu0 }
 0x177   :  { %v2125_v52 = vmax.f32 %v2046_v28, 0.0  ;;  %v1671_v2 = vadd.f32 %v1670_v17, %v1259_v5  ;;  %v3225_v63 = vpop.f32.mrb[13].mxu0  ;;  %v5422_v28 = vpop.permute.xlu1 %1114 }
 0x178   :  { %v5426_v63 = vpop.permute.xlu0 %1119 }
 0x179   :  { %v5400_v57 = vpack.c.bf16 %v2125_v52, %v2124_v61  ;;  %v2047_v19 = vadd.f32 %v5347_v0, %v1671_v2  ;;  %v1264_v2 = vmul.f32 %v5329_v53, %v5306_v38 }
 0x17a   :  { %v1675_v35 = vpop.f32.mrb[14].mxu0 }
 0x17b   :  { %v1676_v42 = vadd.f32 %v1675_v35, %v1260_v23  ;;  %v3228_v62 = vpop.f32.mrb[15].mxu0  ;;  %v2126_v51 = vmax.f32 %v2047_v19, 0.0 }
 0x17c   :  { %v1265_v62 = vmul.f32 %v5329_v53, %v5336_v18 }
 0x17d   :  { %v2048_v56 = vadd.f32 %v5347_v0, %v1676_v42 }
 0x17e   :  { %v1680_v6 = vpop.f32.mrb[16].mxu0 }
 0x17f   :  { %v2127_v36 = vmax.f32 %v2048_v56, 0.0  ;;  %v1681_v1 = vadd.f32 %v1680_v6, %v1261_v9  ;;  %v3231_v10 = vpop.f32.mrb[17].mxu0  ;;  %v5433_v9 = vpop.permute.xlu1 %1034 }
 0x181   :  { %v5414_v22 = vpack.c.bf16 %v2127_v36, %v2126_v51  ;;  %v2049_v3 = vadd.f32 %v5347_v0, %v1681_v1  ;;  %v5436_v51 = vpop.permute.xlu0 %1039 }
 0x182   :  { %v1685_v58 = vpop.f32.mrb[18].mxu0 }
 0x183   :  { %v1686_v32 = vadd.f32 %v1685_v58, %v1262_v39  ;;  %v3234_v48 = vpop.f32.mrb[19].mxu0  ;;  %v2128_v25 = vmax.f32 %v2049_v3, 0.0  ;;  %v1266_v39 = vmul.f32 %v5329_v53, %v5341_v41 }
 0x185   :  { %v2050_v30 = vadd.f32 %v5347_v0, %v1686_v32  ;;  %v5442_v32 = vpop.permute.xlu1 %1124 }
 0x186   :  { %v1690_v5 = vpop.f32.mrb[20].mxu0 }
 0x187   :  { %v2129_v17 = vmax.f32 %v2050_v30, 0.0  ;;  %v1691_v61 = vadd.f32 %v1690_v5, %v1263_v60  ;;  %v3237_v52 = vpop.f32.mrb[21].mxu0  ;;  %v1267_v30 = vmul.f32 %v5329_v53, %v5372_v55  ;;  %v5447_v5 = vpop.permute.xlu0 %1129 }
 0x189   :  { %v5428_v23 = vpack.c.bf16 %v2129_v17, %v2128_v25  ;;  %v2051_v19 = vadd.f32 %v5347_v0, %v1691_v61 }
 0x18a   :  { %v1695_v35 = vpop.f32.mrb[22].mxu0 }
 0x18b   :  { %v1696_v26 = vadd.f32 %v1695_v35, %v1264_v2  ;;  %v3240_v42 = vpop.f32.mrb[23].mxu0  ;;  %v2130_v38 = vmax.f32 %v2051_v19, 0.0  ;;  %v1268_v35 = vmul.f32 %v5329_v53, %v5376_v15  ;;  %v5452_v19 = vpop.permute.xlu1 %1044 }
 0x18d   :  { %v2052_v56 = vadd.f32 %v5347_v0, %v1696_v26 }
 0x18e   :  { %v1700_v6 = vpop.f32.mrb[24].mxu0 }
 0x18f   :  { %v2131_v36 = vmax.f32 %v2052_v56, 0.0  ;;  %v1701_v1 = vadd.f32 %v1700_v6, %v1265_v62  ;;  %v3243_v10 = vpop.f32.mrb[25].mxu0  ;;  %v5456_v62 = vpop.permute.xlu0 %1049 }
 0x190   :  { %v5462_v10 = vpop.permute.xlu1 %1134 }
 0x191   :  { %v5440_v58 = vpack.c.bf16 %v2131_v36, %v2130_v38  ;;  %v2053_v18 = vadd.f32 %v5347_v0, %v1701_v1  ;;  %v1269_v38 = vmul.f32 %v5329_v53, %v5075_v12 }
 0x192   :  { %v1705_v3 = vpop.f32.mrb[26].mxu0 }
 0x193   :  { %v1706_v48 = vadd.f32 %v1705_v3, %v1266_v39  ;;  %v3246_v60 = vpop.f32.mrb[27].mxu0  ;;  %v2132_v61 = vmax.f32 %v2053_v18, 0.0 }
 0x194   :  { %v5466_v60 = vpop.permute.xlu0 %1139 }
 0x195   :  { %v2054_v25 = vadd.f32 %v5347_v0, %v1706_v48  ;;  %v1270_v48 = vmul.f32 %v5329_v53, %v5099_v8 }
 0x196   :  { %v1710_v17 = vpop.f32.mrb[28].mxu0 }
 0x197   :  { %v2133_v52 = vmax.f32 %v2054_v25, 0.0  ;;  %v1711_v41 = vadd.f32 %v1710_v17, %v1267_v30  ;;  %v3249_v2 = vpop.f32.mrb[29].mxu0  ;;  %v2207_v17 = vlaneseq }
 0x199   :  { %v5454_v26 = vpack.c.bf16 %v2133_v52, %v2132_v61  ;;  %v2055_v55 = vadd.f32 %v5347_v0, %v1711_v41  ;;  %v3708_v41 = vmov 1983009808  }
 0x19a   :  { %v1715_v42 = vpop.f32.mrb[30].mxu0  ;;  %v2205_v2 = vunpack.c.l.s4 %v3708_v41 }
 0x19b   :  { %v1716_v56 = vadd.f32 %v1715_v42, %v1268_v35  ;;  %v3252_v6 = vpop.f32.mrb[31].mxu0  ;;  %v2134_v15 = vmax.f32 %v2055_v55, 0.0  ;;  %v2208_v35 = vshrl.u32 %v2207_v17, 7  ;;  %v1271_v42 = vmul.f32 %v5329_v53, %v5127_v29  ;;  %v5473_v55 = vpop.permute.xlu1 %1054 }
 0x19c   :  { %v1272_v29 = vmul.f32 %v5329_v53, %v5151_v40  ;;  %v1273_v40 = vmul.f32 %v5329_v53, %v5179_v59 }
 0x19d   :  { %v2056_v36 = vadd.f32 %v5347_v0, %v1716_v56  ;;  %v2206_v56 = vunpack.c.0.s8 %v2205_v2 }
 0x19e   :  { %v1720_v1 = vpop.f32.mrb[32].mxu0 }
 0x19f   :  { %v2135_v39 = vmax.f32 %v2056_v36, 0.0  ;;  %v1721_v3 = vadd.f32 %v1720_v1, %v1269_v38  ;;  %v3255_v18 = vpop.f32.mrb[33].mxu0  ;;  %v5476_v38 = vpop.permute.xlu0 %1059 }
 0x1a0   :  { %v5483_v18 = vsub.s32 %v2206_v56, %v2208_v35 }
 0x1a1   :  { %v5468_v30 = vpack.c.bf16 %v2135_v39, %v2134_v15  ;;  %v2057_v12 = vadd.f32 %v5347_v0, %v1721_v3  ;;  %v5481_v3 = vld [vmem:[%s5918_s3] sm:$0xff] }
 0x1a2   :  { %v1725_v25 = vpop.f32.mrb[34].mxu0  ;;  %v5489_v17 = vrot.slane %v5481_v3, %v5483_v18 }
 0x1a3   :  { %v1726_v61 = vadd.f32 %v1725_v25, %v1270_v48  ;;  %v3258_v52 = vpop.f32.mrb[35].mxu0  ;;  %v2136_v36 = vmax.f32 %v2057_v12, 0.0  ;;  %v1145_v12 = vpop.permute.xlu1 %1144 }
 0x1a4   :  { %v2218_v2 = vcombine.high %v5489_v17, %v5489_v17  ;;  %v5497_v35 = vpop.permute.xlu0 %1149 }
 0x1a5   :  { %v2058_v8 = vadd.f32 %v5347_v0, %v1726_v61 }
 0x1a6   :  { %v1730_v6 = vpop.f32.mrb[36].mxu0  ;;  %2298 = vmatprep.mubr.f32.mxu1 %v2218_v2 }
 0x1a7   :  { %v2137_v1 = vmax.f32 %v2058_v8, 0.0  ;;  %v1731_v15 = vadd.f32 %v1730_v6, %v1271_v42  ;;  %v3261_v39 = vpop.f32.mrb[37].mxu0 }
 0x1a9   :  { %v3558_v48 = vpack.c.bf16 %v2137_v1, %v2136_v36  ;;  %v2059_v61 = vadd.f32 %v5347_v0, %v1731_v15  ;;  %v1274_v15 = vmul.f32 %v5329_v53, %v5205_v49 }
 0x1aa   :  { %v1735_v25 = vpop.f32.mrb[38].mxu0 }
 0x1ab   :  { %v1736_v52 = vadd.f32 %v1735_v25, %v1272_v29  ;;  %v3264_v41 = vpop.f32.mrb[39].mxu0  ;;  %3559 = vmatprep.subr.bf16.mxu1 %v3558_v48  ;;  %v2138_v56 = vmax.f32 %v2059_v61, 0.0  ;;  %v5504_v48 = vpop.permute.xlu0 %1069 }
 0x1ac   :  { %3561 = vmatpush3.bf16.msra.mxu1 %v5374_v11  ;;  %v5502_v11 = vpop.permute.xlu1 %1064 }
 0x1ad   :  { %v2060_v42 = vadd.f32 %v5347_v0, %v1736_v52  ;;  %v1275_v52 = vmul.f32 %v5329_v53, %v5235_v31 }
 0x1ae   :  { %v1740_v8 = vpop.f32.mrb[40].mxu0 }
 0x1af   :  { %v2139_v6 = vmax.f32 %v2060_v42, 0.0  ;;  %v1741_v36 = vadd.f32 %v1740_v8, %v1273_v40  ;;  %v3267_v1 = vpop.f32.mrb[41].mxu0 }
 0x1b0   :  { %v1155_v49 = vpop.permute.xlu1 %1154  ;;  %v5515_v1 = vpop.permute.xlu0 %1159 }
 0x1b1   :  { %v3562_v39 = vpack.c.bf16 %v2139_v6, %v2138_v56  ;;  %v2061_v59 = vadd.f32 %v5347_v0, %v1741_v36  ;;  %v1276_v6 = vmul.f32 %v5329_v53, %v5251_v37  ;;  %v1309_v36 = vmul.f32 %v5329_v53, %v5462_v10 }
 0x1b2   :  { %v1745_v29 = vpop.f32.mrb[42].mxu0  ;;  %v1277_v37 = vmul.f32 %v5329_v53, %v5264_v54  ;;  %v1310_v10 = vmul.f32 %v5329_v53, %v5466_v60  ;;  %v1278_v54 = vmul.f32 %v5329_v53, %v5273_v13  ;;  %v1279_v13 = vmul.f32 %v5329_v53, %v5286_v34 }
 0x1b3   :  { %v1746_v25 = vadd.f32 %v1745_v29, %v1274_v15  ;;  %v3270_v41 = vpop.f32.mrb[43].mxu0  ;;  %3563 = vmatprep.subr.bf16.mxu1 %v3562_v39  ;;  %v2140_v40 = vmax.f32 %v2061_v59, 0.0 }
 0x1b4   :  { %3565 = vmatpush3.bf16.msra.mxu1 %v5388_v46  ;;  %v5530_v60 = vpop.permute.xlu0 %1079 }
 0x1b5   :  { %v2062_v61 = vadd.f32 %v5347_v0, %v1746_v25 }
 0x1b6   :  { %v1750_v2 = vpop.f32.mrb[44].mxu0 }
 0x1b7   :  { %v2141_v42 = vmax.f32 %v2062_v61, 0.0  ;;  %v3273_v8 = vpop.f32.mrb[45].mxu0  ;;  %v1751_v56 = vadd.f32 %v1750_v2, %v1275_v52  ;;  %v5523_v61 = vpop.permute.xlu1 %1074 }
 0x1b9   :  { %v3566_v46 = vpack.c.bf16 %v2141_v42, %v2140_v40  ;;  %v2063_v59 = vadd.f32 %v5347_v0, %v1751_v56 }
 0x1ba   :  { %v1755_v15 = vpop.f32.mrb[46].mxu0  ;;  %v1920_v39 = vpop.f32.mrb[0].mxu1 }
 0x1bb   :  { %v1756_v29 = vadd.f32 %v1755_v15, %v1276_v6  ;;  %v1921_v25 = vadd.f32 %v1920_v39, %v1309_v36  ;;  %v3276_v31 = vpop.f32.mrb[47].mxu0  ;;  %v3375_v41 = vpop.f32.mrb[1].mxu1  ;;  %3567 = vmatprep.subr.bf16.mxu1 %v3566_v46  ;;  %v1311_v15 = vmul.f32 %v5329_v53, %v1145_v12  ;;  %v1312_v12 = vmul.f32 %v5329_v53, %v5497_v35 }
 0x1bc   :  { %3569 = vmatpush3.bf16.msra.mxu1 %v5400_v57  ;;  %v2142_v57 = vmax.f32 %v2063_v59, 0.0  ;;  %v1280_v35 = vmul.f32 %v5329_v53, %v5295_v33  ;;  %v1281_v33 = vmul.f32 %v5329_v53, %v5314_v44  ;;  %v1282_v44 = vmul.f32 %v5329_v53, %v5320_v43 }
 0x1bd   :  { %v2064_v52 = vadd.f32 %v5347_v0, %v1756_v29  ;;  %v2097_v8 = vadd.f32 %v5347_v0, %v1921_v25  ;;  %v1283_v43 = vmul.f32 %v5329_v53, %v5357_v14  ;;  %v1284_v14 = vmul.f32 %v5329_v53, %v5366_v20 }
 0x1be   :  { %v1760_v2 = vpop.f32.mrb[48].mxu0  ;;  %v1925_v40 = vpop.f32.mrb[2].mxu1  ;;  %v2203_v20 = vcombine.high %v5481_v3, %v5481_v3 }
 0x1bf   :  { %v2143_v42 = vmax.f32 %v2064_v52, 0.0  ;;  %v1761_v6 = vadd.f32 %v1760_v2, %v1277_v37  ;;  %v1926_v36 = vadd.f32 %v1925_v40, %v1310_v10  ;;  %v3279_v56 = vpop.f32.mrb[49].mxu0  ;;  %v3378_v46 = vpop.f32.mrb[3].mxu1  ;;  %v2176_v25 = vmax.f32 %v2097_v8, 0.0 }
 0x1c0   :  { %v1165_v56 = vpop.permute.xlu1 %1164 }
 0x1c1   :  { %v2098_v39 = vadd.f32 %v5347_v0, %v1926_v36  ;;  %v2065_v29 = vadd.f32 %v5347_v0, %v1761_v6  ;;  %v3570_v52 = vpack.c.bf16 %v2143_v42, %v2142_v57 }
 0x1c2   :  { %v1765_v31 = vpop.f32.mrb[50].mxu0  ;;  %v1930_v41 = vpop.f32.mrb[4].mxu1 }
 0x1c3   :  { %v2177_v37 = vmax.f32 %v2098_v39, 0.0  ;;  %v1766_v10 = vadd.f32 %v1765_v31, %v1278_v54  ;;  %v1931_v2 = vadd.f32 %v1930_v41, %v1311_v15  ;;  %v3282_v40 = vpop.f32.mrb[51].mxu0  ;;  %v3381_v59 = vpop.f32.mrb[5].mxu1  ;;  %3571 = vmatprep.subr.bf16.mxu1 %v3570_v52  ;;  %v2144_v42 = vmax.f32 %v2065_v29, 0.0 }
 0x1c4   :  { %3573 = vmatpush3.bf16.msra.mxu1 %v5414_v22  ;;  %v1313_v41 = vmul.f32 %v5329_v53, %v1155_v49  ;;  %v1170_v52 = vpop.permute.xlu0 %1169  ;;  %v1314_v49 = vmul.f32 %v5329_v53, %v5515_v1  ;;  %v1315_v1 = vmul.f32 %v5329_v53, %v1165_v56 }
 0x1c5   :  { %v2066_v36 = vadd.f32 %v5347_v0, %v1766_v10  ;;  %v5540_v6 = vpack.c.bf16 %v2177_v37, %v2176_v25  ;;  %v2099_v54 = vadd.f32 %v5347_v0, %v1931_v2  ;;  %v1316_v56 = vmul.f32 %v5329_v53, %v1170_v52 }
 0x1c6   :  { %v1770_v8 = vpop.f32.mrb[52].mxu0  ;;  %v1935_v46 = vpop.f32.mrb[6].mxu1 }
 0x1c7   :  { %v2145_v57 = vmax.f32 %v2066_v36, 0.0  ;;  %v1771_v15 = vadd.f32 %v1770_v8, %v1279_v13  ;;  %v1936_v39 = vadd.f32 %v1935_v46, %v1312_v12  ;;  %v3285_v31 = vpop.f32.mrb[53].mxu0  ;;  %v3384_v34 = vpop.f32.mrb[7].mxu1  ;;  %v2178_v40 = vmax.f32 %v2099_v54, 0.0 }
 0x1c9   :  { %v2100_v22 = vadd.f32 %v5347_v0, %v1936_v39  ;;  %v3574_v25 = vpack.c.bf16 %v2145_v57, %v2144_v42  ;;  %v2067_v29 = vadd.f32 %v5347_v0, %v1771_v15  ;;  %v5553_v42 = vpop.permute.xlu1 %1084 }
 0x1ca   :  { %v1775_v37 = vpop.f32.mrb[54].mxu0  ;;  %v1940_v10 = vpop.f32.mrb[8].mxu1 }
 0x1cb   :  { %v2179_v59 = vmax.f32 %v2100_v22, 0.0  ;;  %v1776_v2 = vadd.f32 %v1775_v37, %v1280_v35  ;;  %v1941_v13 = vadd.f32 %v1940_v10, %v1313_v41  ;;  %v3288_v12 = vpop.f32.mrb[55].mxu0  ;;  %v3387_v36 = vpop.f32.mrb[9].mxu1  ;;  %3575 = vmatprep.subr.bf16.mxu1 %v3574_v25  ;;  %v2146_v57 = vmax.f32 %v2067_v29, 0.0 }
 0x1cc   :  { %3577 = vmatpush3.bf16.msra.mxu1 %v5428_v23  ;;  %v5562_v22 = vpop.permute.xlu0 %1089 }
 0x1cd   :  { %v2068_v8 = vadd.f32 %v5347_v0, %v1776_v2  ;;  %v5556_v46 = vpack.c.bf16 %v2179_v59, %v2178_v40  ;;  %v2101_v31 = vadd.f32 %v5347_v0, %v1941_v13 }
 0x1ce   :  { %v1780_v54 = vpop.f32.mrb[56].mxu0  ;;  %v1945_v15 = vpop.f32.mrb[10].mxu1 }
 0x1cf   :  { %v2147_v39 = vmax.f32 %v2068_v8, 0.0  ;;  %v1781_v34 = vadd.f32 %v1780_v54, %v1281_v33  ;;  %v1946_v23 = vadd.f32 %v1945_v15, %v1314_v49  ;;  %v3291_v35 = vpop.f32.mrb[57].mxu0  ;;  %v3390_v41 = vpop.f32.mrb[11].mxu1  ;;  %v2180_v59 = vmax.f32 %v2101_v31, 0.0 }
 0x1d0   :  { %v1175_v49 = vpop.permute.xlu1 %1174 }
 0x1d1   :  { %v2102_v25 = vadd.f32 %v5347_v0, %v1946_v23  ;;  %v3578_v37 = vpack.c.bf16 %v2147_v39, %v2146_v57  ;;  %v2069_v29 = vadd.f32 %v5347_v0, %v1781_v34  ;;  %v1317_v52 = vmul.f32 %v5329_v53, %v1175_v49 }
 0x1d2   :  { %v1785_v10 = vpop.f32.mrb[58].mxu0  ;;  %v1950_v40 = vpop.f32.mrb[12].mxu1 }
 0x1d3   :  { %v2181_v2 = vmax.f32 %v2102_v25, 0.0  ;;  %v1786_v13 = vadd.f32 %v1785_v10, %v1282_v44  ;;  %v1951_v12 = vadd.f32 %v1950_v40, %v1315_v1  ;;  %v3294_v36 = vpop.f32.mrb[59].mxu0  ;;  %v3393_v33 = vpop.f32.mrb[13].mxu1  ;;  %3579 = vmatprep.subr.bf16.mxu1 %v3578_v37  ;;  %v2148_v54 = vmax.f32 %v2069_v29, 0.0 }
 0x1d4   :  { %3581 = vmatpush3.bf16.msra.mxu1 %v5440_v58  ;;  %v1180_v44 = vpop.permute.xlu0 %1179  ;;  %v1285_v33 = vmul.f32 %v5329_v53, %v5393_v24  ;;  %v1286_v24 = vmul.f32 %v5329_v53, %v5396_v7 }
 0x1d5   :  { %v2070_v8 = vadd.f32 %v5347_v0, %v1786_v13  ;;  %v5571_v57 = vpack.c.bf16 %v2181_v2, %v2180_v59  ;;  %v2103_v34 = vadd.f32 %v5347_v0, %v1951_v12 }
 0x1d6   :  { %v1790_v15 = vpop.f32.mrb[60].mxu0  ;;  %v1955_v39 = vpop.f32.mrb[14].mxu1 }
 0x1d7   :  { %v2149_v31 = vmax.f32 %v2070_v8, 0.0  ;;  %v1791_v23 = vadd.f32 %v1790_v15, %v1283_v43  ;;  %v1956_v35 = vadd.f32 %v1955_v39, %v1316_v56  ;;  %v3297_v41 = vpop.f32.mrb[61].mxu0  ;;  %v3396_v58 = vpop.f32.mrb[15].mxu1  ;;  %v2182_v40 = vmax.f32 %v2103_v34, 0.0 }
 0x1d8   :  { %v1318_v43 = vmul.f32 %v5329_v53, %v1180_v44  ;;  %v1185_v56 = vpop.permute.xlu1 %1184  ;;  %v5590_v41 = vrot.slane %v2203_v20, %v5483_v18 }
 0x1d9   :  { %v2104_v1 = vadd.f32 %v5347_v0, %v1956_v35  ;;  %v3582_v25 = vpack.c.bf16 %v2149_v31, %v2148_v54  ;;  %v2071_v37 = vadd.f32 %v5347_v0, %v1791_v23  ;;  %v1319_v58 = vmul.f32 %v5329_v53, %v1185_v56 }
 0x1da   :  { %v1795_v29 = vpop.f32.mrb[62].mxu0  ;;  %v1960_v10 = vpop.f32.mrb[16].mxu1  ;;  %v2219_v7 = vcombine.high %v5590_v41, %v5590_v41 }
 0x1db   :  { %v2183_v59 = vmax.f32 %v2104_v1, 0.0  ;;  %v1796_v2 = vadd.f32 %v1795_v29, %v1284_v14  ;;  %v1961_v13 = vadd.f32 %v1960_v10, %v1317_v52  ;;  %v3300_v12 = vpop.f32.mrb[63].mxu0  ;;  %v3399_v36 = vpop.f32.mrb[17].mxu1  ;;  %3583 = vmatprep.subr.bf16.mxu1 %v3582_v25  ;;  %v2150_v54 = vmax.f32 %v2071_v37, 0.0 }
 0x1dc   :  { %3585 = vmatpush3.bf16.msra.mxu1 %v5454_v26  ;;  %v1190_v14 = vpop.permute.xlu0 %1189  ;;  %v1195_v36 = vpop.permute.xlu1 %1194 }
 0x1dd   :  { %v2072_v49 = vadd.f32 %v5347_v0, %v1796_v2  ;;  %v5586_v8 = vpack.c.bf16 %v2183_v59, %v2182_v40  ;;  %v2105_v34 = vadd.f32 %v5347_v0, %v1961_v13  ;;  %v1287_v13 = vmul.f32 %v5329_v53, %v5412_v16 }
 0x1de   :  { %v1800_v15 = vpop.f32.mrb[64].mxu0  ;;  %v1965_v39 = vpop.f32.mrb[18].mxu1  ;;  %v1320_v12 = vmul.f32 %v5329_v53, %v1190_v14  ;;  %v1288_v16 = vmul.f32 %v5329_v53, %v5416_v50  ;;  %v1289_v50 = vmul.f32 %v5329_v53, %v5433_v9  ;;  %v1290_v9 = vmul.f32 %v5329_v53, %v5436_v51 }
 0x1df   :  { %v2151_v31 = vmax.f32 %v2072_v49, 0.0  ;;  %v1801_v26 = vadd.f32 %v1800_v15, %v1285_v33  ;;  %v1966_v23 = vadd.f32 %v1965_v39, %v1318_v43  ;;  %v3303_v35 = vpop.f32.mrb[65].mxu0  ;;  %v3402_v3 = vpop.f32.mrb[19].mxu1  ;;  %v2184_v29 = vmax.f32 %v2105_v34, 0.0 }
 0x1e0   :  { %v1291_v51 = vmul.f32 %v5329_v53, %v5452_v19  ;;  %v1292_v19 = vmul.f32 %v5329_v53, %v5456_v62  ;;  %v1293_v62 = vmul.f32 %v5329_v53, %v5473_v55  ;;  %v1294_v55 = vmul.f32 %v5329_v53, %v5476_v38 }
 0x1e1   :  { %v2106_v52 = vadd.f32 %v5347_v0, %v1966_v23  ;;  %v3586_v44 = vpack.c.bf16 %v2151_v31, %v2150_v54  ;;  %v2073_v1 = vadd.f32 %v5347_v0, %v1801_v26  ;;  %v1321_v26 = vmul.f32 %v5329_v53, %v1195_v36  ;;  %v1200_v23 = vpop.permute.xlu0 %1199 }
 0x1e2   :  { %v1805_v25 = vpop.f32.mrb[66].mxu0  ;;  %v1970_v37 = vpop.f32.mrb[20].mxu1  ;;  %v1295_v38 = vmul.f32 %v5329_v53, %v5502_v11  ;;  %v1296_v11 = vmul.f32 %v5329_v53, %v5504_v48  ;;  %v5674_v48 = vld [vmem:[%s5916_s5] ss:$0 sm:$0xff] }
 0x1e3   :  { %v2185_v10 = vmax.f32 %v2106_v52, 0.0  ;;  %v1806_v40 = vadd.f32 %v1805_v25, %v1286_v24  ;;  %v1971_v59 = vadd.f32 %v1970_v37, %v1319_v58  ;;  %v3306_v2 = vpop.f32.mrb[67].mxu0  ;;  %v3405_v18 = vpop.f32.mrb[21].mxu1  ;;  %3587 = vmatprep.subr.bf16.mxu1 %v3586_v44  ;;  %v2152_v43 = vmax.f32 %v2073_v1, 0.0 }
 0x1e4   :  { %3589 = vmatpush3.bf16.msra.mxu1 %v5468_v30 }
 0x1e5   :  { %v5603_v20 = vpack.c.bf16 %v2185_v10, %v2184_v29  ;;  %v2074_v33 = vadd.f32 %v5347_v0, %v1806_v40  ;;  %v2107_v15 = vadd.f32 %v5347_v0, %v1971_v59  ;;  %v1322_v29 = vmul.f32 %v5329_v53, %v1200_v23  ;;  %v1205_v10 = vpop.permute.xlu1 %1204 }
 0x1e6   :  { %v1810_v56 = vpop.f32.mrb[68].mxu0  ;;  %v1975_v49 = vpop.f32.mrb[22].mxu1 }
 0x1e7   :  { %v2153_v54 = vmax.f32 %v2074_v33, 0.0  ;;  %v1811_v30 = vadd.f32 %v1810_v56, %v1287_v13  ;;  %v1976_v39 = vadd.f32 %v1975_v49, %v1320_v12  ;;  %v3309_v31 = vpop.f32.mrb[69].mxu0  ;;  %v3408_v34 = vpop.f32.mrb[23].mxu1  ;;  %2299 = vmatmul.mubr.f32.vlgmr.msra.gmra.mrb[46].mxu1 %v5489_v17  ;;  %v2186_v52 = vmax.f32 %v2107_v15, 0.0 }
 0x1e8   :  { %2368 = vmatprep.mubr.f32.mxu1 %v2219_v7  ;;  %v1323_v49 = vmul.f32 %v5329_v53, %v1205_v10 }
 0x1e9   :  { %v5611_v35 = vpack.c.bf16 %v2153_v54, %v2152_v43  ;;  %v2108_v3 = vadd.f32 %v5347_v0, %v1976_v39  ;;  %v2075_v24 = vadd.f32 %v5347_v0, %v1811_v30  ;;  %v1210_v54 = vpop.permute.xlu0 %1209 }
 0x1ea   :  { %v1815_v58 = vpop.f32.mrb[70].mxu0  ;;  %v1980_v14 = vpop.f32.mrb[24].mxu1 }
 0x1eb   :  { %v2187_v44 = vmax.f32 %v2108_v3, 0.0  ;;  %v1816_v1 = vadd.f32 %v1815_v58, %v1288_v16  ;;  %v1981_v25 = vadd.f32 %v1980_v14, %v1321_v26  ;;  %v3312_v17 = vpop.f32.mrb[71].mxu0  ;;  %v3411_v37 = vpop.f32.mrb[25].mxu1  ;;  %v2154_v2 = vmax.f32 %v2075_v24, 0.0 }
 0x1ec   :  { %v1324_v14 = vmul.f32 %v5329_v53, %v1210_v54 }
 0x1ed   :  { %v5618_v40 = vpack.c.bf16 %v2187_v44, %v2186_v52  ;;  %v2076_v59 = vadd.f32 %v5347_v0, %v1816_v1  ;;  %v2109_v12 = vadd.f32 %v5347_v0, %v1981_v25  ;;  %v1215_v52 = vpop.permute.xlu1 %1214 }
 0x1ee   :  { %v1820_v18 = vpop.f32.mrb[72].mxu0  ;;  %v1985_v7 = vpop.f32.mrb[26].mxu1 }
 0x1ef   :  { %v2155_v13 = vmax.f32 %v2076_v59, 0.0  ;;  %v1821_v36 = vadd.f32 %v1820_v18, %v1289_v50  ;;  %v1986_v33 = vadd.f32 %v1985_v7, %v1322_v29  ;;  %v3315_v43 = vpop.f32.mrb[73].mxu0  ;;  %v3414_v56 = vpop.f32.mrb[27].mxu1  ;;  %v2188_v16 = vmax.f32 %v2109_v12, 0.0 }
 0x1f0   :  { %v1325_v7 = vmul.f32 %v5329_v53, %v1215_v52 }
 0x1f1   :  { %v5625_v15 = vpack.c.bf16 %v2155_v13, %v2154_v2  ;;  %v2110_v30 = vadd.f32 %v5347_v0, %v1986_v33  ;;  %v2077_v39 = vadd.f32 %v5347_v0, %v1821_v36  ;;  %v1220_v13 = vpop.permute.xlu0 %1219 }
 0x1f2   :  { %v1825_v31 = vpop.f32.mrb[74].mxu0  ;;  %v1990_v34 = vpop.f32.mrb[28].mxu1 }
 0x1f3   :  { %v2189_v26 = vmax.f32 %v2110_v30, 0.0  ;;  %v1826_v23 = vadd.f32 %v1825_v31, %v1290_v9  ;;  %v1991_v3 = vadd.f32 %v1990_v34, %v1323_v49  ;;  %v3318_v24 = vpop.f32.mrb[75].mxu0  ;;  %v3417_v58 = vpop.f32.mrb[29].mxu1  ;;  %v2156_v25 = vmax.f32 %v2077_v39, 0.0 }
 0x1f4   :  { %v1326_v34 = vmul.f32 %v5329_v53, %v1220_v13 }
 0x1f5   :  { %v5632_v44 = vpack.c.bf16 %v2189_v26, %v2188_v16  ;;  %v2078_v1 = vadd.f32 %v5347_v0, %v1826_v23  ;;  %v2111_v29 = vadd.f32 %v5347_v0, %v1991_v3  ;;  %v1225_v16 = vpop.permute.xlu1 %1224 }
 0x1f6   :  { %v1830_v17 = vpop.f32.mrb[76].mxu0  ;;  %v1995_v37 = vpop.f32.mrb[30].mxu1 }
 0x1f7   :  { %v2157_v50 = vmax.f32 %v2078_v1, 0.0  ;;  %v1831_v10 = vadd.f32 %v1830_v17, %v1291_v51  ;;  %v1996_v59 = vadd.f32 %v1995_v37, %v1324_v14  ;;  %v3321_v2 = vpop.f32.mrb[77].mxu0  ;;  %v3420_v18 = vpop.f32.mrb[31].mxu1  ;;  %v2190_v9 = vmax.f32 %v2111_v29, 0.0 }
 0x1f8   :  { %v1327_v37 = vmul.f32 %v5329_v53, %v1225_v16 }
 0x1f9   :  { %v5639_v12 = vpack.c.bf16 %v2157_v50, %v2156_v25  ;;  %v2112_v36 = vadd.f32 %v5347_v0, %v1996_v59  ;;  %v2079_v33 = vadd.f32 %v5347_v0, %v1831_v10  ;;  %v1230_v50 = vpop.permute.xlu0 %1229 }
 0x1fa   :  { %v1835_v43 = vpop.f32.mrb[78].mxu0  ;;  %v2000_v56 = vpop.f32.mrb[32].mxu1 }
 0x1fb   :  { %v2191_v49 = vmax.f32 %v2112_v36, 0.0  ;;  %v1836_v54 = vadd.f32 %v1835_v43, %v1292_v19  ;;  %v2001_v30 = vadd.f32 %v2000_v56, %v1325_v7  ;;  %v3324_v39 = vpop.f32.mrb[79].mxu0  ;;  %v3423_v31 = vpop.f32.mrb[33].mxu1  ;;  %v2158_v3 = vmax.f32 %v2079_v33, 0.0 }
 0x1fc   :  { %v1328_v56 = vmul.f32 %v5329_v53, %v1230_v50 }
 0x1fd   :  { %v5646_v26 = vpack.c.bf16 %v2191_v49, %v2190_v9  ;;  %v2080_v23 = vadd.f32 %v5347_v0, %v1836_v54  ;;  %v2113_v14 = vadd.f32 %v5347_v0, %v2001_v30  ;;  %v1235_v9 = vpop.permute.xlu1 %1234 }
 0x1fe   :  { %v1840_v24 = vpop.f32.mrb[80].mxu0  ;;  %v2005_v58 = vpop.f32.mrb[34].mxu1 }
 0x1ff   :  { %v2159_v51 = vmax.f32 %v2080_v23, 0.0  ;;  %v1841_v52 = vadd.f32 %v1840_v24, %v1293_v62  ;;  %v2006_v1 = vadd.f32 %v2005_v58, %v1326_v34  ;;  %v3327_v25 = vpop.f32.mrb[81].mxu0  ;;  %v3426_v17 = vpop.f32.mrb[35].mxu1  ;;  %v2192_v19 = vmax.f32 %v2113_v14, 0.0 }
 0x200   :  { %v1329_v58 = vmul.f32 %v5329_v53, %v1235_v9  ;;  %v1297_v53 = vmul.f32 %v5674_v48, %v5523_v61 }
 0x201   :  { %v5653_v29 = vpack.c.bf16 %v2159_v51, %v2158_v3  ;;  %v2114_v10 = vadd.f32 %v5347_v0, %v2006_v1  ;;  %v2081_v59 = vadd.f32 %v5347_v0, %v1841_v52  ;;  %v1240_v51 = vpop.permute.xlu0 %1239 }
 0x202   :  { %v1845_v2 = vpop.f32.mrb[82].mxu0  ;;  %v2010_v18 = vpop.f32.mrb[36].mxu1 }
 0x203   :  { %v2193_v7 = vmax.f32 %v2114_v10, 0.0  ;;  %v1846_v13 = vadd.f32 %v1845_v2, %v1294_v55  ;;  %v2011_v36 = vadd.f32 %v2010_v18, %v1327_v37  ;;  %v3330_v33 = vpop.f32.mrb[83].mxu0  ;;  %v3429_v43 = vpop.f32.mrb[37].mxu1  ;;  %v2160_v30 = vmax.f32 %v2081_v59, 0.0 }
 0x204   :  { %v1330_v18 = vmul.f32 %v5674_v48, %v1240_v51 }
 0x205   :  { %v5660_v49 = vpack.c.bf16 %v2193_v7, %v2192_v19  ;;  %v2082_v54 = vadd.f32 %v5347_v0, %v1846_v13  ;;  %v2115_v34 = vadd.f32 %v5347_v0, %v2011_v36 }
 0x206   :  { %v1850_v39 = vpop.f32.mrb[84].mxu0  ;;  %v2015_v31 = vpop.f32.mrb[38].mxu1 }
 0x207   :  { %v2161_v62 = vmax.f32 %v2082_v54, 0.0  ;;  %v1851_v16 = vadd.f32 %v1850_v39, %v1295_v38  ;;  %v2016_v23 = vadd.f32 %v2015_v31, %v1328_v56  ;;  %v3333_v3 = vpop.f32.mrb[85].mxu0  ;;  %v3432_v24 = vpop.f32.mrb[39].mxu1  ;;  %v2194_v55 = vmax.f32 %v2115_v34, 0.0  ;;  %v5690_v31 = vld [vmem:[%s5917_s6] ss:$0 sm:$0xff] }
 0x208   :  { %v1298_v39 = vmul.f32 %v5674_v48, %v5530_v60  ;;  %v1299_v60 = vmul.f32 %v5674_v48, %v5553_v42  ;;  %v1301_v42 = vmul.f32 %v5674_v48, %v5382_v45 }
 0x209   :  { %v5667_v14 = vpack.c.bf16 %v2161_v62, %v2160_v30  ;;  %v2116_v52 = vadd.f32 %v5347_v0, %v2016_v23  ;;  %v2083_v1 = vadd.f32 %v5347_v0, %v1851_v16 }
 0x20a   :  { %v1855_v25 = vpop.f32.mrb[86].mxu0  ;;  %v2020_v17 = vpop.f32.mrb[40].mxu1 }
 0x20b   :  { %v2195_v37 = vmax.f32 %v2116_v52, 0.0  ;;  %v1856_v50 = vadd.f32 %v1855_v25, %v1296_v11  ;;  %v2021_v10 = vadd.f32 %v2020_v17, %v1329_v58  ;;  %v3336_v59 = vpop.f32.mrb[87].mxu0  ;;  %v3435_v2 = vpop.f32.mrb[41].mxu1  ;;  %v2162_v13 = vmax.f32 %v2083_v1, 0.0 }
 0x20d   :  { %v5679_v19 = vpack.c.bf16 %v2195_v37, %v2194_v55  ;;  %v2084_v7 = vadd.f32 %v5347_v0, %v1856_v50  ;;  %v2117_v38 = vadd.f32 %v5347_v0, %v2021_v10  ;;  %v1300_v50 = vmul.f32 %v5674_v48, %v5562_v22 }
 0x20e   :  { %v1860_v36 = vpop.f32.mrb[88].mxu0  ;;  %v2025_v33 = vpop.f32.mrb[42].mxu1  ;;  %v1302_v22 = vmul.f32 %v5674_v48, %v5386_v47 }
 0x20f   :  { %v2163_v43 = vmax.f32 %v2084_v7, 0.0  ;;  %v1861_v56 = vadd.f32 %v1860_v36, %v1297_v53  ;;  %v2026_v9 = vadd.f32 %v2025_v33, %v1330_v18  ;;  %v3339_v54 = vpop.f32.mrb[89].mxu0  ;;  %v3438_v30 = vpop.f32.mrb[43].mxu1  ;;  %v2196_v0 = vmax.f32 %v2117_v38, 0.0 }
 0x211   :  { %v5685_v61 = vpack.c.bf16 %v2163_v43, %v2162_v13  ;;  %v2118_v62 = vadd.f32 %v5690_v31, %v2026_v9  ;;  %v2085_v23 = vadd.f32 %v5690_v31, %v1861_v56 }
 0x212   :  { %v1865_v34 = vpop.f32.mrb[90].mxu0  ;;  %v5693_v16 = vpop.f32.mrb[44].mxu1 }
 0x213   :  { %v2197_v3 = vmax.f32 %v2118_v62, 0.0  ;;  %v1866_v24 = vadd.f32 %v1865_v34, %v1298_v39  ;;  %v3342_v11 = vpop.f32.mrb[91].mxu0  ;;  %v3441_v58 = vpop.f32.mrb[45].mxu1  ;;  %v2164_v25 = vmax.f32 %v2085_v23, 0.0  ;;  %v1303_v62 = vmul.f32 %v5674_v48, %v5402_v21 }
 0x214   :  { %v1304_v11 = vmul.f32 %v5674_v48, %v5407_v4  ;;  %v1305_v21 = vmul.f32 %v5674_v48, %v5422_v28  ;;  %v1306_v4 = vmul.f32 %v5674_v48, %v5426_v63  ;;  %v1307_v28 = vmul.f32 %v5674_v48, %v5442_v32 }
 0x215   :  { %v5698_v51 = vpack.c.bf16 %v2197_v3, %v2196_v0  ;;  %v2086_v52 = vadd.f32 %v5690_v31, %v1866_v24  ;;  %v1308_v63 = vmul.f32 %v5674_v48, %v5447_v5  ;;  %v6026_v5 = vmov 0.0|0.0  }
 0x216   :  { %v1870_v1 = vpop.f32.mrb[92].mxu0 }
 0x217   :  { %v2165_v17 = vmax.f32 %v2086_v52, 0.0  ;;  %v1871_v55 = vadd.f32 %v1870_v1, %v1299_v60  ;;  %v3345_v37 = vpop.f32.mrb[93].mxu0 }
 0x219   :  { %v5703_v10 = vpack.c.bf16 %v2165_v17, %v2164_v25  ;;  %v2087_v2 = vadd.f32 %v5690_v31, %v1871_v55 }
 0x21a   :  { %v1875_v59 = vpop.f32.mrb[94].mxu0 }
 0x21b   :  { %v1876_v53 = vadd.f32 %v1875_v59, %v1300_v50  ;;  %v3348_v18 = vpop.f32.mrb[95].mxu0  ;;  %v2166_v36 = vmax.f32 %v2087_v2, 0.0 }
 0x21d   :  { %v2088_v7 = vadd.f32 %v5690_v31, %v1876_v53 }
 0x21e   :  { %v1880_v13 = vpop.f32.mrb[96].mxu0 }
 0x21f   :  { %v2167_v33 = vmax.f32 %v2088_v7, 0.0  ;;  %v1881_v43 = vadd.f32 %v1880_v13, %v1301_v42  ;;  %v3351_v38 = vpop.f32.mrb[97].mxu0 }
 0x221   :  { %v3620_v56 = vpack.c.bf16 %v2167_v33, %v2166_v36  ;;  %v2089_v54 = vadd.f32 %v5690_v31, %v1881_v43 }
 0x222   :  { %v1885_v9 = vpop.f32.mrb[98].mxu0 }
 0x223   :  { %v1886_v30 = vadd.f32 %v1885_v9, %v1302_v22  ;;  %v3354_v39 = vpop.f32.mrb[99].mxu0  ;;  %v2168_v0 = vmax.f32 %v2089_v54, 0.0 }
 0x225   :  { %v2090_v45 = vadd.f32 %v5690_v31, %v1886_v30 }
 0x226   :  { %v1890_v34 = vpop.f32.mrb[100].mxu0 }
 0x227   :  { %v2169_v23 = vmax.f32 %v2090_v45, 0.0  ;;  %v1891_v3 = vadd.f32 %v1890_v34, %v1303_v62  ;;  %v3357_v24 = vpop.f32.mrb[101].mxu0 }
 0x228   :  { %v2533_v24 = vld [vmem:[%s5920_s9] sm:$0xff] }
 0x229   :  { %v3590_v47 = vpack.c.bf16 %v2169_v23, %v2168_v0  ;;  %v2091_v60 = vadd.f32 %v5690_v31, %v1891_v3 }
 0x22a   :  { %v1895_v58 = vpop.f32.mrb[102].mxu0 }
 0x22b   :  { %v1896_v52 = vadd.f32 %v1895_v58, %v1304_v11  ;;  %v3360_v1 = vpop.f32.mrb[103].mxu0  ;;  %3591 = vmatprep.subr.bf16.mxu1 %v3590_v47  ;;  %v2170_v55 = vmax.f32 %v2091_v60, 0.0  ;;  %v2534_v11 = vld [vmem:[%s5920_s9 + $0x8] sm:$0xff] }
 0x22c   :  { %3593 = vmatpush3.bf16.msra.mxu1 %v5611_v35  ;;  %v3656_v58 = vpack.c.bf16 %v2534_v11, %v2533_v24  ;;  %v2535_v1 = vld [vmem:[%s5920_s9 + $0x10] sm:$0xff] }
 0x22d   :  { %v2092_v25 = vadd.f32 %v5690_v31, %v1896_v52 }
 0x22e   :  { %v1900_v17 = vpop.f32.mrb[104].mxu0 }
 0x22f   :  { %v2171_v37 = vmax.f32 %v2092_v25, 0.0  ;;  %v1901_v50 = vadd.f32 %v1900_v17, %v1305_v21  ;;  %v3363_v59 = vpop.f32.mrb[105].mxu0  ;;  %v2536_v21 = vld [vmem:[%s5920_s9 + $0x18] sm:$0xff]  ;;  %v2537_v17 = vld [vmem:[%s5920_s9 + $0x20] sm:$0x3] }
 0x230   :  { %v3659_v25 = vpack.c.bf16 %v2536_v21, %v2535_v1 }
 0x231   :  { %v3594_v2 = vpack.c.bf16 %v2171_v37, %v2170_v55  ;;  %v2093_v18 = vadd.f32 %v5690_v31, %v1901_v50  ;;  %v2621_v55 = vld [vmem:[%s5921_s11] sm:$0xff]  ;;  %v2622_v37 = vld [vmem:[%s5921_s11 + $0x8] sm:$0xff] }
 0x232   :  { %v1905_v53 = vpop.f32.mrb[106].mxu0  ;;  %v2976_v50 = vld [vmem:[%s5922_s8] ss:$0 sm:$0xff] }
 0x233   :  { %v1906_v42 = vadd.f32 %v1905_v53, %v1306_v4  ;;  %v3366_v7 = vpop.f32.mrb[107].mxu0  ;;  %3595 = vmatprep.subr.bf16.mxu1 %v3594_v2  ;;  %v2172_v36 = vmax.f32 %v2093_v18, 0.0  ;;  %v3662_v4 = vpack.c.bf16 %v2622_v37, %v2621_v55  ;;  %v2623_v18 = vld [vmem:[%s5921_s11 + $0x10] sm:$0xff] }
 0x234   :  { %3597 = vmatpush3.bf16.msra.mxu1 %v5625_v15 }
 0x235   :  { %v2094_v35 = vadd.f32 %v5690_v31, %v1906_v42  ;;  %v2624_v42 = vld [vmem:[%s5921_s11 + $0x18] sm:$0xff] }
 0x236   :  { %v1910_v13 = vpop.f32.mrb[108].mxu0  ;;  %v3665_v7 = vpack.c.bf16 %v2624_v42, %v2623_v18 }
 0x237   :  { %v2173_v33 = vmax.f32 %v2094_v35, 0.0  ;;  %v1911_v43 = vadd.f32 %v1910_v13, %v1307_v28  ;;  %v3369_v38 = vpop.f32.mrb[109].mxu0  ;;  %v2625_v28 = vld [vmem:[%s5921_s11 + $0x20] sm:$0x3]  ;;  %v2710_v13 = vld [vmem:[%s5923_s13 + $0x8] sm:$0xff] }
 0x238   :  { %v2709_v35 = vld [vmem:[%s5923_s13] sm:$0xff] }
 0x239   :  { %v3598_v22 = vpack.c.bf16 %v2173_v33, %v2172_v36  ;;  %v2095_v54 = vadd.f32 %v5690_v31, %v1911_v43  ;;  %v2978_v36 = vld [vmem:[%s5924_s10] ss:$0 sm:$0xff]  ;;  %v3668_v43 = vpack.c.bf16 %v2710_v13, %v2709_v35 }
 0x23a   :  { %v1915_v9 = vpop.f32.mrb[110].mxu0 }
 0x23b   :  { %v1916_v30 = vadd.f32 %v1915_v9, %v1308_v63  ;;  %v3372_v39 = vpop.f32.mrb[111].mxu0  ;;  %3599 = vmatprep.subr.bf16.mxu1 %v3598_v22  ;;  %v2174_v15 = vmax.f32 %v2095_v54, 0.0  ;;  %v2711_v22 = vld [vmem:[%s5923_s13 + $0x10] sm:$0xff]  ;;  %v2712_v9 = vld [vmem:[%s5923_s13 + $0x18] sm:$0xff] }
 0x23c   :  { %3601 = vmatpush3.bf16.msra.mxu1 %v5639_v12  ;;  %v2446_v12 = vld [vmem:[%s5919_s7 + $0x10] sm:$0xff]  ;;  %v3671_v54 = vpack.c.bf16 %v2712_v9, %v2711_v22  ;;  %v2798_v39 = vld [vmem:[%s5925_s15] sm:$0xff] }
 0x23d   :  { %v2096_v32 = vadd.f32 %v5690_v31, %v1916_v30  ;;  %v2713_v30 = vld [vmem:[%s5923_s13 + $0x20] sm:$0x3] }
 0x23f   :  { %v2175_v62 = vmax.f32 %v2096_v32, 0.0  ;;  %v2799_v32 = vld [vmem:[%s5925_s15 + $0x8] sm:$0xff] }
 0x241   :  { %v3602_v45 = vpack.c.bf16 %v2175_v62, %v2174_v15  ;;  %v2981_v15 = vld [vmem:[%s5926_s12] ss:$0 sm:$0xff] }
 0x243   :  { %3603 = vmatprep.subr.bf16.mxu1 %v3602_v45  ;;  %v3674_v45 = vpack.c.bf16 %v2799_v32, %v2798_v39 }
 0x244   :  { %3605 = vmatpush3.bf16.msra.mxu1 %v5653_v29  ;;  %v2447_v29 = vld [vmem:[%s5919_s7 + $0x18] sm:$0xff] }
 0x245   :  { %3607 = vmatprep.subr.bf16.mxu1 %v5540_v6  ;;  %v1245_v6 = vpop.permute.xlu1 %1244 }
 0x248   :  { %3609 = vmatpush3.bf16.msra.mxu1 %v5667_v14  ;;  %v2448_v14 = vld [vmem:[%s5919_s7 + $0x20] sm:$0xff] }
 0x249   :  { %3611 = vmatprep.subr.bf16.mxu1 %v5556_v46  ;;  %v1331_v46 = vmul.f32 %v5674_v48, %v1245_v6  ;;  %v2449_v48 = vld [vmem:[%s5919_s7 + $0x28] sm:$0xff] }
 0x24c   :  { %3613 = vmatpush3.bf16.msra.mxu1 %v5685_v61 }
 0x24d   :  { %3615 = vmatprep.subr.bf16.mxu1 %v5571_v57  ;;  %v2031_v57 = vadd.f32 %v5693_v16, %v1331_v46 }
 0x250   :  { %3617 = vmatpush3.bf16.msra.mxu1 %v5703_v10  ;;  %v2451_v10 = vld [vmem:[%s5919_s7 + $0x38] sm:$0xff] }
 0x251   :  { %3619 = vmatprep.subr.bf16.mxu1 %v5586_v8  ;;  %v2119_v8 = vadd.f32 %v5690_v31, %v2031_v57  ;;  %v2800_v57 = vld [vmem:[%s5925_s15 + $0x10] sm:$0xff] }
 0x254   :  { %3621 = vmatpush3.bf16.msra.mxu1 %v3620_v56 }
 0x255   :  { %3622 = vmatprep.subr.bf16.mxu1 %v6026_v5 }
 0x257   :  { %2369 = vmatmul.mubr.f32.vlgmr.msra.gmra.mrb[48].mxu1 %v5590_v41  ;;  %v2198_v41 = vmax.f32 %v2119_v8, 0.0  ;;  %v2801_v8 = vld [vmem:[%s5925_s15 + $0x18] sm:$0xff] }
 0x258   :  { %3624 = vmatpush3.bf16.msra.mxu1 %v5603_v20  ;;  %3472 = vmatprep.mubr.msk.f32.mxu1 %vm3706_vm0, %v5974_v27  ;;  %v2974_v20 = vld.sshfl [vmem:[%s5918_s3 + $0x8] sm:$0x3 pattern:$0x76325410] }
 0x259   :  { %3625 = vmatprep.subr.bf16.mxu1 %v6026_v5 }
 0x25c   :  { %3627 = vmatpush3.bf16.msra.mxu1 %v5618_v40  ;;  %v2444_v40 = vld [vmem:[%s5919_s7] sm:$0xff] }
 0x25d   :  { %3628 = vmatprep.subr.bf16.mxu1 %v6026_v5 }
 0x260   :  { %3630 = vmatpush3.bf16.msra.mxu1 %v5632_v44  ;;  %v2445_v44 = vld [vmem:[%s5919_s7 + $0x8] sm:$0xff] }
 0x261   :  { %3631 = vmatprep.subr.bf16.mxu1 %v6026_v5 }
 0x264   :  { %3633 = vmatpush3.bf16.msra.mxu1 %v5646_v26  ;;  %v3644_v26 = vpack.c.bf16 %v2445_v44, %v2444_v40  ;;  %v2803_v40 = vld [vmem:[%s5925_s15 + $0x28] sm:$0xff] }
 0x265   :  { %3634 = vmatprep.subr.bf16.mxu1 %v6026_v5 }
 0x268   :  { %3636 = vmatpush3.bf16.msra.mxu1 %v5660_v49  ;;  %v3647_v49 = vpack.c.bf16 %v2447_v29, %v2446_v12  ;;  %v2805_v12 = vld [vmem:[%s5925_s15 + $0x38] sm:$0xff]  ;;  %v2984_v29 = vld [vmem:[%s5927_s14] ss:$0 sm:$0xff] }
 0x269   :  { %3637 = vmatprep.subr.bf16.mxu1 %v6026_v5 }
 0x26c   :  { %3639 = vmatpush3.bf16.msra.mxu1 %v5679_v19  ;;  %v3650_v19 = vpack.c.bf16 %v2449_v48, %v2448_v14 }
 0x26d   :  { %3640 = vmatprep.subr.bf16.mxu1 %v6026_v5 }
 0x270   :  { %3642 = vmatpush3.bf16.msra.mxu1 %v5698_v51  ;;  %v2450_v51 = vld [vmem:[%s5919_s7 + $0x30] sm:$0xff] }
 0x271   :  { %3470 = vmatprep.subr.mxu1 %v5974_v27  ;;  %v3653_v56 = vpack.c.bf16 %v2451_v10, %v2450_v51 }
 0x274   :  { %3471 = vmatpush3.msra.mxu1 %v2198_v41  ;;  %v3677_v41 = vpack.c.bf16 %v2801_v8, %v2800_v57 }
 0x275   :  { %3473 = vmatmul.mubr.msk.f32.vlgmr.msra.gmra.mrb[50].mxu1 %vm2231_vm3, %v2974_v20  ;;  %3643 = vmatprep.subr.bf16.mxu1 %v6026_v5  ;;  %v2802_v20 = vld [vmem:[%s5925_s15 + $0x20] sm:$0xff] }
 0x276   :  { %3491 = vmatprep.mubr.msk.f32.mxu1 %vm3706_vm0, %v5974_v27  ;;  %3645 = vmatpush3.bf16.msra.mxu1 %v3644_v26  ;;  %v3680_v44 = vpack.c.bf16 %v2803_v40, %v2802_v20 }
 0x277   :  { %3646 = vmatprep.subr.bf16.mxu1 %v6026_v5 }
 0x27a   :  { %3648 = vmatpush3.bf16.msra.mxu1 %v3647_v49 }
 0x27b   :  { %3649 = vmatprep.subr.bf16.mxu1 %v6026_v5 }
 0x27e   :  { %3651 = vmatpush3.bf16.msra.mxu1 %v3650_v19 }
 0x27f   :  { %3652 = vmatprep.subr.bf16.mxu1 %v6026_v5 }
 0x282   :  { %3654 = vmatpush3.bf16.msra.mxu1 %v3653_v56 }
 0x283   :  { %3655 = vmatprep.subr.bf16.mxu1 %v6026_v5 }
 0x2ba   :  { %v3105_v61 = vpop.f32.mrb[46].mxu1 }
 0x2bb   :  { %v3106_v31 = vpop.f32.mrb[47].mxu1 }
 0x2bc   :  { %v3107_v16 = vadd.f32 %v3106_v31, %v3105_v61 }
 0x32a   :  { %v3140_v34 = vpop.f32.mrb[48].mxu1 }
 0x32b   :  { %v3141_v0 = vpop.f32.mrb[49].mxu1 }
 0x32c   :  { %v3142_v23 = vadd.f32 %v3141_v0, %v3140_v34 }
 0x32e   :  { %v2371_v3 = vadd.f32 %v3142_v23, %v3107_v16 }
 0x348   :  { %v2440_v47 = vpop.f32.mrb[50].mxu1 }
 0x349   :  { %v2441_v60 = vadd.f32 %v2440_v47, %v2371_v3  ;;  %v3474_v52 = vpop.f32.mrb[51].mxu1 }
 0x34b   :  { %3492 = vmatmul.mubr.msk.f32.vlgmr.msra.gmra.mrb[52].mxu1 %vm2459_vm4, %v2441_v60 }
 0x34c   :  { %3657 = vmatpush3.bf16.msra.mxu1 %v3656_v58  ;;  %3504 = vmatprep.mubr.msk.f32.mxu1 %vm3706_vm0, %v5974_v27 }
 0x34d   :  { %3658 = vmatprep.subr.bf16.mxu1 %v6026_v5 }
 0x350   :  { %3660 = vmatpush3.bf16.msra.mxu1 %v3659_v25 }
 0x351   :  { %3502 = vmatprep.subr.mxu1 %v5974_v27 }
 0x354   :  { %3503 = vmatpush3.msk.msra.mxu1 %vm1570_vm1, %v2537_v17 }
 0x355   :  { %3661 = vmatprep.subr.bf16.mxu1 %v6026_v5 }
 0x41e   :  { %v2529_v59 = vpop.f32.mrb[52].mxu1 }
 0x41f   :  { %v2530_v2 = vadd.f32 %v2976_v50, %v2529_v59  ;;  %v3493_v53 = vpop.f32.mrb[53].mxu1 }
 0x421   :  { %3505 = vmatmul.mubr.msk.f32.vlgmr.msra.gmra.mrb[54].mxu1 %vm1332_vm2, %v2530_v2 }
 0x422   :  { %3663 = vmatpush3.bf16.msra.mxu1 %v3662_v4  ;;  %3517 = vmatprep.mubr.msk.f32.mxu1 %vm3706_vm0, %v5974_v27 }
 0x423   :  { %3664 = vmatprep.subr.bf16.mxu1 %v6026_v5 }
 0x426   :  { %3666 = vmatpush3.bf16.msra.mxu1 %v3665_v7 }
 0x427   :  { %3515 = vmatprep.subr.mxu1 %v5974_v27 }
 0x42a   :  { %3516 = vmatpush3.msk.msra.mxu1 %vm1570_vm1, %v2625_v28 }
 0x42b   :  { %3667 = vmatprep.subr.bf16.mxu1 %v6026_v5 }
 0x4f4   :  { %v2617_v33 = vpop.f32.mrb[54].mxu1 }
 0x4f5   :  { %v2618_v38 = vadd.f32 %v2978_v36, %v2617_v33  ;;  %v3506_v63 = vpop.f32.mrb[55].mxu1 }
 0x4f7   :  { %3518 = vmatmul.mubr.msk.f32.vlgmr.msra.gmra.mrb[56].mxu1 %vm1332_vm2, %v2618_v38 }
 0x4f8   :  { %3669 = vmatpush3.bf16.msra.mxu1 %v3668_v43  ;;  %3530 = vmatprep.mubr.msk.f32.mxu1 %vm3706_vm0, %v5974_v27 }
 0x4f9   :  { %3670 = vmatprep.subr.bf16.mxu1 %v6026_v5 }
 0x4fc   :  { %3672 = vmatpush3.bf16.msra.mxu1 %v3671_v54 }
 0x4fd   :  { %3528 = vmatprep.subr.mxu1 %v5974_v27 }
 0x500   :  { %3529 = vmatpush3.msk.msra.mxu1 %vm1570_vm1, %v2713_v30 }
 0x501   :  { %3673 = vmatprep.subr.bf16.mxu1 %v6026_v5 }
 0x5ca   :  { %v2705_v62 = vpop.f32.mrb[56].mxu1 }
 0x5cb   :  { %v2706_v6 = vadd.f32 %v2981_v15, %v2705_v62  ;;  %v3519_v46 = vpop.f32.mrb[57].mxu1 }
 0x5cd   :  { %3531 = vmatmul.mubr.msk.f32.vlgmr.msra.gmra.mrb[58].mxu1 %vm1332_vm2, %v2706_v6 }
 0x5ce   :  { %3675 = vmatpush3.bf16.msra.mxu1 %v3674_v45  ;;  %3549 = vmatprep.mubr.msk.f32.mxu1 %vm3706_vm0, %v5974_v27  ;;  %v2804_v27 = vld [vmem:[%s5925_s15 + $0x30] sm:$0xff] }
 0x5cf   :  { %3676 = vmatprep.subr.bf16.mxu1 %v6026_v5  ;;  %v3683_v26 = vpack.c.bf16 %v2805_v12, %v2804_v27 }
 0x5d2   :  { %3678 = vmatpush3.bf16.msra.mxu1 %v3677_v41 }
 0x5d3   :  { %3679 = vmatprep.subr.bf16.mxu1 %v6026_v5 }
 0x5d6   :  { %3681 = vmatpush3.bf16.msra.mxu1 %v3680_v44 }
 0x5d7   :  { %3682 = vmatprep.subr.bf16.mxu1 %v6026_v5  ;;  %v2987_v5 = vld [vmem:[%s5928_s16] ss:$0 sm:$0xff] }
 0x5da   :  { %3684 = vmatpush3.bf16.msra.mxu1 %v3683_v26 }
 0x6a0   :  { %v2793_v49 = vpop.f32.mrb[58].mxu1 }
 0x6a1   :  { %v2794_v14 = vadd.f32 %v2984_v29, %v2793_v49  ;;  %v3532_v48 = vpop.f32.mrb[59].mxu1 }
 0x6a3   :  { %v2797_v19 = vmax.f32 %v2794_v14, 0.0 }
 0x6a5   :  { %3550 = vmatmul.mubr.msk.f32.vlgmr.msra.gmra.mrb[60].mxu1 %vm2459_vm4, %v2797_v19 }
 0x778   :  { %v2882_v61 = vpop.f32.mrb[60].mxu1 }
 0x779   :  { %v2883_v31 = vadd.f32 %v2987_v5, %v2882_v61  ;;  %v3551_v16 = vpop.f32.mrb[61].mxu1 }
 0x77b   :  { %2887 = vst.msk [vmem:[%s5929_s17] sm:$0x3] %vm2886_vm5, %v2883_v31 }

</bundles_post_ra>
